<compile_context>
chip_gen: v7x
topology: tpu7x:2x2x1
jax: 0.10.0
libtpu: 0.0.40
codegen_flags: <defaults>
</compile_context>

<pallas_src>
import functools

import jax
import jax.numpy as jnp
from jax.experimental import pallas as pl
from jax.experimental.pallas import tpu as pltpu


# ----------------- fused 1x1 conv + dilated depthwise 3x3 conv -----------------

def _qkv_dwconv_kernel(x_ref, m_ref, wq_ref, bq_ref, wd_ref, bd_ref, o_ref,
                       *, pad, dil, th, W):
    """One (batch, row-strip): qkv = DWConv3x3_dil( Conv1x1(x) ), channels lane-dense."""
    si = pl.program_id(1)
    row0 = si * th                       # first output row of this strip
    rows = th + 2 * pad                  # haloed rows needed from the padded input

    # --- fused 1x1 conv on the haloed strip (MXU, f32 accumulate) ---------------
    xs = x_ref[0, pl.ds(row0, rows), :, :].astype(jnp.float32)      # (rows, Wpp, Cin)
    wpp, cin = xs.shape[1], xs.shape[2]
    c3p = o_ref.shape[3]
    q1 = jnp.dot(xs.reshape(rows * wpp, cin),
                 wq_ref[...].astype(jnp.float32),
                 preferred_element_type=jnp.float32)                # (rows*Wpp, C3p)
    q1 = (q1 + bq_ref[...].astype(jnp.float32)).reshape(rows, wpp, c3p)

    # Zero the dwconv's padding halo: the reference applies the 1x1 conv *before* the
    # dwconv's zero padding, so the halo must be exactly 0 (not the 1x1-conv bias).
    q1 = q1 * m_ref[pl.ds(row0, rows), :, :].astype(jnp.float32)    # (rows, Wpp, 1) bcast

    # --- dilated depthwise 3x3: 9 shifted multiply-accumulates (VPU) ------------
    wd = wd_ref[...].astype(jnp.float32)                            # (9, C3p) tap-major
    acc = jnp.zeros((th, W, c3p), jnp.float32)
    for t in range(9):                                              # static unroll
        di = (t // 3) * dil
        dj = (t % 3) * dil
        acc = acc + q1[di:di + th, dj:dj + W, :] * wd[t][None, None, :]
    acc = acc + bd_ref[...].astype(jnp.float32)[None, :, :]         # (1,1,C3p) bias
    o_ref[0] = acc.astype(o_ref.dtype)                              # lane-dense store (C3p=128k)


def _largest_divisor_leq(n, cap):
    cap = max(1, min(n, cap))
    for d in range(cap, 0, -1):
        if n % d == 0:
            return d
    return 1


def qkv_dwconv(x_nhwc, w_qkv, b_qkv, w_dw, b_dw, *, dilation=2):
    """Fused Conv2d(Cin, C3, 1) + depthwise Conv2d(C3, C3, 3, dil=2, pad=2, groups=C3).

    x_nhwc: (b, H, W, Cin).  Weights already zero-padded to C3p (multiple of 128) channels.
    Returns (b, H, W, C3p)."""
    b, H, W, cin = x_nhwc.shape
    c3p = w_qkv.shape[1]
    pad = dilation

    # Spatial halo padding; padded width rounded to a sublane multiple so the in-kernel
    # (rows, Wpp, Cin) -> (rows*Wpp, Cin) reshape is layout-preserving.
    wpp = -(-(W + 2 * pad) // 8) * 8
    xp = jnp.pad(x_nhwc, ((0, 0), (pad, pad), (pad, wpp - W - pad), (0, 0)))
    hp = H + 2 * pad

    # Interior mask (1 inside the original image, 0 in the halo), shared across batches.
    row_in = (jnp.arange(hp) >= pad) & (jnp.arange(hp) < H + pad)
    col_in = (jnp.arange(wpp) >= pad) & (jnp.arange(wpp) < W + pad)
    mask = (row_in[:, None] & col_in[None, :]).astype(x_nhwc.dtype)[:, :, None]  # (hp, wpp, 1)

    # Row-strip tiling: ~4 MiB output strips, but >= 2 strips per batch when possible.
    tgt_rows = max(1, (4 << 20) // (W * c3p * x_nhwc.dtype.itemsize))
    th = _largest_divisor_leq(H, min(tgt_rows, max(H // 2, 1)))
    n_strips = H // th

    kern = functools.partial(_qkv_dwconv_kernel, pad=pad, dil=dilation, th=th, W=W)
    return pl.pallas_call(
        kern,
        out_shape=jax.ShapeDtypeStruct((b, H, W, c3p), x_nhwc.dtype),
        grid=(b, n_strips),
        in_specs=[
            pl.BlockSpec((1, hp, wpp, cin), lambda bi, si: (bi, 0, 0, 0)),  # resident per batch
            pl.BlockSpec((hp, wpp, 1), lambda bi, si: (0, 0, 0)),           # halo mask (resident)
            pl.BlockSpec((cin, c3p), lambda bi, si: (0, 0)),
            pl.BlockSpec((1, c3p), lambda bi, si: (0, 0)),
            pl.BlockSpec((9, c3p), lambda bi, si: (0, 0)),
            pl.BlockSpec((1, c3p), lambda bi, si: (0, 0)),
        ],
        out_specs=pl.BlockSpec((1, th, W, c3p), lambda bi, si: (bi, si, 0, 0)),
        compiler_params=pltpu.CompilerParams(
            dimension_semantics=("parallel", "parallel")),
    )(xp, mask, w_qkv, b_qkv.reshape(1, c3p), w_dw, b_dw.reshape(1, c3p))


# ------------- transposed channel attention + fused output projection -----------

def _attn_proj_kernel(qkv_ref, wp_ref, bp_ref, temp_ref, o_ref, *, dim, num_heads):
    """Per-batch channel attention + fused project_out.

    qkv_ref: (1, HW, C3p), channel order [q | k | v], each (head, c)-major.
    o_ref:   (1, dim, HW)  -> NCHW rows, lane-dense store over HW."""
    ch = dim // num_heads
    qkv = qkv_ref[0].astype(jnp.float32)                             # (HW, C3p)

    outs = []
    for hd in range(num_heads):                                      # static, small
        q = qkv[:, hd * ch:(hd + 1) * ch]                            # (HW, ch)
        k = qkv[:, dim + hd * ch:dim + (hd + 1) * ch]
        v = qkv[:, 2 * dim + hd * ch:2 * dim + (hd + 1) * ch]

        # F.normalize(x, dim=-1): x * rsqrt(max(sum x^2, 1e-24)); norm taken over HW.
        qn = q * jax.lax.rsqrt(jnp.maximum(jnp.sum(q * q, 0, keepdims=True), 1e-24))
        kn = k * jax.lax.rsqrt(jnp.maximum(jnp.sum(k * k, 0, keepdims=True), 1e-24))

        # (ch x ch) logits on the MXU, contracting the HW (sublane) axis.
        logits = jax.lax.dot_general(qn, kn, (((0,), (0,)), ((), ())),
                                     preferred_element_type=jnp.float32)
        logits = logits * temp_ref[hd]                               # SMEM scalar
        m = jnp.max(logits, -1, keepdims=True)
        p = jnp.exp(logits - m)
        attn = p / jnp.sum(p, -1, keepdims=True)                     # exact softmax (tiny)

        # out[c, n] = sum_d attn[c, d] * v[n, d]  -> (ch, HW)
        outs.append(jax.lax.dot_general(attn, v, (((1,), (1,)), ((), ())),
                                        preferred_element_type=jnp.float32))

    out_full = jnp.concatenate(outs, axis=0)                         # (dim, HW)

    # Fused project_out: y[o, n] = sum_i w_proj[i, o] * out_full[i, n] + b_proj[o]
    y = jax.lax.dot_general(wp_ref[...].astype(jnp.float32), out_full,
                            (((0,), (0,)), ((), ())),
                            preferred_element_type=jnp.float32)      # (dim, HW)
    y = y + bp_ref[...].astype(jnp.float32)                          # (dim, 1) lane-broadcast
    o_ref[0] = y.astype(o_ref.dtype)


def attention_project(qkv_flat, w_proj, b_proj, temperature, *, dim, num_heads):
    """qkv_flat: (b, HW, C3p) -> (b, dim, HW)."""
    b, hw, c3p = qkv_flat.shape
    kern = functools.partial(_attn_proj_kernel, dim=dim, num_heads=num_heads)
    return pl.pallas_call(
        kern,
        out_shape=jax.ShapeDtypeStruct((b, dim, hw), qkv_flat.dtype),
        grid=(b,),
        in_specs=[
            pl.BlockSpec((1, hw, c3p), lambda bi: (bi, 0, 0)),
            pl.BlockSpec((dim, dim), lambda bi: (0, 0)),
            pl.BlockSpec((dim, 1), lambda bi: (0, 0)),
            pl.BlockSpec(memory_space=pltpu.MemorySpace.SMEM),       # temperature (num_heads,)
        ],
        out_specs=pl.BlockSpec((1, dim, hw), lambda bi: (bi, 0, 0)),
        compiler_params=pltpu.CompilerParams(dimension_semantics=("parallel",)),
    )(qkv_flat, w_proj, b_proj.reshape(dim, 1), temperature)


# ------------------------------ module forward ---------------------------------

def init_params(key, dim, num_heads):
    ks = jax.random.split(key, 6)
    c3 = 3 * dim
    return {
        # nn.Conv2d(dim, 3*dim, 1) weight stored as (in, out) matmul weight
        'w_qkv': jax.random.normal(ks[0], (dim, c3), jnp.float32) * 0.1,
        'b_qkv': jax.random.normal(ks[1], (c3,), jnp.float32) * 0.02,
        # depthwise Conv2d(3*dim, 3*dim, 3, dilation=2, groups=3*dim):
        # torch weight (C,1,3,3) stored tap-major: w_dw[3*a+b, c] = W[c, 0, a, b]
        'w_dw': jax.random.normal(ks[2], (9, c3), jnp.float32) * 0.1,
        'b_dw': jax.random.normal(ks[3], (c3,), jnp.float32) * 0.02,
        # nn.Parameter(torch.ones(num_heads, 1, 1)) stored flat
        'temperature': jnp.ones((num_heads,), jnp.float32),
        # nn.Conv2d(dim, dim, 1) stored as (in, out)
        'w_proj': jax.random.normal(ks[4], (dim, dim), jnp.float32) * 0.1,
        'b_proj': jax.random.normal(ks[5], (dim,), jnp.float32) * 0.02,
    }


def dilated_mdta_forward(x, params, *, dim, num_heads):
    b, c, h, w = x.shape
    c3 = 3 * dim
    c3p = -(-c3 // 128) * 128                      # lane-dense channel padding

    # Zero-pad qkv / dwconv weights to the padded channel count; padded channels stay
    # exactly zero through both convs and are never read by the attention kernel.
    wq = jnp.pad(params['w_qkv'], ((0, 0), (0, c3p - c3)))
    bq = jnp.pad(params['b_qkv'], (0, c3p - c3))
    wd = jnp.pad(params['w_dw'], ((0, 0), (0, c3p - c3)))
    bd = jnp.pad(params['b_dw'], (0, c3p - c3))

    # NCHW -> NHWC (channels on the lane axis): the only wrapper-side transpose.
    x_nhwc = jnp.transpose(x, (0, 2, 3, 1))                          # (b, h, w, dim)

    qkv = qkv_dwconv(x_nhwc, wq, bq, wd, bd, dilation=2)             # (b, h, w, c3p)
    qkv_flat = qkv.reshape(b, h * w, c3p)                            # layout-preserving (free)

    y = attention_project(qkv_flat, params['w_proj'], params['b_proj'],
                          params['temperature'].astype(jnp.float32),
                          dim=dim, num_heads=num_heads)              # (b, dim, h*w)
    return y.reshape(b, dim, h, w)                                   # free -> NCHW


# ------------------------------ pure-jnp reference ------------------------------

def _reference_forward(x, params, *, dim, num_heads):
    b, c, h, w = x.shape
    hi = jax.lax.Precision.HIGHEST
    qkv = jnp.einsum('bihw,io->bohw', x, params['w_qkv'], precision=hi)
    qkv = qkv + params['b_qkv'][None, :, None, None]
    qp = jnp.pad(qkv, ((0, 0), (0, 0), (2, 2), (2, 2)))
    dw = jnp.zeros_like(qkv)
    for a in range(3):
        for bb in range(3):
            dw = dw + qp[:, :, 2 * a:2 * a + h, 2 * bb:2 * bb + w] * \
                 params['w_dw'][3 * a + bb][None, :, None, None]
    dw = dw + params['b_dw'][None, :, None, None]
    ch = dim // num_heads

    def heads(t):
        return t.reshape(b, num_heads, ch, h * w)

    q, k, v = heads(dw[:, :dim]), heads(dw[:, dim:2 * dim]), heads(dw[:, 2 * dim:])
    q = q / jnp.maximum(jnp.linalg.norm(q, axis=-1, keepdims=True), 1e-12)
    k = k / jnp.maximum(jnp.linalg.norm(k, axis=-1, keepdims=True), 1e-12)
    attn = jnp.einsum('bhcn,bhdn->bhcd', q, k, precision=hi)
    attn = attn * params['temperature'][None, :, None, None]
    attn = jax.nn.softmax(attn, axis=-1)
    out = jnp.einsum('bhcd,bhdn->bhcn', attn, v, precision=hi)
    out = out.reshape(b, dim, h, w)
    y = jnp.einsum('bihw,io->bohw', out, params['w_proj'], precision=hi)
    return y + params['b_proj'][None, :, None, None]


# ------------------------------------- main -------------------------------------

if __name__ == "__main__":
    dim = 16
    num_heads = 2
    b, h, w = 2, 16, 16

    key = jax.random.PRNGKey(0)
    kx, kp = jax.random.split(key)
    x = jax.random.normal(kx, (b, dim, h, w), jnp.float32)           # NCHW like the module
    params = init_params(kp, dim, num_heads)

    fwd = jax.jit(functools.partial(dilated_mdta_forward, dim=dim, num_heads=num_heads))
    y = jax.block_until_ready(fwd(x, params))

    assert y.shape == (b, dim, h, w), y.shape
    assert bool(jnp.all(jnp.isfinite(y)))

    y_ref = _reference_forward(x, params, dim=dim, num_heads=num_heads)
    err = float(jnp.max(jnp.abs(y - y_ref)))
    assert err < 2e-3, f"max abs error vs reference: {err}"
    print("KERNEL_OK")
</pallas_src>

<mosaic_0001>
module attributes {stable_mosaic.version = 11 : i64} {
  func.func @_qkv_dwconv_kernel(%arg0: i32, %arg1: i32, %arg2: memref<1x20x24x16xf32, #tpu.memory_space<vmem>>, %arg3: memref<20x24x1xf32, #tpu.memory_space<vmem>>, %arg4: memref<16x128xf32, #tpu.memory_space<vmem>>, %arg5: memref<1x128xf32, #tpu.memory_space<vmem>>, %arg6: memref<9x128xf32, #tpu.memory_space<vmem>>, %arg7: memref<1x128xf32, #tpu.memory_space<vmem>>, %arg8: memref<1x8x16x128xf32, #tpu.memory_space<vmem>>) attributes {dimension_semantics = [#tpu.dimension_semantics<parallel>, #tpu.dimension_semantics<parallel>], iteration_bounds = array<i64: 2, 2>, scalar_prefetch = 0 : i64, scratch_operands = 0 : i64, tpu.core_type = #tpu.core_type<tc>, window_params = [{transform_indices = @transform_0, window_bounds = array<i64: 1, 20, 24, 16>}, {pipeline_mode = #tpu.pipeline_mode<synchronous>, transform_indices = @transform_1, window_bounds = array<i64: 20, 24, 1>}, {pipeline_mode = #tpu.pipeline_mode<synchronous>, transform_indices = @transform_2, window_bounds = array<i64: 16, 128>}, {pipeline_mode = #tpu.pipeline_mode<synchronous>, transform_indices = @transform_3, window_bounds = array<i64: 1, 128>}, {pipeline_mode = #tpu.pipeline_mode<synchronous>, transform_indices = @transform_4, window_bounds = array<i64: 9, 128>}, {pipeline_mode = #tpu.pipeline_mode<synchronous>, transform_indices = @transform_5, window_bounds = array<i64: 1, 128>}, {transform_indices = @transform_6, window_bounds = array<i64: 1, 8, 16, 128>}]} {
    %c8_i32 = arith.constant 8 : i32
    %0 = arith.muli %arg1, %c8_i32 : i32
    %c0 = arith.constant 0 : index
    %1 = arith.index_cast %0 : i32 to index
    %c0_0 = arith.constant 0 : index
    %c0_1 = arith.constant 0 : index
    %2 = vector.load %arg2[%c0, %1, %c0_0, %c0_1] : memref<1x20x24x16xf32, #tpu.memory_space<vmem>>, vector<1x12x24x16xf32>
    %3 = vector.shape_cast %2 : vector<1x12x24x16xf32> to vector<12x24x16xf32>
    %4 = vector.shape_cast %3 : vector<12x24x16xf32> to vector<288x16xf32>
    %c0_2 = arith.constant 0 : index
    %c0_3 = arith.constant 0 : index
    %5 = vector.load %arg4[%c0_2, %c0_3] : memref<16x128xf32, #tpu.memory_space<vmem>>, vector<16x128xf32>
    %cst = arith.constant dense<0.000000e+00> : vector<288x128xf32>
    %6 = tpu.matmul %4, %5, %cst {dimension_numbers = #tpu.dot_dimension_numbers<[1], [0], [0], [1], [0, 0, 1, 1], [], []>} : vector<288x16xf32>, vector<16x128xf32>, vector<288x128xf32> -> vector<288x128xf32>
    %c0_4 = arith.constant 0 : index
    %c0_5 = arith.constant 0 : index
    %7 = vector.load %arg5[%c0_4, %c0_5] : memref<1x128xf32, #tpu.memory_space<vmem>>, vector<1x128xf32>
    %8 = vector.broadcast %7 : vector<1x128xf32> to vector<288x128xf32>
    %9 = arith.addf %6, %8 : vector<288x128xf32>
    %10 = vector.shape_cast %9 : vector<288x128xf32> to vector<12x24x128xf32>
    %11 = arith.index_cast %0 : i32 to index
    %c0_6 = arith.constant 0 : index
    %c0_7 = arith.constant 0 : index
    %12 = vector.load %arg3[%11, %c0_6, %c0_7] : memref<20x24x1xf32, #tpu.memory_space<vmem>>, vector<12x24x1xf32>
    %13 = vector.broadcast %12 : vector<12x24x1xf32> to vector<12x24x128xf32>
    %14 = arith.mulf %10, %13 : vector<12x24x128xf32>
    %c0_8 = arith.constant 0 : index
    %c0_9 = arith.constant 0 : index
    %15 = vector.load %arg6[%c0_8, %c0_9] : memref<9x128xf32, #tpu.memory_space<vmem>>, vector<9x128xf32>
    %cst_10 = arith.constant 0.000000e+00 : f32
    %16 = vector.broadcast %cst_10 : f32 to vector<8x16x128xf32>
    %17 = vector.extract_strided_slice %14 {offsets = [0, 0, 0], sizes = [8, 16, 128], strides = [1, 1, 1]} : vector<12x24x128xf32> to vector<8x16x128xf32>
    %18 = vector.extract_strided_slice %15 {offsets = [0, 0], sizes = [1, 128], strides = [1, 1]} : vector<9x128xf32> to vector<1x128xf32>
    %19 = vector.shape_cast %18 : vector<1x128xf32> to vector<128xf32>
    %20 = vector.shape_cast %19 : vector<128xf32> to vector<1x1x128xf32>
    %21 = vector.broadcast %20 : vector<1x1x128xf32> to vector<8x16x128xf32>
    %22 = arith.mulf %17, %21 : vector<8x16x128xf32>
    %23 = arith.addf %16, %22 : vector<8x16x128xf32>
    %24 = vector.extract_strided_slice %14 {offsets = [0, 2, 0], sizes = [8, 16, 128], strides = [1, 1, 1]} : vector<12x24x128xf32> to vector<8x16x128xf32>
    %25 = vector.extract_strided_slice %15 {offsets = [1, 0], sizes = [1, 128], strides = [1, 1]} : vector<9x128xf32> to vector<1x128xf32>
    %26 = vector.shape_cast %25 : vector<1x128xf32> to vector<128xf32>
    %27 = vector.shape_cast %26 : vector<128xf32> to vector<1x1x128xf32>
    %28 = vector.broadcast %27 : vector<1x1x128xf32> to vector<8x16x128xf32>
    %29 = arith.mulf %24, %28 : vector<8x16x128xf32>
    %30 = arith.addf %23, %29 : vector<8x16x128xf32>
    %31 = vector.extract_strided_slice %14 {offsets = [0, 4, 0], sizes = [8, 16, 128], strides = [1, 1, 1]} : vector<12x24x128xf32> to vector<8x16x128xf32>
    %32 = vector.extract_strided_slice %15 {offsets = [2, 0], sizes = [1, 128], strides = [1, 1]} : vector<9x128xf32> to vector<1x128xf32>
    %33 = vector.shape_cast %32 : vector<1x128xf32> to vector<128xf32>
    %34 = vector.shape_cast %33 : vector<128xf32> to vector<1x1x128xf32>
    %35 = vector.broadcast %34 : vector<1x1x128xf32> to vector<8x16x128xf32>
    %36 = arith.mulf %31, %35 : vector<8x16x128xf32>
    %37 = arith.addf %30, %36 : vector<8x16x128xf32>
    %38 = vector.extract_strided_slice %14 {offsets = [2, 0, 0], sizes = [8, 16, 128], strides = [1, 1, 1]} : vector<12x24x128xf32> to vector<8x16x128xf32>
    %39 = vector.extract_strided_slice %15 {offsets = [3, 0], sizes = [1, 128], strides = [1, 1]} : vector<9x128xf32> to vector<1x128xf32>
    %40 = vector.shape_cast %39 : vector<1x128xf32> to vector<128xf32>
    %41 = vector.shape_cast %40 : vector<128xf32> to vector<1x1x128xf32>
    %42 = vector.broadcast %41 : vector<1x1x128xf32> to vector<8x16x128xf32>
    %43 = arith.mulf %38, %42 : vector<8x16x128xf32>
    %44 = arith.addf %37, %43 : vector<8x16x128xf32>
    %45 = vector.extract_strided_slice %14 {offsets = [2, 2, 0], sizes = [8, 16, 128], strides = [1, 1, 1]} : vector<12x24x128xf32> to vector<8x16x128xf32>
    %46 = vector.extract_strided_slice %15 {offsets = [4, 0], sizes = [1, 128], strides = [1, 1]} : vector<9x128xf32> to vector<1x128xf32>
    %47 = vector.shape_cast %46 : vector<1x128xf32> to vector<128xf32>
    %48 = vector.shape_cast %47 : vector<128xf32> to vector<1x1x128xf32>
    %49 = vector.broadcast %48 : vector<1x1x128xf32> to vector<8x16x128xf32>
    %50 = arith.mulf %45, %49 : vector<8x16x128xf32>
    %51 = arith.addf %44, %50 : vector<8x16x128xf32>
    %52 = vector.extract_strided_slice %14 {offsets = [2, 4, 0], sizes = [8, 16, 128], strides = [1, 1, 1]} : vector<12x24x128xf32> to vector<8x16x128xf32>
    %53 = vector.extract_strided_slice %15 {offsets = [5, 0], sizes = [1, 128], strides = [1, 1]} : vector<9x128xf32> to vector<1x128xf32>
    %54 = vector.shape_cast %53 : vector<1x128xf32> to vector<128xf32>
    %55 = vector.shape_cast %54 : vector<128xf32> to vector<1x1x128xf32>
    %56 = vector.broadcast %55 : vector<1x1x128xf32> to vector<8x16x128xf32>
    %57 = arith.mulf %52, %56 : vector<8x16x128xf32>
    %58 = arith.addf %51, %57 : vector<8x16x128xf32>
    %59 = vector.extract_strided_slice %14 {offsets = [4, 0, 0], sizes = [8, 16, 128], strides = [1, 1, 1]} : vector<12x24x128xf32> to vector<8x16x128xf32>
    %60 = vector.extract_strided_slice %15 {offsets = [6, 0], sizes = [1, 128], strides = [1, 1]} : vector<9x128xf32> to vector<1x128xf32>
    %61 = vector.shape_cast %60 : vector<1x128xf32> to vector<128xf32>
    %62 = vector.shape_cast %61 : vector<128xf32> to vector<1x1x128xf32>
    %63 = vector.broadcast %62 : vector<1x1x128xf32> to vector<8x16x128xf32>
    %64 = arith.mulf %59, %63 : vector<8x16x128xf32>
    %65 = arith.addf %58, %64 : vector<8x16x128xf32>
    %66 = vector.extract_strided_slice %14 {offsets = [4, 2, 0], sizes = [8, 16, 128], strides = [1, 1, 1]} : vector<12x24x128xf32> to vector<8x16x128xf32>
    %67 = vector.extract_strided_slice %15 {offsets = [7, 0], sizes = [1, 128], strides = [1, 1]} : vector<9x128xf32> to vector<1x128xf32>
    %68 = vector.shape_cast %67 : vector<1x128xf32> to vector<128xf32>
    %69 = vector.shape_cast %68 : vector<128xf32> to vector<1x1x128xf32>
    %70 = vector.broadcast %69 : vector<1x1x128xf32> to vector<8x16x128xf32>
    %71 = arith.mulf %66, %70 : vector<8x16x128xf32>
    %72 = arith.addf %65, %71 : vector<8x16x128xf32>
    %73 = vector.extract_strided_slice %14 {offsets = [4, 4, 0], sizes = [8, 16, 128], strides = [1, 1, 1]} : vector<12x24x128xf32> to vector<8x16x128xf32>
    %74 = vector.extract_strided_slice %15 {offsets = [8, 0], sizes = [1, 128], strides = [1, 1]} : vector<9x128xf32> to vector<1x128xf32>
    %75 = vector.shape_cast %74 : vector<1x128xf32> to vector<128xf32>
    %76 = vector.shape_cast %75 : vector<128xf32> to vector<1x1x128xf32>
    %77 = vector.broadcast %76 : vector<1x1x128xf32> to vector<8x16x128xf32>
    %78 = arith.mulf %73, %77 : vector<8x16x128xf32>
    %79 = arith.addf %72, %78 : vector<8x16x128xf32>
    %c0_11 = arith.constant 0 : index
    %c0_12 = arith.constant 0 : index
    %80 = vector.load %arg7[%c0_11, %c0_12] : memref<1x128xf32, #tpu.memory_space<vmem>>, vector<1x128xf32>
    %81 = vector.shape_cast %80 : vector<1x128xf32> to vector<1x1x128xf32>
    %82 = vector.broadcast %81 : vector<1x1x128xf32> to vector<8x16x128xf32>
    %83 = arith.addf %79, %82 : vector<8x16x128xf32>
    %c0_13 = arith.constant 0 : index
    %c0_14 = arith.constant 0 : index
    %c0_15 = arith.constant 0 : index
    %c0_16 = arith.constant 0 : index
    %84 = vector.load %arg8[%c0_13, %c0_14, %c0_15, %c0_16] : memref<1x8x16x128xf32, #tpu.memory_space<vmem>>, vector<1x8x16x128xf32>
    %85 = vector.shape_cast %84 : vector<1x8x16x128xf32> to vector<8x16x128xf32>
    %86 = vector.shape_cast %83 : vector<8x16x128xf32> to vector<1x8x16x128xf32>
    tpu.vector_store %arg8[%c0_13, %c0_14, %c0_15, %c0_16], %86 {strides = array<i32>} : memref<1x8x16x128xf32, #tpu.memory_space<vmem>>, vector<1x8x16x128xf32>,
    return
  }
  func.func @transform_0(%arg0: i32, %arg1: i32) -> (i32, i32, i32, i32) {
    %c0_i32 = arith.constant 0 : i32
    %c0_i32_0 = arith.constant 0 : i32
    %c0_i32_1 = arith.constant 0 : i32
    %c0_i32_2 = arith.constant 0 : i32
    return %arg0, %c0_i32, %c0_i32_0, %c0_i32_1 : i32, i32, i32, i32
  }
  func.func @transform_1(%arg0: i32, %arg1: i32) -> (i32, i32, i32) {
    %c0_i32 = arith.constant 0 : i32
    %c0_i32_0 = arith.constant 0 : i32
    %c0_i32_1 = arith.constant 0 : i32
    %c0_i32_2 = arith.constant 0 : i32
    return %c0_i32, %c0_i32_0, %c0_i32_1 : i32, i32, i32
  }
  func.func @transform_2(%arg0: i32, %arg1: i32) -> (i32, i32) {
    %c0_i32 = arith.constant 0 : i32
    %c0_i32_0 = arith.constant 0 : i32
    %c0_i32_1 = arith.constant 0 : i32
    return %c0_i32, %c0_i32_0 : i32, i32
  }
  func.func @transform_3(%arg0: i32, %arg1: i32) -> (i32, i32) {
    %c0_i32 = arith.constant 0 : i32
    %c0_i32_0 = arith.constant 0 : i32
    %c0_i32_1 = arith.constant 0 : i32
    return %c0_i32, %c0_i32_0 : i32, i32
  }
  func.func @transform_4(%arg0: i32, %arg1: i32) -> (i32, i32) {
    %c0_i32 = arith.constant 0 : i32
    %c0_i32_0 = arith.constant 0 : i32
    %c0_i32_1 = arith.constant 0 : i32
    return %c0_i32, %c0_i32_0 : i32, i32
  }
  func.func @transform_5(%arg0: i32, %arg1: i32) -> (i32, i32) {
    %c0_i32 = arith.constant 0 : i32
    %c0_i32_0 = arith.constant 0 : i32
    %c0_i32_1 = arith.constant 0 : i32
    return %c0_i32, %c0_i32_0 : i32, i32
  }
  func.func @transform_6(%arg0: i32, %arg1: i32) -> (i32, i32, i32, i32) {
    %c0_i32 = arith.constant 0 : i32
    %c0_i32_0 = arith.constant 0 : i32
    %c0_i32_1 = arith.constant 0 : i32
    return %arg0, %arg1, %c0_i32, %c0_i32_0 : i32, i32, i32, i32
  }
}

module attributes {stable_mosaic.version = 11 : i64} {
  func.func @_attn_proj_kernel(%arg0: i32, %arg1: memref<1x256x128xf32, #tpu.memory_space<vmem>>, %arg2: memref<16x16xf32, #tpu.memory_space<vmem>>, %arg3: memref<16x1xf32, #tpu.memory_space<vmem>>, %arg4: memref<2xf32, #tpu.memory_space<smem>>, %arg5: memref<1x16x256xf32, #tpu.memory_space<vmem>>) attributes {dimension_semantics = [#tpu.dimension_semantics<parallel>], iteration_bounds = array<i64: 2>, scalar_prefetch = 0 : i64, scratch_operands = 0 : i64, tpu.core_type = #tpu.core_type<tc>, window_params = [{transform_indices = @transform_0, window_bounds = array<i64: 1, 256, 128>}, {pipeline_mode = #tpu.pipeline_mode<synchronous>, transform_indices = @transform_1, window_bounds = array<i64: 16, 16>}, {pipeline_mode = #tpu.pipeline_mode<synchronous>, transform_indices = @transform_2, window_bounds = array<i64: 16, 1>}, {transform_indices = @transform_3, window_bounds = array<i64: 2>}, {transform_indices = @transform_4, window_bounds = array<i64: 1, 16, 256>}]} {
    %c0 = arith.constant 0 : index
    %c0_0 = arith.constant 0 : index
    %c0_1 = arith.constant 0 : index
    %0 = vector.load %arg1[%c0, %c0_0, %c0_1] : memref<1x256x128xf32, #tpu.memory_space<vmem>>, vector<1x256x128xf32>
    %1 = vector.shape_cast %0 : vector<1x256x128xf32> to vector<256x128xf32>
    %2 = vector.extract_strided_slice %1 {offsets = [0, 0], sizes = [256, 8], strides = [1, 1]} : vector<256x128xf32> to vector<256x8xf32>
    %3 = vector.extract_strided_slice %1 {offsets = [0, 16], sizes = [256, 8], strides = [1, 1]} : vector<256x128xf32> to vector<256x8xf32>
    %4 = vector.extract_strided_slice %1 {offsets = [0, 32], sizes = [256, 8], strides = [1, 1]} : vector<256x128xf32> to vector<256x8xf32>
    %5 = arith.mulf %2, %2 : vector<256x8xf32>
    %cst = arith.constant dense<0.000000e+00> : vector<8xf32>
    %6 = vector.multi_reduction <add>, %5, %cst [0] : vector<256x8xf32> to vector<8xf32>
    %7 = vector.shape_cast %6 : vector<8xf32> to vector<1x8xf32>
    %cst_2 = arith.constant 1.000000e-24 : f32
    %8 = vector.broadcast %cst_2 : f32 to vector<1x8xf32>
    %9 = arith.maximumf %7, %8 : vector<1x8xf32>
    %10 = math.rsqrt %9 : vector<1x8xf32>
    %11 = vector.broadcast %10 : vector<1x8xf32> to vector<256x8xf32>
    %12 = arith.mulf %2, %11 : vector<256x8xf32>
    %13 = arith.mulf %3, %3 : vector<256x8xf32>
    %cst_3 = arith.constant dense<0.000000e+00> : vector<8xf32>
    %14 = vector.multi_reduction <add>, %13, %cst_3 [0] : vector<256x8xf32> to vector<8xf32>
    %15 = vector.shape_cast %14 : vector<8xf32> to vector<1x8xf32>
    %cst_4 = arith.constant 1.000000e-24 : f32
    %16 = vector.broadcast %cst_4 : f32 to vector<1x8xf32>
    %17 = arith.maximumf %15, %16 : vector<1x8xf32>
    %18 = math.rsqrt %17 : vector<1x8xf32>
    %19 = vector.broadcast %18 : vector<1x8xf32> to vector<256x8xf32>
    %20 = arith.mulf %3, %19 : vector<256x8xf32>
    %cst_5 = arith.constant dense<0.000000e+00> : vector<8x8xf32>
    %21 = tpu.matmul %12, %20, %cst_5 {dimension_numbers = #tpu.dot_dimension_numbers<[0], [0], [1], [1], [0, 1, 1, 1], [], []>} : vector<256x8xf32>, vector<256x8xf32>, vector<8x8xf32> -> vector<8x8xf32>
    %c0_6 = arith.constant 0 : index
    %22 = memref.load %arg4[%c0_6] : memref<2xf32, #tpu.memory_space<smem>>
    %23 = vector.broadcast %22 : f32 to vector<8x8xf32>
    %24 = arith.mulf %21, %23 : vector<8x8xf32>
    %cst_7 = arith.constant dense<0xFF800000> : vector<8xf32>
    %25 = vector.multi_reduction <maximumf>, %24, %cst_7 [1] : vector<8x8xf32> to vector<8xf32>
    %26 = vector.shape_cast %25 : vector<8xf32> to vector<8x1xf32>
    %27 = vector.broadcast %26 : vector<8x1xf32> to vector<8x8xf32>
    %28 = arith.subf %24, %27 : vector<8x8xf32>
    %29 = math.exp %28 : vector<8x8xf32>
    %cst_8 = arith.constant dense<0.000000e+00> : vector<8xf32>
    %30 = vector.multi_reduction <add>, %29, %cst_8 [1] : vector<8x8xf32> to vector<8xf32>
    %31 = vector.shape_cast %30 : vector<8xf32> to vector<8x1xf32>
    %32 = vector.broadcast %31 : vector<8x1xf32> to vector<8x8xf32>
    %33 = arith.divf %29, %32 : vector<8x8xf32>
    %cst_9 = arith.constant dense<0.000000e+00> : vector<8x256xf32>
    %34 = tpu.matmul %33, %4, %cst_9 {dimension_numbers = #tpu.dot_dimension_numbers<[1], [1], [0], [0], [0, 0, 1, 0], [], []>} : vector<8x8xf32>, vector<256x8xf32>, vector<8x256xf32> -> vector<8x256xf32>
    %35 = vector.extract_strided_slice %1 {offsets = [0, 8], sizes = [256, 8], strides = [1, 1]} : vector<256x128xf32> to vector<256x8xf32>
    %36 = vector.extract_strided_slice %1 {offsets = [0, 24], sizes = [256, 8], strides = [1, 1]} : vector<256x128xf32> to vector<256x8xf32>
    %37 = vector.extract_strided_slice %1 {offsets = [0, 40], sizes = [256, 8], strides = [1, 1]} : vector<256x128xf32> to vector<256x8xf32>
    %38 = arith.mulf %35, %35 : vector<256x8xf32>
    %cst_10 = arith.constant dense<0.000000e+00> : vector<8xf32>
    %39 = vector.multi_reduction <add>, %38, %cst_10 [0] : vector<256x8xf32> to vector<8xf32>
    %40 = vector.shape_cast %39 : vector<8xf32> to vector<1x8xf32>
    %cst_11 = arith.constant 1.000000e-24 : f32
    %41 = vector.broadcast %cst_11 : f32 to vector<1x8xf32>
    %42 = arith.maximumf %40, %41 : vector<1x8xf32>
    %43 = math.rsqrt %42 : vector<1x8xf32>
    %44 = vector.broadcast %43 : vector<1x8xf32> to vector<256x8xf32>
    %45 = arith.mulf %35, %44 : vector<256x8xf32>
    %46 = arith.mulf %36, %36 : vector<256x8xf32>
    %cst_12 = arith.constant dense<0.000000e+00> : vector<8xf32>
    %47 = vector.multi_reduction <add>, %46, %cst_12 [0] : vector<256x8xf32> to vector<8xf32>
    %48 = vector.shape_cast %47 : vector<8xf32> to vector<1x8xf32>
    %cst_13 = arith.constant 1.000000e-24 : f32
    %49 = vector.broadcast %cst_13 : f32 to vector<1x8xf32>
    %50 = arith.maximumf %48, %49 : vector<1x8xf32>
    %51 = math.rsqrt %50 : vector<1x8xf32>
    %52 = vector.broadcast %51 : vector<1x8xf32> to vector<256x8xf32>
    %53 = arith.mulf %36, %52 : vector<256x8xf32>
    %cst_14 = arith.constant dense<0.000000e+00> : vector<8x8xf32>
    %54 = tpu.matmul %45, %53, %cst_14 {dimension_numbers = #tpu.dot_dimension_numbers<[0], [0], [1], [1], [0, 1, 1, 1], [], []>} : vector<256x8xf32>, vector<256x8xf32>, vector<8x8xf32> -> vector<8x8xf32>
    %c1 = arith.constant 1 : index
    %55 = memref.load %arg4[%c1] : memref<2xf32, #tpu.memory_space<smem>>
    %56 = vector.broadcast %55 : f32 to vector<8x8xf32>
    %57 = arith.mulf %54, %56 : vector<8x8xf32>
    %cst_15 = arith.constant dense<0xFF800000> : vector<8xf32>
    %58 = vector.multi_reduction <maximumf>, %57, %cst_15 [1] : vector<8x8xf32> to vector<8xf32>
    %59 = vector.shape_cast %58 : vector<8xf32> to vector<8x1xf32>
    %60 = vector.broadcast %59 : vector<8x1xf32> to vector<8x8xf32>
    %61 = arith.subf %57, %60 : vector<8x8xf32>
    %62 = math.exp %61 : vector<8x8xf32>
    %cst_16 = arith.constant dense<0.000000e+00> : vector<8xf32>
    %63 = vector.multi_reduction <add>, %62, %cst_16 [1] : vector<8x8xf32> to vector<8xf32>
    %64 = vector.shape_cast %63 : vector<8xf32> to vector<8x1xf32>
    %65 = vector.broadcast %64 : vector<8x1xf32> to vector<8x8xf32>
    %66 = arith.divf %62, %65 : vector<8x8xf32>
    %cst_17 = arith.constant dense<0.000000e+00> : vector<8x256xf32>
    %67 = tpu.matmul %66, %37, %cst_17 {dimension_numbers = #tpu.dot_dimension_numbers<[1], [1], [0], [0], [0, 0, 1, 0], [], []>} : vector<8x8xf32>, vector<256x8xf32>, vector<8x256xf32> -> vector<8x256xf32>
    %68 = tpu.concatenate %34, %67 in 0 : vector<8x256xf32>, vector<8x256xf32> -> vector<16x256xf32>
    %c0_18 = arith.constant 0 : index
    %c0_19 = arith.constant 0 : index
    %69 = vector.load %arg2[%c0_18, %c0_19] : memref<16x16xf32, #tpu.memory_space<vmem>>, vector<16x16xf32>
    %cst_20 = arith.constant dense<0.000000e+00> : vector<16x256xf32>
    %70 = tpu.matmul %69, %68, %cst_20 {dimension_numbers = #tpu.dot_dimension_numbers<[0], [0], [1], [1], [0, 1, 1, 1], [], []>} : vector<16x16xf32>, vector<16x256xf32>, vector<16x256xf32> -> vector<16x256xf32>
    %c0_21 = arith.constant 0 : index
    %c0_22 = arith.constant 0 : index
    %71 = vector.load %arg3[%c0_21, %c0_22] : memref<16x1xf32, #tpu.memory_space<vmem>>, vector<16x1xf32>
    %72 = vector.broadcast %71 : vector<16x1xf32> to vector<16x256xf32>
    %73 = arith.addf %70, %72 : vector<16x256xf32>
    %c0_23 = arith.constant 0 : index
    %c0_24 = arith.constant 0 : index
    %c0_25 = arith.constant 0 : index
    %74 = vector.load %arg5[%c0_23, %c0_24, %c0_25] : memref<1x16x256xf32, #tpu.memory_space<vmem>>, vector<1x16x256xf32>
    %75 = vector.shape_cast %74 : vector<1x16x256xf32> to vector<16x256xf32>
    %76 = vector.shape_cast %73 : vector<16x256xf32> to vector<1x16x256xf32>
    tpu.vector_store %arg5[%c0_23, %c0_24, %c0_25], %76 {strides = array<i32>} : memref<1x16x256xf32, #tpu.memory_space<vmem>>, vector<1x16x256xf32>,
    return
  }
  func.func @transform_0(%arg0: i32) -> (i32, i32, i32) {
    %c0_i32 = arith.constant 0 : i32
    %c0_i32_0 = arith.constant 0 : i32
    %c0_i32_1 = arith.constant 0 : i32
    return %arg0, %c0_i32, %c0_i32_0 : i32, i32, i32
  }
  func.func @transform_1(%arg0: i32) -> (i32, i32) {
    %c0_i32 = arith.constant 0 : i32
    %c0_i32_0 = arith.constant 0 : i32
    %c0_i32_1 = arith.constant 0 : i32
    return %c0_i32, %c0_i32_0 : i32, i32
  }
  func.func @transform_2(%arg0: i32) -> (i32, i32) {
    %c0_i32 = arith.constant 0 : i32
    %c0_i32_0 = arith.constant 0 : i32
    %c0_i32_1 = arith.constant 0 : i32
    return %c0_i32, %c0_i32_0 : i32, i32
  }
  func.func @transform_3(%arg0: i32) -> i32 {
    %c0_i32 = arith.constant 0 : i32
    %c0_i32_0 = arith.constant 0 : i32
    return %c0_i32 : i32
  }
  func.func @transform_4(%arg0: i32) -> (i32, i32, i32) {
    %c0_i32 = arith.constant 0 : i32
    %c0_i32_0 = arith.constant 0 : i32
    %c0_i32_1 = arith.constant 0 : i32
    return %arg0, %c0_i32, %c0_i32_0 : i32, i32, i32
  }
}

</mosaic_0001>

<bundles_post_ra>
// kernel: dilated_mdta_forward.3
= control target key start
LH: loop header
LB: loop body
LE: loop exit
PB: predicated region body
PF: predicated region fallthrough
CT: control target
= control target key end

     0   :  { %9 = vsyncpa [#allocation3], 0  ;;  %s3007_s15 = smov 0   ;;  %s4168_s0 = inlined_call_operand.vmem [shape: f32[2,256,128], index: 0, kind: input, shape index: {}]   ;;  %s4169_s1 = inlined_call_operand.vmem [shape: f32[16,16], index: 1, kind: input, shape index: {}]   ;;  %s4170_s2 = inlined_call_operand.vmem [shape: f32[16,1], index: 2, kind: input, shape index: {}]   ;;  %s4171_s3 = inlined_call_operand.vmem [shape: f32[2], index: 3, kind: input, shape index: {}]   ;;  %s4172_s4 = inlined_call_operand.vmem [shape: f32[2,16,256], index: 4, kind: output, shape index: {}]  }
   0x1 LB: > { %s2009_s16 = sadd.s32 4294967295, %s2972_s15   ;;  %p2011_p0 = scmp.ge.s32.totalorder %s2972_s15, 1  ;;  %s2972_s15 = sphi %s3007_s15, %s15_s15  }
   0x2   : > { %p135_p1 = scmp.lt.s32.totalorder %s2972_s15, 3  ;;  %s154_s19 = sshll.u32 %s4171_s3, 4  ;;  %s155_s19 = int_to_ptr.vmem [resolvable:$true] %s154_s19 }
   0x3   : > { %p2405_p3 = scmp.eq.s32.totalorder %s2009_s16, 0  ;;  %s2947_s21 = scalar_lea.vmem %s155_s19, 16 }
   0x4   : > { %p3018_p2 = pnand %p2011_p0, %p135_p1  ;;  %p2948_p6 = scmp.ne.s32.totalorder %s155_s19, %s2947_s21 }
   0x5   : > { %p2955_p10 = scmp.lt.s32.totalorder %s155_s19, %s155_s19  ;;  %p2956_p11 = scmp.lt.s32.totalorder %s2947_s21, %s2947_s21 }
   0x6   : > { %p2401_p4 = pneg %p3018_p2 }
   0x7   : > { %p2957_p12 = por %p2956_p11, %p2955_p10 }
   0x8   : > { %p2402_p5 = pnand %p2405_p3, %p2401_p4 }
   0xa   : > { %p2949_p7 = pneg %p2402_p5 }
   0xc   : > { %p2950_p8 = pnand %p2949_p7, %p2948_p6 }
   0xe   : > { %p2951_p9 = pneg %p2950_p8 }
  0x10   : > { %p2958_p13 = pnand %p2957_p12, %p2951_p9 }
  0x12   : > { %2961 = shalt.err (!%p2958_p13)
}
  0x13   : > { %s2974_s22 = smov [#allocation2]   ;;  %175 = sbr.rel (%p3018_p2) target bundleno = 1362 (0x552), region = 36 }
  0x14   : > { %2404 = dma.vmem_to_smem (!%p2402_p5), %s155_s19, 16, %s2974_s22, [#allocation3]  }
  0x1a   : > { %2967 = dma.done.wait (%p2405_p3), [#allocation3], 16  }
  0x1b   : > { %2969 = vsyncadd (%p2405_p3), [#allocation3], 4294967280 }
  0x1c   : > { %181 = sfence }
  0x1d   : > { %p202_p0 = scmp.lt.s32.totalorder %s2009_s16, 1  ;;  %vm994_vm0 = vcmask 130112   ;;  %vm276_vm1 = vcmask 64512   ;;  %vm1098_vm2 = vcmask 261312   ;;  %vm380_vm3 = vcmask 195712   ;;  %s2975_s27 = smov 120  }
  0x1e   : > { %s2976_s28 = smov 104   ;;  %s2977_s29 = smov 112   ;;  %vm4035_vm4 = vmpackc.low %vm276_vm1, %vm276_vm1  ;;  %vm1854_vm5 = vcmask 130048  }
  0x1f   : > { %s4237_s16 = smov (!%p202_p0, %s2009_s16), 1  ;;  %s2978_s30 = smov 88  }
  0x20   : > { %s2091_s23 = sshll.u32 %s4237_s16, 8  ;;  %s2979_s5 = smov 96  }
  0x21   : > { %s3035_s26 = scalar_lea.vmem %s4168_s0, %s2091_s23  ;;  %s2053_s6 = sld [smem:[#allocation2 + $0x1]] }
  0x22   : > { %v3038_v0 = vld [vmem:[%s3035_s26] sm:$0xff]  ;;  %v3041_v1 = vld [vmem:[%s3035_s26 + $0x8] sm:$0xff]  ;;  %v3044_v2 = vld [vmem:[%s3035_s26 + $0x10] sm:$0xff]  ;;  %s746_s7 = sld [smem:[#allocation2]]  ;;  %s2092_s18 = sshll.u32 %s4237_s16, 5 }
  0x23   : > { %v3047_v3 = vld [vmem:[%s3035_s26 + $0x18] sm:$0xff]  ;;  %v3051_v4 = vmul.f32 %v3038_v0, %v3038_v0  ;;  %v3055_v5 = vmul.f32 %v3041_v1, %v3041_v1  ;;  %v3059_v6 = vmul.f32 %v3044_v2, %v3044_v2  ;;  %v3062_v7 = vld [vmem:[%s3035_s26 + $0x20] sm:$0xff]  ;;  %v3069_v9 = vld [vmem:[%s3035_s26 + $0x28] sm:$0xff]  ;;  %s211_s21 = scalar_lea.vmem %s4172_s4, %s2092_s18 }
  0x24   : > { %v3066_v8 = vmul.f32 %v3047_v3, %v3047_v3  ;;  %v3073_v10 = vmul.f32 %v3062_v7, %v3062_v7  ;;  %v3082_v14 = vld [vmem:[%s3035_s26 + $0x30] sm:$0xff]  ;;  %v3085_v16 = vld [vmem:[%s3035_s26 + $0x38] sm:$0xff]  ;;  %v3089_v17 = vmul.f32 %v3069_v9, %v3069_v9  ;;  %v3094_v19 = vld [vmem:[%s3035_s26 + $0x40] sm:$0xff] }
  0x25   : > { %v995_v11 = vsel %vm994_vm0, %v3051_v4, 0.0  ;;  %v996_v12 = vsel %vm994_vm0, %v3055_v5, 0.0  ;;  %v998_v13 = vsel %vm994_vm0, %v3059_v6, 0.0  ;;  %4204 = vst [vmem:[#allocation5_spill] sm:$0xff] %v3082_v14  ;;  %4205 = vst [vmem:[#allocation6_spill] sm:$0xff] %v3085_v16  ;;  %v3097_v20 = vld [vmem:[%s3035_s26 + $0x48] sm:$0xff]  ;;  %v3107_v24 = vmul.f32 %v3082_v14, %v3082_v14 }
  0x26   : > { %v997_v15 = vadd.f32 %v996_v12, %v995_v11  ;;  %v1000_v18 = vsel %vm994_vm0, %v3066_v8, 0.0  ;;  %4206 = vst [vmem:[#allocation7_spill] sm:$0xff] %v3094_v19  ;;  %4207 = vst [vmem:[#allocation8_spill] sm:$0xff] %v3097_v20  ;;  %v3100_v22 = vld [vmem:[%s3035_s26 + $0x50] sm:$0xff]  ;;  %v3103_v23 = vld [vmem:[%s3035_s26 + $0x58] sm:$0xff]  ;;  %v1002_v25 = vsel %vm994_vm0, %v3073_v10, 0.0  ;;  %v3122_v29 = vmul.f32 %v3085_v16, %v3085_v16 }
  0x27   : > { %4208 = vst [vmem:[#allocation9_spill] sm:$0xff] %v3100_v22  ;;  %4209 = vst [vmem:[#allocation10_spill] sm:$0xff] %v3103_v23  ;;  %v3112_v26 = vld [vmem:[%s3035_s26 + $0x60] sm:$0xff]  ;;  %v3115_v27 = vld [vmem:[%s3035_s26 + $0x68] sm:$0xff]  ;;  %v3126_v31 = vmul.f32 %v3094_v19, %v3094_v19  ;;  %v3130_v32 = vmul.f32 %v3097_v20, %v3097_v20  ;;  %v3134_v33 = vsel %vm276_vm1, %v3055_v5, 0.0  ;;  %v1004_v34 = vsel %vm994_vm0, %v3089_v17, 0.0 }
  0x28   : > { %v999_v21 = vadd.f32 %v998_v13, %v997_v15  ;;  %4210 = vst [vmem:[#allocation11_spill] sm:$0xff] %v3112_v26  ;;  %4211 = vst [vmem:[#allocation12_spill] sm:$0xff] %v3115_v27  ;;  %v3118_v28 = vld [vmem:[%s3035_s26 + $0x70] sm:$0xff]  ;;  %v3139_v35 = vld [vmem:[%s3035_s26 + $0x78] sm:$0xff]  ;;  %v3143_v36 = vmul.f32 %v3100_v22, %v3100_v22  ;;  %v3147_v37 = vmul.f32 %v3103_v23, %v3103_v23  ;;  %v3151_v38 = vsel %vm276_vm1, %v3059_v6, 0.0 }
  0x29   : > { %4212 = vst [vmem:[#allocation13_spill] sm:$0xff] %v3118_v28  ;;  %4213 = vst [vmem:[#allocation14_spill] sm:$0xff] %v3139_v35  ;;  %v3154_v40 = vld [vmem:[%s3035_s26 + $0x80] sm:$0xff]  ;;  %v3157_v41 = vld [vmem:[%s3035_s26 + $0x88] sm:$0xff]  ;;  %v3161_v42 = vmul.f32 %v3112_v26, %v3112_v26  ;;  %v3165_v43 = vmul.f32 %v3115_v27, %v3115_v27  ;;  %v3169_v44 = vmul.f32 %v3118_v28, %v3118_v28  ;;  %v1006_v45 = vsel %vm994_vm0, %v3107_v24, 0.0 }
  0x2a   : > { %v1001_v30 = vadd.f32 %v1000_v18, %v999_v21  ;;  %v3174_v46 = vld [vmem:[%s3035_s26 + $0x90] sm:$0xff]  ;;  %v1099_v48 = vsel %vm1098_vm2, %v3051_v4, 0.0  ;;  %v1100_v49 = vsel %vm1098_vm2, %v3055_v5, 0.0  ;;  %v1102_v50 = vsel %vm1098_vm2, %v3059_v6, 0.0  ;;  %v3183_v51 = vld [vmem:[%s3035_s26 + $0x98] sm:$0xff]  ;;  %v3186_v52 = vld [vmem:[%s3035_s26 + $0xa0] sm:$0xff] }
  0x2b   : > { %v3190_v53 = vmul.f32 %v3139_v35, %v3139_v35  ;;  %v3194_v54 = vsel %vm276_vm1, %v3066_v8, 0.0  ;;  %v1008_v55 = vsel %vm994_vm0, %v3122_v29, 0.0  ;;  %v1101_v56 = vadd.f32 %v1100_v49, %v1099_v48  ;;  %v3199_v57 = vld [vmem:[%s3035_s26 + $0xa8] sm:$0xff]  ;;  %v3212_v62 = vld [vmem:[%s3035_s26 + $0xb0] sm:$0xff]  ;;  %v3215_v63 = vld [vmem:[%s3035_s26 + $0xb8] sm:$0xff] }
  0x2c   : > { %v1003_v39 = vadd.f32 %v1002_v25, %v1001_v30  ;;  %v3203_v58 = vmul.f32 %v3154_v40, %v3154_v40  ;;  %v3207_v59 = vmul.f32 %v3157_v41, %v3157_v41  ;;  %v1104_v61 = vsel %vm1098_vm2, %v3066_v8, 0.0  ;;  %4214 = vst [vmem:[#allocation15_spill] sm:$0xff] %v3212_v62  ;;  %4215 = vst [vmem:[#allocation16_spill] sm:$0xff] %v3215_v63  ;;  %v3228_v18 = vld [vmem:[%s3035_s26 + $0xc0] sm:$0xff]  ;;  %v3287_v23 = vld [vmem:[%s3035_s26 + $0xd8] sm:$0xff] }
  0x2d   : > { %v3219_v11 = vmul.f32 %v3174_v46, %v3174_v46  ;;  %v3223_v12 = vsel %vm276_vm1, %v3073_v10, 0.0  ;;  %v1010_v13 = vsel %vm994_vm0, %v3126_v31, 0.0  ;;  %v1103_v15 = vadd.f32 %v1102_v50, %v1101_v56  ;;  %4216 = vst [vmem:[#allocation17_spill] sm:$0xff] %v3228_v18  ;;  %v3304_v20 = vld [vmem:[%s3035_s26 + $0xe0] sm:$0xff] }
  0x2e   : > { %v1005_v47 = vadd.f32 %v1004_v34, %v1003_v39  ;;  %v3232_v21 = vmul.f32 %v3183_v51, %v3183_v51  ;;  %v3236_v25 = vmul.f32 %v3186_v52, %v3186_v52  ;;  %v1106_v34 = vsel %vm1098_vm2, %v3073_v10, 0.0  ;;  %v3241_v39 = vld [vmem:[%s3035_s26 + $0xc8] sm:$0xff] }
  0x2f   : > { %4217 = vst [vmem:[#allocation18_spill] sm:$0xff] %v3241_v39  ;;  %v3252_v48 = vsel %vm276_vm1, %v3089_v17, 0.0  ;;  %v1012_v49 = vsel %vm994_vm0, %v3130_v32, 0.0  ;;  %v1105_v50 = vadd.f32 %v1104_v61, %v1103_v15  ;;  %v3262_v56 = vmul.f32 %v3215_v63, %v3215_v63  ;;  %v3318_v63 = vld [vmem:[%s3035_s26 + $0xe8] sm:$0xff] }
  0x30   : > { %v1007_v60 = vadd.f32 %v1006_v45, %v1005_v47  ;;  %v3244_v45 = vld [vmem:[%s3035_s26 + $0xd0] sm:$0xff]  ;;  %v3248_v47 = vmul.f32 %v3199_v57, %v3199_v57  ;;  %v1108_v28 = vsel %vm1098_vm2, %v3089_v17, 0.0  ;;  %v3268_v35 = vmul.f32 %v3228_v18, %v3228_v18 }
  0x31   : > { %4218 = vst [vmem:[#allocation19_spill] sm:$0xff] %v3244_v45  ;;  %v3272_v26 = vsel %vm276_vm1, %v3107_v24, 0.0  ;;  %v1014_v61 = vsel %vm994_vm0, %v3143_v36, 0.0  ;;  %v1107_v15 = vadd.f32 %v1106_v34, %v1105_v50  ;;  %v3278_v27 = vmul.f32 %v3241_v39, %v3241_v39 }
  0x32   : > { %v1009_v30 = vadd.f32 %v1008_v55, %v1007_v60  ;;  %v3258_v55 = vmul.f32 %v3212_v62, %v3212_v62  ;;  %v1110_v22 = vsel %vm1098_vm2, %v3107_v24, 0.0  ;;  %v3291_v18 = vsel %vm276_vm1, %v3122_v29, 0.0 }
  0x33   : > { %v382_v34 = vsel %vm380_vm3, %v3055_v5, 0.0  ;;  %v1016_v50 = vsel %vm994_vm0, %v3147_v37, 0.0  ;;  %v1109_v19 = vadd.f32 %v1108_v28, %v1107_v15  ;;  %v277_v39 = vsel %vm276_vm1, %v3051_v4, 0.0 }
  0x34   : > { %v1011_v60 = vadd.f32 %v1010_v13, %v1009_v30  ;;  %v3282_v13 = vmul.f32 %v3244_v45, %v3244_v45  ;;  %v1112_v45 = vsel %vm1098_vm2, %v3122_v29, 0.0  ;;  %v1018_v5 = vsel %vm994_vm0, %v3161_v42, 0.0 }
  0x35   : > { %v1111_v62 = vadd.f32 %v1110_v22, %v1109_v19  ;;  %v279_v14 = vadd.f32 %v3134_v33, %v277_v39  ;;  %v381_v28 = vsel %vm380_vm3, %v3051_v4, 0.0  ;;  %v1114_v15 = vsel %vm1098_vm2, %v3126_v31, 0.0 }
  0x36   : > { %v1013_v30 = vadd.f32 %v1012_v49, %v1011_v60  ;;  %v384_v49 = vsel %vm380_vm3, %v3059_v6, 0.0  ;;  %v3313_v6 = vmul.f32 %v3287_v23, %v3287_v23  ;;  %v386_v16 = vsel %vm380_vm3, %v3066_v8, 0.0 }
  0x37   : > { %v1020_v19 = vsel %vm994_vm0, %v3165_v43, 0.0  ;;  %v1113_v22 = vadd.f32 %v1112_v45, %v1111_v62  ;;  %v281_v4 = vadd.f32 %v3151_v38, %v279_v14  ;;  %v3327_v33 = vmul.f32 %v3304_v20, %v3304_v20 }
  0x38   : > { %v1015_v60 = vadd.f32 %v1014_v61, %v1013_v30  ;;  %v383_v30 = vadd.f32 %v382_v34, %v381_v28  ;;  %v1116_v34 = vsel %vm1098_vm2, %v3130_v32, 0.0  ;;  %v1022_v8 = vsel %vm994_vm0, %v3169_v44, 0.0 }
  0x39   : > { %v1115_v28 = vadd.f32 %v1114_v15, %v1113_v22  ;;  %v283_v62 = vadd.f32 %v3194_v54, %v281_v4  ;;  %v3338_v14 = vmul.f32 %v3318_v63, %v3318_v63  ;;  %v1118_v45 = vsel %vm1098_vm2, %v3143_v36, 0.0 }
  0x3a   : > { %v1017_v61 = vadd.f32 %v1016_v50, %v1015_v60  ;;  %v385_v50 = vadd.f32 %v384_v49, %v383_v30  ;;  %v388_v60 = vsel %vm380_vm3, %v3073_v10, 0.0  ;;  %v3343_v49 = vld [vmem:[%s3035_s26 + $0xf0] sm:$0xff]  ;;  %v390_v10 = vsel %vm380_vm3, %v3089_v17, 0.0 }
  0x3b   : > { %v1117_v15 = vadd.f32 %v1116_v34, %v1115_v28  ;;  %v285_v54 = vadd.f32 %v3223_v12, %v283_v62  ;;  %v292_v30 = vsel %vm276_vm1, %v3126_v31, 0.0  ;;  %v1026_v17 = vsel %vm994_vm0, %v3203_v58, 0.0 }
  0x3c   : > { %v1019_v39 = vadd.f32 %v1018_v5, %v1017_v61  ;;  %v387_v5 = vadd.f32 %v386_v16, %v385_v50  ;;  %v1024_v61 = vsel %vm994_vm0, %v3190_v53, 0.0  ;;  %v3355_v16 = vld [vmem:[%s3035_s26 + $0xf8] sm:$0xff]  ;;  %v3364_v12 = vmul.f32 %v3343_v49, %v3343_v49 }
  0x3d   : > { %v1119_v50 = vadd.f32 %v1118_v45, %v1117_v15  ;;  %v287_v34 = vadd.f32 %v3252_v48, %v285_v54  ;;  %v1122_v28 = vsel %vm1098_vm2, %v3161_v42, 0.0  ;;  %v394_v62 = vsel %vm380_vm3, %v3122_v29, 0.0 }
  0x3e   : > { %v1021_v38 = vadd.f32 %v1020_v19, %v1019_v39  ;;  %v1120_v19 = vsel %vm1098_vm2, %v3147_v37, 0.0  ;;  %v389_v4 = vadd.f32 %v388_v60, %v387_v5  ;;  %v392_v39 = vsel %vm380_vm3, %v3107_v24, 0.0 }
  0x3f   : > { %v1028_v24 = vsel %vm994_vm0, %v3207_v59, 0.0  ;;  %v289_v45 = vadd.f32 %v3272_v26, %v287_v34  ;;  %v3375_v48 = vmul.f32 %v3355_v16, %v3355_v16  ;;  %v1030_v29 = vsel %vm994_vm0, %v3219_v11, 0.0 }
  0x40   : > { %v1023_v22 = vadd.f32 %v1022_v8, %v1021_v38  ;;  %v391_v60 = vadd.f32 %v390_v10, %v389_v4  ;;  %v1121_v38 = vadd.f32 %v1120_v19, %v1119_v50  ;;  %v396_v10 = vsel %vm380_vm3, %v3126_v31, 0.0 }
  0x41   : > { %v294_v26 = vsel %vm276_vm1, %v3130_v32, 0.0  ;;  %v1126_v4 = vsel %vm1098_vm2, %v3169_v44, 0.0  ;;  %v1032_v31 = vsel %vm994_vm0, %v3232_v21, 0.0 }
  0x42   : > { %v1025_v8 = vadd.f32 %v1024_v61, %v1023_v22  ;;  %v1124_v61 = vsel %vm1098_vm2, %v3165_v43, 0.0  ;;  %v393_v15 = vadd.f32 %v392_v39, %v391_v60  ;;  %v1123_v54 = vadd.f32 %v1122_v28, %v1121_v38 }
  0x43   : > { %v291_v22 = vadd.f32 %v3291_v18, %v289_v45  ;;  %v398_v39 = vsel %vm380_vm3, %v3130_v32, 0.0  ;;  %v1128_v28 = vsel %vm1098_vm2, %v3190_v53, 0.0  ;;  %v298_v45 = vsel %vm276_vm1, %v3147_v37, 0.0 }
  0x44   : > { %v1027_v5 = vadd.f32 %v1026_v17, %v1025_v8  ;;  %v395_v17 = vadd.f32 %v394_v62, %v393_v15  ;;  %v1125_v50 = vadd.f32 %v1124_v61, %v1123_v54  ;;  %v296_v8 = vsel %vm276_vm1, %v3143_v36, 0.0 }
  0x45   : > { %v293_v34 = vadd.f32 %v292_v30, %v291_v22  ;;  %v1034_v62 = vsel %vm994_vm0, %v3236_v25, 0.0  ;;  %v402_v15 = vsel %vm380_vm3, %v3147_v37, 0.0  ;;  %v300_v54 = vsel %vm276_vm1, %v3161_v42, 0.0 }
  0x46   : > { %v1029_v19 = vadd.f32 %v1028_v24, %v1027_v5  ;;  %v397_v60 = vadd.f32 %v396_v10, %v395_v17  ;;  %v400_v24 = vsel %vm380_vm3, %v3143_v36, 0.0  ;;  %v1127_v32 = vadd.f32 %v1126_v4, %v1125_v50 }
  0x47   : > { %v295_v38 = vadd.f32 %v294_v26, %v293_v34  ;;  %v1130_v5 = vsel %vm1098_vm2, %v3203_v58, 0.0  ;;  %v1036_v10 = vsel %vm994_vm0, %v3248_v47, 0.0  ;;  %v1132_v26 = vsel %vm1098_vm2, %v3207_v59, 0.0 }
  0x48   : > { %v1031_v18 = vadd.f32 %v1030_v29, %v1029_v19  ;;  %v399_v61 = vadd.f32 %v398_v39, %v397_v60  ;;  %v1129_v36 = vadd.f32 %v1128_v28, %v1127_v32  ;;  %v404_v4 = vsel %vm380_vm3, %v3161_v42, 0.0 }
  0x49   : > { %v297_v29 = vadd.f32 %v296_v8, %v295_v38  ;;  %v1038_v17 = vsel %vm994_vm0, %v3258_v55, 0.0  ;;  %v1134_v34 = vsel %vm1098_vm2, %v3219_v11, 0.0  ;;  %v1040_v28 = vsel %vm994_vm0, %v3262_v56, 0.0 }
  0x4a   : > { %v1033_v30 = vadd.f32 %v1032_v31, %v1031_v18  ;;  %v401_v19 = vadd.f32 %v400_v24, %v399_v61  ;;  %v1131_v37 = vadd.f32 %v1130_v5, %v1129_v36  ;;  %v302_v31 = vsel %vm276_vm1, %v3165_v43, 0.0 }
  0x4b   : > { %v299_v39 = vadd.f32 %v298_v45, %v297_v29  ;;  %v406_v18 = vsel %vm380_vm3, %v3165_v43, 0.0  ;;  %v304_v24 = vsel %vm276_vm1, %v3169_v44, 0.0  ;;  %v1136_v32 = vsel %vm1098_vm2, %v3232_v21, 0.0 }
  0x4c   : > { %v1035_v22 = vadd.f32 %v1034_v62, %v1033_v30  ;;  %v403_v8 = vadd.f32 %v402_v15, %v401_v19  ;;  %v1133_v42 = vadd.f32 %v1132_v26, %v1131_v37  ;;  %v408_v45 = vsel %vm380_vm3, %v3169_v44, 0.0 }
  0x4d   : > { %v301_v60 = vadd.f32 %v300_v54, %v299_v39  ;;  %v1042_v30 = vsel %vm994_vm0, %v3268_v35, 0.0  ;;  %v306_v61 = vsel %vm276_vm1, %v3190_v53, 0.0  ;;  %v410_v29 = vsel %vm380_vm3, %v3190_v53, 0.0 }
  0x4e   : > { %v1037_v50 = vadd.f32 %v1036_v10, %v1035_v22  ;;  %v405_v38 = vadd.f32 %v404_v4, %v403_v8  ;;  %v1135_v43 = vadd.f32 %v1134_v34, %v1133_v42  ;;  %v1138_v10 = vsel %vm1098_vm2, %v3236_v25, 0.0 }
  0x4f   : > { %v303_v5 = vadd.f32 %v302_v31, %v301_v60  ;;  %v1044_v54 = vsel %vm994_vm0, %v3278_v27, 0.0  ;;  %v308_v26 = vsel %vm276_vm1, %v3203_v58, 0.0  ;;  %v1140_v4 = vsel %vm1098_vm2, %v3248_v47, 0.0 }
  0x50   : > { %v1039_v62 = vadd.f32 %v1038_v17, %v1037_v50  ;;  %v407_v36 = vadd.f32 %v406_v18, %v405_v38  ;;  %v1137_v44 = vadd.f32 %v1136_v32, %v1135_v43  ;;  %v412_v37 = vsel %vm380_vm3, %v3203_v58, 0.0 }
  0x51   : > { %v305_v22 = vadd.f32 %v304_v24, %v303_v5  ;;  %v1046_v39 = vsel %vm994_vm0, %v3282_v13, 0.0  ;;  %v310_v50 = vsel %vm276_vm1, %v3207_v59, 0.0  ;;  %v1142_v8 = vsel %vm1098_vm2, %v3258_v55, 0.0 }
  0x52   : > { %v1041_v15 = vadd.f32 %v1040_v28, %v1039_v62  ;;  %v409_v17 = vadd.f32 %v408_v45, %v407_v36  ;;  %v1139_v53 = vadd.f32 %v1138_v10, %v1137_v44  ;;  %v414_v28 = vsel %vm380_vm3, %v3207_v59, 0.0 }
  0x53   : > { %v307_v31 = vadd.f32 %v306_v61, %v305_v22  ;;  %v1048_v42 = vsel %vm994_vm0, %v3313_v6, 0.0  ;;  %v312_v24 = vsel %vm276_vm1, %v3219_v11, 0.0  ;;  %v1144_v32 = vsel %vm1098_vm2, %v3262_v56, 0.0 }
  0x54   : > { %v1043_v19 = vadd.f32 %v1042_v30, %v1041_v15  ;;  %v411_v18 = vadd.f32 %v410_v29, %v409_v17  ;;  %v1141_v58 = vadd.f32 %v1140_v4, %v1139_v53  ;;  %v416_v45 = vsel %vm380_vm3, %v3219_v11, 0.0 }
  0x55   : > { %v309_v60 = vadd.f32 %v308_v26, %v307_v31  ;;  %v1050_v30 = vsel %vm994_vm0, %v3327_v33, 0.0  ;;  %v314_v5 = vsel %vm276_vm1, %v3232_v21, 0.0  ;;  %v1146_v15 = vsel %vm1098_vm2, %v3268_v35, 0.0 }
  0x56   : > { %v1045_v34 = vadd.f32 %v1044_v54, %v1043_v19  ;;  %v413_v38 = vadd.f32 %v412_v37, %v411_v18  ;;  %v1143_v59 = vadd.f32 %v1142_v8, %v1141_v58  ;;  %v418_v36 = vsel %vm380_vm3, %v3232_v21, 0.0 }
  0x57   : > { %v311_v43 = vadd.f32 %v310_v50, %v309_v60  ;;  %v1052_v29 = vsel %vm994_vm0, %v3338_v14, 0.0  ;;  %v316_v44 = vsel %vm276_vm1, %v3236_v25, 0.0  ;;  %v1148_v26 = vsel %vm1098_vm2, %v3278_v27, 0.0 }
  0x58   : > { %v1047_v62 = vadd.f32 %v1046_v39, %v1045_v34  ;;  %v415_v10 = vadd.f32 %v414_v28, %v413_v38  ;;  %v1145_v11 = vadd.f32 %v1144_v32, %v1143_v59  ;;  %v420_v4 = vsel %vm380_vm3, %v3236_v25, 0.0 }
  0x59   : > { %v313_v54 = vadd.f32 %v312_v24, %v311_v43  ;;  %v1054_v17 = vsel %vm994_vm0, %v3364_v12, 0.0  ;;  %v318_v39 = vsel %vm276_vm1, %v3248_v47, 0.0  ;;  %v1150_v31 = vsel %vm1098_vm2, %v3282_v13, 0.0 }
  0x5a   : > { %v1049_v61 = vadd.f32 %v1048_v42, %v1047_v62  ;;  %v417_v19 = vadd.f32 %v416_v45, %v415_v10  ;;  %v1147_v21 = vadd.f32 %v1146_v15, %v1145_v11  ;;  %v422_v34 = vsel %vm380_vm3, %v3248_v47, 0.0 }
  0x5b   : > { %v315_v37 = vadd.f32 %v314_v5, %v313_v54  ;;  %v1056_v8 = vsel %vm994_vm0, %v3375_v48, 0.0  ;;  %v320_v28 = vsel %vm276_vm1, %v3258_v55, 0.0  ;;  %v1152_v58 = vsel %vm1098_vm2, %v3313_v6, 0.0 }
  0x5c   : > { %v1051_v22 = vadd.f32 %v1050_v30, %v1049_v61  ;;  %v419_v50 = vadd.f32 %v418_v36, %v417_v19  ;;  %v1149_v25 = vadd.f32 %v1148_v26, %v1147_v21  ;;  %v424_v24 = vsel %vm380_vm3, %v3258_v55, 0.0 }
  0x5d   : > { %v317_v18 = vadd.f32 %v316_v44, %v315_v37  ;;  %v322_v47 = vsel %vm276_vm1, %v3262_v56, 0.0  ;;  %v1154_v45 = vsel %vm1098_vm2, %v3327_v33, 0.0  ;;  %v426_v59 = vsel %vm380_vm3, %v3262_v56, 0.0 }
  0x5e   : > { %v1053_v53 = vadd.f32 %v1052_v29, %v1051_v22  ;;  %v421_v60 = vadd.f32 %v420_v4, %v419_v50  ;;  %v1151_v62 = vadd.f32 %v1150_v31, %v1149_v25  ;;  %v324_v61 = vsel %vm276_vm1, %v3268_v35, 0.0 }
  0x5f   : > { %v319_v32 = vadd.f32 %v318_v39, %v317_v18  ;;  %v1156_v55 = vsel %vm1098_vm2, %v3338_v14, 0.0  ;;  %v428_v36 = vsel %vm380_vm3, %v3268_v35, 0.0  ;;  %v326_v54 = vsel %vm276_vm1, %v3278_v27, 0.0 }
  0x60   : > { %v1055_v42 = vadd.f32 %v1054_v17, %v1053_v53  ;;  %v423_v30 = vadd.f32 %v422_v34, %v421_v60  ;;  %v1153_v43 = vadd.f32 %v1152_v58, %v1151_v62  ;;  %v1158_v56 = vsel %vm1098_vm2, %v3364_v12, 0.0 }
  0x61   : > { %v321_v5 = vadd.f32 %v320_v28, %v319_v32  ;;  %v430_v26 = vsel %vm380_vm3, %v3278_v27, 0.0  ;;  %v328_v17 = vsel %vm276_vm1, %v3282_v13, 0.0  ;;  %v432_v37 = vsel %vm380_vm3, %v3282_v13, 0.0 }
  0x62   : > { %v1057_v38 = vadd.f32 %v1056_v8, %v1055_v42  ;;  %v425_v10 = vadd.f32 %v424_v24, %v423_v30  ;;  %v1155_v29 = vadd.f32 %v1154_v45, %v1153_v43  ;;  %v1160_v53 = vsel %vm1098_vm2, %v3375_v48, 0.0 }
  0x63   : > { %v323_v11 = vadd.f32 %v322_v47, %v321_v5  ;;  %v330_v50 = vsel %vm276_vm1, %v3313_v6, 0.0  ;;  %v434_v8 = vsel %vm380_vm3, %v3313_v6, 0.0  ;;  %v332_v18 = vsel %vm276_vm1, %v3327_v33, 0.0 }
  0x64   : > { %v1058_v15 = vrot.slane %v1057_v38, 4  ;;  %v427_v22 = vadd.f32 %v426_v59, %v425_v10  ;;  %v1157_v19 = vadd.f32 %v1156_v55, %v1155_v29  ;;  %v436_v58 = vsel %vm380_vm3, %v3327_v33, 0.0 }
  0x65   : > { %v325_v4 = vadd.f32 %v324_v61, %v323_v11  ;;  %v334_v24 = vsel %vm276_vm1, %v3338_v14, 0.0  ;;  %v438_v47 = vsel %vm380_vm3, %v3338_v14, 0.0  ;;  %v440_v43 = vsel %vm380_vm3, %v3364_v12, 0.0 }
  0x66   : > { %v1059_v44 = vadd.f32 %v1058_v15, %v1057_v38  ;;  %v429_v35 = vadd.f32 %v428_v36, %v427_v22  ;;  %v1159_v39 = vadd.f32 %v1158_v56, %v1157_v19  ;;  %v336_v38 = vsel %vm276_vm1, %v3364_v12, 0.0 }
  0x67   : > { %v327_v31 = vadd.f32 %v326_v54, %v325_v4  ;;  %v338_v5 = vsel %vm276_vm1, %v3375_v48, 0.0  ;;  %v442_v15 = vsel %vm380_vm3, %v3375_v48, 0.0 }
  0x68   : > { %v1060_v21 = vrot.slane %v1059_v44, 2  ;;  %v431_v27 = vadd.f32 %v430_v26, %v429_v35  ;;  %v1161_v42 = vadd.f32 %v1160_v53, %v1159_v39 }
  0x69   : > { %v329_v25 = vadd.f32 %v328_v17, %v327_v31 }
  0x6a   : > { %v1061_v34 = vadd.f32 %v1060_v21, %v1059_v44  ;;  %v433_v13 = vadd.f32 %v432_v37, %v431_v27  ;;  %v1162_v30 = vrot.slane %v1161_v42, 4 }
  0x6b   : > { %v331_v60 = vadd.f32 %v330_v50, %v329_v25 }
  0x6c   : > { %v1062_v28 = vrot.slane %v1061_v34, 1  ;;  %v435_v32 = vadd.f32 %v434_v8, %v433_v13  ;;  %v1163_v55 = vadd.f32 %v1162_v30, %v1161_v42  ;;  %v4222_v30 = vld [vmem:[#allocation15_spill] sm:$0xff] }
  0x6d   : > { %v333_v6 = vadd.f32 %v332_v18, %v331_v60 }
  0x6e   : > { %v1063_v62 = vadd.f32 %v1062_v28, %v1061_v34  ;;  %v437_v59 = vadd.f32 %v436_v58, %v435_v32  ;;  %v1164_v11 = vrot.slane %v1163_v55, 2  ;;  %v4220_v32 = vld [vmem:[#allocation16_spill] sm:$0xff] }
  0x6f   : > { %v335_v33 = vadd.f32 %v334_v24, %v333_v6  ;;  %v4219_v24 = vld [vmem:[#allocation6_spill] sm:$0xff] }
  0x70   : > { %v1064_v45 = vmax.f32 %v1063_v62, 1e-24  ;;  %v439_v61 = vadd.f32 %v438_v47, %v437_v59  ;;  %v1165_v12 = vadd.f32 %v1164_v11, %v1163_v55 }
  0x71   : > { %v337_v14 = vadd.f32 %v336_v38, %v335_v33  ;;  %v4221_v38 = vld [vmem:[#allocation5_spill] sm:$0xff] }
  0x72   : > { %2899 = vrsqrt.f32 %v1064_v45  ;;  %v441_v10 = vadd.f32 %v440_v43, %v439_v61  ;;  %v1166_v31 = vrot.slane %v1165_v12, 1  ;;  %v4223_v61 = vld [vmem:[#allocation8_spill] sm:$0xff] }
  0x73   : > { %v3538_v36 = vadd.f32 %v338_v5, %v337_v14  ;;  %v4224_v14 = vld [vmem:[#allocation18_spill] sm:$0xff] }
  0x74   : > { %v443_v29 = vadd.f32 %v442_v15, %v441_v10  ;;  %v1167_v13 = vadd.f32 %v1166_v31, %v1165_v12 }
  0x76   : > { %v444_v54 = vrot.slane %v443_v29, 4  ;;  %v1168_v43 = vmax.f32 %v1167_v13, 1e-24 }
  0x78   : > { %v445_v44 = vadd.f32 %v444_v54, %v443_v29  ;;  %v4225_v29 = vld [vmem:[#allocation7_spill] sm:$0xff]  ;;  %v4226_v54 = vld [vmem:[#allocation17_spill] sm:$0xff]  ;;  %2901 = vrsqrt.f32 %v1168_v43 }
  0x7a   : > { %v446_v22 = vrot.slane %v445_v44, 2 }
  0x7c   : > { %v3540_v56 = vpop.eup %2899  ;;  %v447_v4 = vadd.f32 %v446_v22, %v445_v44  ;;  %v4227_v22 = vld [vmem:[#allocation10_spill] sm:$0xff] }
  0x7d   : > { %v1068_v26 = vmul.f32 %v3540_v56, %v3044_v2  ;;  %v1084_v19 = vmul.f32 %v3540_v56, %v3174_v46  ;;  %v1066_v48 = vmul.f32 %v3540_v56, %v3038_v0  ;;  %v1082_v17 = vmul.f32 %v3540_v56, %v3154_v40 }
  0x7e   : > { %v1069_v21 = vmul.f32 %v3540_v56, %v3047_v3  ;;  %v1085_v35 = vmul.f32 %v3540_v56, %v3183_v51  ;;  %v1067_v39 = vmul.f32 %v3540_v56, %v3041_v1  ;;  %v1083_v53 = vmul.f32 %v3540_v56, %v3157_v41 }
  0x7f   : > { %v2433_v37 = vpack.i.bf16 %v1068_v26, %v1084_v19  ;;  %v2423_v50 = vpack.i.bf16 %v1066_v48, %v1082_v17  ;;  %v448_v34 = vrot.slane %v447_v4, 1  ;;  %v1071_v8 = vmul.f32 %v3540_v56, %v3069_v9 }
  0x80   : > { %v2438_v27 = vpack.i.bf16 %v1069_v21, %v1085_v35  ;;  %v1087_v25 = vmul.f32 %v3540_v56, %v3199_v57  ;;  %v2428_v18 = vpack.i.bf16 %v1067_v39, %v1083_v53  ;;  %v1070_v28 = vmul.f32 %v3540_v56, %v3062_v7  ;;  %v4229_v21 = vld [vmem:[#allocation19_spill] sm:$0xff]  ;;  %v4230_v39 = vld [vmem:[#allocation12_spill] sm:$0xff] }
  0x81   : > { %2434 = vrot.lane.b32.xlu1 %v2433_v37, %s2975_s27  ;;  %2424 = vrot.lane.b32.xlu0 %v2423_v50, %s2975_s27  ;;  %v1086_v42 = vmul.f32 %v3540_v56, %v3186_v52  ;;  %v449_v58 = vadd.f32 %v448_v34, %v447_v4  ;;  %v1073_v62 = vmul.f32 %v3540_v56, %v4219_v24  ;;  %v4228_v4 = vld [vmem:[#allocation9_spill] sm:$0xff]  ;;  %v4231_v34 = vld [vmem:[#allocation11_spill] sm:$0xff] }
  0x82   : > { %v2448_v60 = vpack.i.bf16 %v1071_v8, %v1087_v25  ;;  %v1089_v47 = vmul.f32 %v3540_v56, %v4220_v32  ;;  %v1072_v45 = vmul.f32 %v3540_v56, %v4221_v38  ;;  %v1088_v59 = vmul.f32 %v3540_v56, %v4222_v30  ;;  %v3613_v13 = vpop.eup %2901 }
  0x83   : > { %v2443_v6 = vpack.i.bf16 %v1070_v28, %v1086_v42  ;;  %v450_v33 = vmax.f32 %v449_v58, 1e-24  ;;  %v1075_v15 = vmul.f32 %v3540_v56, %v4223_v61  ;;  %v1091_v55 = vmul.f32 %v3540_v56, %v4224_v14 }
  0x84   : > { %v2458_v5 = vpack.i.bf16 %v1073_v62, %v1089_v47  ;;  %v2453_v10 = vpack.i.bf16 %v1072_v45, %v1088_v59  ;;  %v1074_v11 = vmul.f32 %v3540_v56, %v4225_v29  ;;  %v1090_v44 = vmul.f32 %v3540_v56, %v4226_v54 }
  0x85   : > { %2439 = vrot.lane.b32.xlu1 %v2438_v27, %s2975_s27  ;;  %2429 = vrot.lane.b32.xlu0 %v2428_v18, %s2975_s27  ;;  %2903 = vrsqrt.f32 %v450_v33  ;;  %v2468_v12 = vpack.i.bf16 %v1075_v15, %v1091_v55  ;;  %v1077_v26 = vmul.f32 %v3540_v56, %v4227_v22  ;;  %v1093_v19 = vmul.f32 %v3540_v56, %v3287_v23  ;;  %v4232_v18 = vld [vmem:[#allocation14_spill] sm:$0xff] }
  0x86   : > { %v2463_v48 = vpack.i.bf16 %v1074_v11, %v1090_v44  ;;  %v1076_v17 = vmul.f32 %v3540_v56, %v4228_v4  ;;  %v1092_v35 = vmul.f32 %v3540_v56, %v4229_v21  ;;  %v1079_v53 = vmul.f32 %v3540_v56, %v4230_v39 }
  0x87   : > { %v2478_v37 = vpack.i.bf16 %v1077_v26, %v1093_v19  ;;  %v1095_v31 = vmul.f32 %v3540_v56, %v3318_v63  ;;  %v1078_v27 = vmul.f32 %v3540_v56, %v4231_v34  ;;  %v1094_v8 = vmul.f32 %v3540_v56, %v3304_v20 }
  0x88   : > { %v2473_v50 = vpack.i.bf16 %v1076_v17, %v1092_v35  ;;  %v1081_v28 = vmul.f32 %v3540_v56, %v4232_v18  ;;  %v1097_v42 = vmul.f32 %v3540_v56, %v3355_v16  ;;  %v1096_v47 = vmul.f32 %v3540_v56, %v3343_v49 }
  0x89   : > { %2449 = vrot.lane.b32.xlu1 %v2448_v60, %s2975_s27  ;;  %2444 = vrot.lane.b32.xlu0 %v2443_v6, %s2975_s27  ;;  %v2488_v25 = vpack.i.bf16 %v1079_v53, %v1095_v31  ;;  %v2483_v58 = vpack.i.bf16 %v1078_v27, %v1094_v8  ;;  %v4233_v60 = vld [vmem:[#allocation13_spill] sm:$0xff]  ;;  %v1186_v59 = vmul.f32 %v3613_v13, %v3154_v40 }
  0x8a   : > { %v1080_v62 = vmul.f32 %v3540_v56, %v4233_v60  ;;  %v2498_v45 = vpack.i.bf16 %v1081_v28, %v1097_v42  ;;  %v1187_v43 = vmul.f32 %v3613_v13, %v3157_v41  ;;  %v1170_v55 = vmul.f32 %v3613_v13, %v3038_v0 }
  0x8b   : > { %v1188_v26 = vmul.f32 %v3613_v13, %v3174_v46  ;;  %v1189_v19 = vmul.f32 %v3613_v13, %v3183_v51  ;;  %v1172_v35 = vmul.f32 %v3613_v13, %v3044_v2  ;;  %v1191_v27 = vmul.f32 %v3613_v13, %v3199_v57 }
  0x8c   : > { %v2493_v33 = vpack.i.bf16 %v1080_v62, %v1096_v47  ;;  %v2508_v15 = vpack.i.bf16 %v1187_v43, %v1186_v59  ;;  %v1174_v28 = vmul.f32 %v3613_v13, %v3062_v7  ;;  %v1175_v42 = vmul.f32 %v3613_v13, %v3069_v9 }
  0x8d   : > { %2459 = vrot.lane.b32.xlu1 %v2458_v5, %s2975_s27  ;;  %2454 = vrot.lane.b32.xlu0 %v2453_v10, %s2975_s27  ;;  %v1171_v10 = vmul.f32 %v3613_v13, %v3041_v1  ;;  %v2528_v17 = vpack.i.bf16 %v1189_v19, %v1188_v26  ;;  %v1192_v47 = vmul.f32 %v3613_v13, %v4222_v30 }
  0x8f   : > { %v3620_v6 = vpop.eup %2903 }
  0x90   : > { %v468_v5 = vmul.f32 %v3620_v6, %v3154_v40  ;;  %v469_v56 = vmul.f32 %v3620_v6, %v3157_v41  ;;  %v452_v44 = vmul.f32 %v3620_v6, %v3038_v0  ;;  %v2518_v41 = vpack.i.bf16 %v1171_v10, %v1170_v55 }
  0x91   : > { %2469 = vrot.lane.b32.xlu1 %v2468_v12, %s2975_s27  ;;  %2464 = vrot.lane.b32.xlu0 %v2463_v48, %s2975_s27  ;;  %v453_v12 = vmul.f32 %v3620_v6, %v3041_v1  ;;  %v470_v0 = vmul.f32 %v3620_v6, %v3174_v46  ;;  %v471_v1 = vmul.f32 %v3620_v6, %v3183_v51 }
  0x92   : > { %v2503_v11 = vpack.i.bf16 %v469_v56, %v468_v5  ;;  %v454_v31 = vmul.f32 %v3620_v6, %v3044_v2  ;;  %v455_v46 = vmul.f32 %v3620_v6, %v3047_v3  ;;  %v473_v2 = vmul.f32 %v3620_v6, %v3199_v57 }
  0x93   : > { %v2513_v48 = vpack.i.bf16 %v453_v12, %v452_v44  ;;  %v2523_v53 = vpack.i.bf16 %v471_v1, %v470_v0  ;;  %v456_v62 = vmul.f32 %v3620_v6, %v3062_v7  ;;  %v2558_v57 = vpack.i.bf16 %v1175_v42, %v1174_v28 }
  0x94   : > { %v2533_v8 = vpack.i.bf16 %v455_v46, %v454_v31  ;;  %v474_v43 = vmul.f32 %v3620_v6, %v4222_v30  ;;  %v475_v7 = vmul.f32 %v3620_v6, %v4220_v32  ;;  %v1177_v5 = vmul.f32 %v3613_v13, %v4219_v24 }
  0x95   : > { %2479 = vrot.lane.b32.xlu1 %v2478_v37, %s2975_s27  ;;  %2474 = vrot.lane.b32.xlu0 %v2473_v50, %s2975_s27  ;;  %v1173_v37 = vmul.f32 %v3613_v13, %v3047_v3  ;;  %v1190_v50 = vmul.f32 %v3613_v13, %v3186_v52  ;;  %v459_v30 = vmul.f32 %v3620_v6, %v4219_v24 }
  0x96   : > { %v2563_v56 = vpack.i.bf16 %v475_v7, %v474_v43  ;;  %v1194_v55 = vmul.f32 %v3613_v13, %v4226_v54  ;;  %v1195_v10 = vmul.f32 %v3613_v13, %v4224_v14  ;;  %v476_v44 = vmul.f32 %v3620_v6, %v4226_v54 }
  0x97   : > { %v2538_v51 = vpack.i.bf16 %v1173_v37, %v1172_v35  ;;  %v2548_v3 = vpack.i.bf16 %v1191_v27, %v1190_v50  ;;  %v1178_v12 = vmul.f32 %v3613_v13, %v4225_v29  ;;  %v460_v19 = vmul.f32 %v3620_v6, %v4225_v29 }
  0x98   : > { %v2588_v24 = vpack.i.bf16 %v1195_v10, %v1194_v55  ;;  %v461_v54 = vmul.f32 %v3620_v6, %v4223_v61  ;;  %v1197_v0 = vmul.f32 %v3613_v13, %v3287_v23  ;;  %v479_v29 = vmul.f32 %v3620_v6, %v3287_v23  ;;  %v3793_v55 = vld [vmem:[%s3035_s26 + $0x88] sm:$0xff] }
  0x99   : > { %2489 = vrot.lane.b32.xlu1 %v2488_v25, %s2975_s27  ;;  %2484 = vrot.lane.b32.xlu0 %v2483_v58, %s2975_s27  ;;  %v472_v25 = vmul.f32 %v3620_v6, %v3186_v52  ;;  %v457_v52 = vmul.f32 %v3620_v6, %v3069_v9  ;;  %v1180_v35 = vmul.f32 %v3613_v13, %v4228_v4 }
  0x9a   : > { %v2593_v1 = vpack.i.bf16 %v461_v54, %v460_v19  ;;  %v1181_v37 = vmul.f32 %v3613_v13, %v4227_v22  ;;  %v462_v31 = vmul.f32 %v3620_v6, %v4228_v4  ;;  %v1198_v46 = vmul.f32 %v3613_v13, %v3304_v20 }
  0x9b   : > { %v2543_v58 = vpack.i.bf16 %v473_v2, %v472_v25  ;;  %v2553_v59 = vpack.i.bf16 %v457_v52, %v456_v62  ;;  %v480_v27 = vmul.f32 %v3620_v6, %v3304_v20  ;;  %v481_v4 = vmul.f32 %v3620_v6, %v3318_v63 }
  0x9c   : > { %v2618_v23 = vpack.i.bf16 %v1181_v37, %v1180_v35  ;;  %v1182_v25 = vmul.f32 %v3613_v13, %v4231_v34  ;;  %v1183_v2 = vmul.f32 %v3613_v13, %v4230_v39  ;;  %v464_v20 = vmul.f32 %v3620_v6, %v4231_v34  ;;  %v3821_v35 = vld [vmem:[%s3035_s26 + $0x8] sm:$0xff] }
  0x9d   : > { %2499 = vrot.lane.b32.xlu1 %v2498_v45, %s2975_s27  ;;  %2494 = vrot.lane.b32.xlu0 %v2493_v33, %s2975_s27  ;;  %v1193_v45 = vmul.f32 %v3613_v13, %v4220_v32  ;;  %v1176_v33 = vmul.f32 %v3613_v13, %v4221_v38  ;;  %v1201_v62 = vmul.f32 %v3613_v13, %v3355_v16 }
  0x9e   : > { %v2638_v42 = vpack.i.bf16 %v1183_v2, %v1182_v25  ;;  %v482_v34 = vmul.f32 %v3620_v6, %v3343_v49  ;;  %v466_v43 = vmul.f32 %v3620_v6, %v4233_v60 }
  0x9f   : > { %v2568_v9 = vpack.i.bf16 %v1193_v45, %v1192_v47  ;;  %v2578_v32 = vpack.i.bf16 %v1177_v5, %v1176_v33  ;;  %v1184_v47 = vmul.f32 %v3613_v13, %v4233_v60  ;;  %v1185_v45 = vmul.f32 %v3613_v13, %v4232_v18 }
  0xa1   : > { %2509 = vrot.lane.b32.xlu1 %v2508_v15, %s2976_s28  ;;  %2504 = vrot.lane.b32.xlu0 %v2503_v11, %s2977_s29  ;;  %v458_v15 = vmul.f32 %v3620_v6, %v4221_v38  ;;  %v477_v38 = vmul.f32 %v3620_v6, %v4224_v14  ;;  %v2658_v7 = vpack.i.bf16 %v1185_v45, %v1184_v47  ;;  %v3861_v45 = vld [vmem:[%s3035_s26 + $0xb0] sm:$0xff] }
  0xa3   : > { %v2573_v11 = vpack.i.bf16 %v459_v30, %v458_v15  ;;  %v2583_v26 = vpack.i.bf16 %v477_v38, %v476_v44 }
  0xa5   : > { %2519 = vrot.lane.b32.xlu1 %v2518_v41, %s2976_s28  ;;  %2514 = vrot.lane.b32.xlu0 %v2513_v48, %s2977_s29  ;;  %v1179_v41 = vmul.f32 %v3613_v13, %v4223_v61  ;;  %v1196_v48 = vmul.f32 %v3613_v13, %v4229_v21 }
  0xa7   : > { %v2598_v14 = vpack.i.bf16 %v1179_v41, %v1178_v12  ;;  %v2608_v61 = vpack.i.bf16 %v1197_v0, %v1196_v48  ;;  %v3802_v41 = vld [vmem:[%s3035_s26 + $0x90] sm:$0xff] }
  0xa9   : > { %2529 = vrot.lane.b32.xlu1 %v2528_v17, %s2976_s28  ;;  %2524 = vrot.lane.b32.xlu0 %v2523_v53, %s2977_s29  ;;  %v478_v17 = vmul.f32 %v3620_v6, %v4229_v21  ;;  %v463_v21 = vmul.f32 %v3620_v6, %v4227_v22  ;;  %v340_v22 = vrot.slane %v3538_v36, 4 }
  0xab   : > { %v2603_v53 = vpack.i.bf16 %v479_v29, %v478_v17  ;;  %v2613_v50 = vpack.i.bf16 %v463_v21, %v462_v31  ;;  %v341_v28 = vadd.f32 %v340_v22, %v3538_v36  ;;  %v3816_v29 = vld [vmem:[%s3035_s26 + $0x98] sm:$0xff] }
  0xad   : > { %2539 = vrot.lane.b32.xlu1 %v2538_v51, %s2976_s28  ;;  %2534 = vrot.lane.b32.xlu0 %v2533_v8, %s2977_s29  ;;  %v1199_v51 = vmul.f32 %v3613_v13, %v3318_v63  ;;  %v465_v63 = vmul.f32 %v3620_v6, %v4230_v39  ;;  %v483_v39 = vmul.f32 %v3620_v6, %v3355_v16 }
  0xaf   : > { %v2628_v8 = vpack.i.bf16 %v1199_v51, %v1198_v46  ;;  %v2633_v52 = vpack.i.bf16 %v465_v63, %v464_v20 }
  0xb1   : > { %2549 = vrot.lane.b32.xlu1 %v2548_v3, %s2976_s28  ;;  %2544 = vrot.lane.b32.xlu0 %v2543_v58, %s2977_s29  ;;  %v2623_v3 = vpack.i.bf16 %v481_v4, %v480_v27  ;;  %v1200_v58 = vmul.f32 %v3613_v13, %v3343_v49  ;;  %v467_v49 = vmul.f32 %v3620_v6, %v4232_v18 }
  0xb3   : > { %v2648_v36 = vpack.i.bf16 %v1201_v62, %v1200_v58 }
  0xb5   : > { %2559 = vrot.lane.b32.xlu1 %v2558_v57, %s2976_s28  ;;  %2554 = vrot.lane.b32.xlu0 %v2553_v59, %s2977_s29  ;;  %v342_v57 = vrot.slane %v341_v28, 2  ;;  %v2643_v59 = vpack.i.bf16 %v483_v39, %v482_v34  ;;  %v3853_v34 = vld [vmem:[%s3035_s26 + $0x18] sm:$0xff] }
  0xb7   : > { %v343_v16 = vadd.f32 %v342_v57, %v341_v28  ;;  %v3846_v28 = vld [vmem:[%s3035_s26 + $0xa8] sm:$0xff] }
  0xb9   : > { %2569 = vrot.lane.b32.xlu1 %v2568_v9, %s2976_s28  ;;  %2564 = vrot.lane.b32.xlu0 %v2563_v56, %s2977_s29  ;;  %v2653_v9 = vpack.i.bf16 %v467_v49, %v466_v43  ;;  %v344_v33 = vrot.slane %v343_v16, 1 }
  0xbb   : > { %v345_v13 = vadd.f32 %v344_v33, %v343_v16 }
  0xbd   : > { %2579 = vrot.lane.b32.xlu1 %v2578_v32, %s2976_s28  ;;  %2574 = vrot.lane.b32.xlu0 %v2573_v11, %s2977_s29  ;;  %v346_v5 = vmax.f32 %v345_v13, 1e-24 }
  0xbf   : > { %2905 = vrsqrt.f32 %v346_v5  ;;  %v3877_v5 = vld [vmem:[%s3035_s26 + $0xb8] sm:$0xff] }
  0xc1   : > { %2589 = vrot.lane.b32.xlu1 %v2588_v24, %s2976_s28  ;;  %2584 = vrot.lane.b32.xlu0 %v2583_v26, %s2977_s29 }
  0xc5   : > { %2599 = vrot.lane.b32.xlu1 %v2598_v14, %s2976_s28  ;;  %2594 = vrot.lane.b32.xlu0 %v2593_v1, %s2977_s29  ;;  %v3809_v14 = vld [vmem:[%s3035_s26] sm:$0xff] }
  0xc9   : > { %2609 = vrot.lane.b32.xlu1 %v2608_v61, %s2976_s28  ;;  %2604 = vrot.lane.b32.xlu0 %v2603_v53, %s2977_s29  ;;  %v3788_v60 = vpop.eup %2905 }
  0xca   : > { %v364_v56 = vmul.f32 %v3788_v60, %v3154_v40  ;;  %v365_v10 = vmul.f32 %v3793_v55, %v3788_v60  ;;  %v366_v26 = vmul.f32 %v3802_v41, %v3788_v60  ;;  %v348_v48 = vmul.f32 %v3809_v14, %v3788_v60 }
  0xcb   : > { %v367_v61 = vmul.f32 %v3816_v29, %v3788_v60  ;;  %v349_v37 = vmul.f32 %v3821_v35, %v3788_v60  ;;  %v351_v39 = vmul.f32 %v3853_v34, %v3788_v60 }
  0xcd   : > { %2619 = vrot.lane.b32.xlu1 %v2618_v23, %s2976_s28  ;;  %2614 = vrot.lane.b32.xlu0 %v2613_v50, %s2977_s29  ;;  %v3829_v23 = vld [vmem:[%s3035_s26 + $0xa0] sm:$0xff] }
  0xce   : > { %v368_v46 = vmul.f32 %v3829_v23, %v3788_v60 }
  0xd1   : > { %2629 = vrot.lane.b32.xlu1 %v2628_v8, %s2976_s28  ;;  %2624 = vrot.lane.b32.xlu0 %v2623_v3, %s2977_s29  ;;  %v3838_v8 = vld [vmem:[%s3035_s26 + $0x10] sm:$0xff] }
  0xd2   : > { %v350_v25 = vmul.f32 %v3838_v8, %v3788_v60 }
  0xd5   : > { %2639 = vrot.lane.b32.xlu1 %v2638_v42, %s2976_s28  ;;  %2634 = vrot.lane.b32.xlu0 %v2633_v52, %s2977_s29  ;;  %v369_v42 = vmul.f32 %v3846_v28, %v3788_v60 }
  0xd9   : > { %2649 = vrot.lane.b32.xlu1 %v2648_v36, %s2976_s28  ;;  %2644 = vrot.lane.b32.xlu0 %v2643_v59, %s2977_s29  ;;  %v370_v59 = vmul.f32 %v3861_v45, %v3788_v60 }
  0xdd   : > { %2659 = vrot.lane.b32.xlu1 %v2658_v7, %s2976_s28  ;;  %2654 = vrot.lane.b32.xlu0 %v2653_v9, %s2977_s29  ;;  %v3869_v7 = vld [vmem:[%s3035_s26 + $0x20] sm:$0xff] }
  0xde   : > { %v352_v9 = vmul.f32 %v3869_v7, %v3788_v60 }
  0xf3   : > { %v2435_v18 = vpop.permute.xlu1 %2434  ;;  %v2425_v6 = vpop.permute.xlu0 %2424 }
  0xf4   : > { %v2426_v15 = vunpack.i.l.bf16 %v2425_v6  ;;  %v2436_v40 = vunpack.i.l.bf16 %v2435_v18  ;;  %v2427_v54 = vunpack.i.h.bf16 %v2425_v6  ;;  %v2437_v22 = vunpack.i.h.bf16 %v2435_v18 }
  0xf5   : > { %v371_v18 = vmul.f32 %v3877_v5, %v3788_v60 }
  0xf6   : > { %v2663_v11 = vpack.i.bf16 %v2426_v15, %v364_v56  ;;  %v2667_v1 = vpack.i.bf16 %v2436_v40, %v366_v26  ;;  %v2700_v51 = vpack.i.bf16 %v2427_v54, %v348_v48  ;;  %v2704_v62 = vpack.i.bf16 %v2437_v22, %v350_v25  ;;  %v3882_v56 = vld [vmem:[%s3035_s26 + $0x28] sm:$0xff]  ;;  %v3889_v48 = vld [vmem:[%s3035_s26 + $0xc0] sm:$0xff] }
  0xf7   : > { %v2440_v30 = vpop.permute.xlu1 %2439  ;;  %v2430_v32 = vpop.permute.xlu0 %2429  ;;  %v353_v15 = vmul.f32 %v3882_v56, %v3788_v60 }
  0xf8   : > { %v2431_v44 = vunpack.i.l.bf16 %v2430_v32  ;;  %v2441_v17 = vunpack.i.l.bf16 %v2440_v30  ;;  %v2432_v31 = vunpack.i.h.bf16 %v2430_v32  ;;  %v2442_v52 = vunpack.i.h.bf16 %v2440_v30 }
  0xfa   : > { %v2665_v24 = vpack.i.bf16 %v2431_v44, %v365_v10  ;;  %v2669_v27 = vpack.i.bf16 %v2441_v17, %v367_v61  ;;  %v2702_v2 = vpack.i.bf16 %v2432_v31, %v349_v37  ;;  %v2706_v49 = vpack.i.bf16 %v2442_v52, %v351_v39  ;;  %v3894_v61 = vld [vmem:[%s3035_s26 + $0x30] sm:$0xff]  ;;  %v3906_v39 = vld [vmem:[%s3035_s26 + $0x38] sm:$0xff] }
  0xfb   : > { %v3797_v38 = vpop.permute.xlu1 %2449  ;;  %2664 = vxpose.xlu0.b32.start [1/16] (narrow) %v2663_v11, 8  ;;  %v3799_v12 = vpop.permute.xlu0 %2444 }
  0xfc   : > { %v2446_v21 = vunpack.i.l.bf16 %v3799_v12  ;;  %v2451_v63 = vunpack.i.l.bf16 %v3797_v38  ;;  %v2447_v16 = vunpack.i.h.bf16 %v3799_v12  ;;  %v2452_v32 = vunpack.i.h.bf16 %v3797_v38 }
  0xfd   : > { %v354_v38 = vmul.f32 %v3894_v61, %v3788_v60 }
  0xfe   : > { %v2671_v3 = vpack.i.bf16 %v2446_v21, %v368_v46  ;;  %v2673_v36 = vpack.i.bf16 %v2451_v63, %v369_v42  ;;  %v2708_v10 = vpack.i.bf16 %v2447_v16, %v352_v9  ;;  %v2710_v21 = vpack.i.bf16 %v2452_v32, %v353_v15  ;;  %v3901_v63 = vld [vmem:[%s3035_s26 + $0xc8] sm:$0xff]  ;;  %v3913_v32 = vld [vmem:[%s3035_s26 + $0xd0] sm:$0xff] }
  0xff   : > { %v3806_v19 = vpop.permute.xlu1 %2459  ;;  %2666 = vxpose.xlu0.b32.cont [2/16] (narrow) %v2665_v24, 8  ;;  %v3813_v0 = vpop.permute.xlu0 %2454  ;;  %v373_v42 = vmul.f32 %v3901_v63, %v3788_v60 }
 0x100   : > { %v2456_v47 = vunpack.i.l.bf16 %v3813_v0  ;;  %v2461_v13 = vunpack.i.l.bf16 %v3806_v19  ;;  %v2457_v46 = vunpack.i.h.bf16 %v3813_v0  ;;  %v355_v0 = vmul.f32 %v3906_v39, %v3788_v60 }
 0x102   : > { %v2675_v6 = vpack.i.bf16 %v2456_v47, %v370_v59  ;;  %v2677_v26 = vpack.i.bf16 %v2461_v13, %v371_v18  ;;  %v2462_v59 = vunpack.i.h.bf16 %v3806_v19  ;;  %v3918_v19 = vld [vmem:[%s3035_s26 + $0x40] sm:$0xff] }
 0x103   : > { %v3825_v53 = vpop.permute.xlu1 %2469  ;;  %2668 = vxpose.xlu0.b32.cont [3/16] (narrow) %v2667_v1, 8  ;;  %v3833_v50 = vpop.permute.xlu0 %2464  ;;  %v372_v1 = vmul.f32 %v3889_v48, %v3788_v60 }
 0x104   : > { %v2466_v54 = vunpack.i.l.bf16 %v3833_v50 }
 0x106   : > { %2701 = vxpose.xlu1.b32.start [1/16] (narrow) %v2700_v51, 8 }
 0x107   : > { %v3835_v4 = vpop.permute.xlu1 %2479  ;;  %2670 = vxpose.xlu0.b32.cont [4/16] (narrow) %v2669_v27, 8  ;;  %v3842_v20 = vpop.permute.xlu0 %2474 }
 0x10a   : > { %2703 = vxpose.xlu1.b32.cont [2/16] (narrow) %v2702_v2, 8 }
 0x10b   : > { %v3850_v58 = vpop.permute.xlu1 %2489  ;;  %2672 = vxpose.xlu0.b32.cont [5/16] (narrow) %v2671_v3, 8  ;;  %v3857_v57 = vpop.permute.xlu0 %2484  ;;  %v2471_v3 = vunpack.i.l.bf16 %v3825_v53 }
 0x10d   : > { %v2681_v15 = vpack.i.bf16 %v2471_v3, %v373_v42  ;;  %v2472_v3 = vunpack.i.h.bf16 %v3825_v53  ;;  %v3942_v53 = vld [vmem:[%s3035_s26 + $0x50] sm:$0xff] }
 0x10e   : > { %2705 = vxpose.xlu1.b32.cont [3/16] (narrow) %v2704_v62, 8  ;;  %v2679_v62 = vpack.i.bf16 %v2466_v54, %v372_v1 }
 0x10f   : > { %v3865_v43 = vpop.permute.xlu1 %2499  ;;  %2674 = vxpose.xlu0.b32.cont [6/16] (narrow) %v2673_v36, 8  ;;  %v3873_v33 = vpop.permute.xlu0 %2494 }
 0x112   : > { %2707 = vxpose.xlu1.b32.cont [4/16] (narrow) %v2706_v49, 8  ;;  %v2712_v49 = vpack.i.bf16 %v2457_v46, %v354_v38 }
 0x113   : > { %v2510_v30 = vpop.permute.xlu1 %2509  ;;  %2676 = vxpose.xlu0.b32.cont [7/16] (narrow) %v2675_v6, 8  ;;  %v2505_v24 = vpop.permute.xlu0 %2504 }
 0x114   : > { %v2512_v11 = vunpack.i.h.bf16 %v2510_v30  ;;  %v2511_v44 = vunpack.i.l.bf16 %v2510_v30  ;;  %v2507_v12 = vunpack.i.h.bf16 %v2505_v24  ;;  %v2506_v40 = vunpack.i.l.bf16 %v2505_v24 }
 0x115   : > { %v2476_v30 = vunpack.i.l.bf16 %v3842_v20 }
 0x116   : > { %2709 = vxpose.xlu1.b32.cont [5/16] (narrow) %v2708_v10, 8  ;;  %v2311_v17 = vpack.c.bf16 %v2512_v11, %v2511_v44  ;;  %v2231_v31 = vpack.c.bf16 %v2507_v12, %v2506_v40  ;;  %v374_v10 = vmul.f32 %v3913_v32, %v3788_v60  ;;  %v356_v44 = vmul.f32 %v3918_v19, %v3788_v60 }
 0x117   : > { %v2520_v37 = vpop.permute.xlu1 %2519  ;;  %2678 = vxpose.xlu0.b32.cont [8/16] (narrow) %v2677_v26, 8  ;;  %v2515_v22 = vpop.permute.xlu0 %2514  ;;  %v2714_v40 = vpack.i.bf16 %v2462_v59, %v355_v0  ;;  %v2467_v26 = vunpack.i.h.bf16 %v3833_v50 }
 0x118   : > { %v2522_v51 = vunpack.i.h.bf16 %v2520_v37  ;;  %v2521_v27 = vunpack.i.l.bf16 %v2520_v37  ;;  %2312 = vmatprep.subr.bf16.mxu0 %v2311_v17  ;;  %v2517_v25 = vunpack.i.h.bf16 %v2515_v22  ;;  %v2516_v2 = vunpack.i.l.bf16 %v2515_v22  ;;  %2232 = vmatprep.subr.bf16.mxu1 %v2231_v31  ;;  %v3930_v22 = vld [vmem:[%s3035_s26 + $0x48] sm:$0xff] }
 0x119   : > { %v2481_v31 = vunpack.i.l.bf16 %v3835_v4  ;;  %v357_v50 = vmul.f32 %v3930_v22, %v3788_v60  ;;  %v2716_v42 = vpack.i.bf16 %v2467_v26, %v356_v44  ;;  %v2491_v26 = vunpack.i.l.bf16 %v3850_v58 }
 0x11a   : > { %2711 = vxpose.xlu1.b32.cont [6/16] (narrow) %v2710_v21, 8  ;;  %v2313_v52 = vpack.c.bf16 %v2522_v51, %v2521_v27  ;;  %v2233_v47 = vpack.c.bf16 %v2517_v25, %v2516_v2  ;;  %v3925_v21 = vld [vmem:[%s3035_s26 + $0xd8] sm:$0xff]  ;;  %v2683_v51 = vpack.i.bf16 %v2476_v30, %v374_v10  ;;  %v2477_v10 = vunpack.i.h.bf16 %v3842_v20 }
 0x11b   : > { %v2530_v36 = vpop.permute.xlu1 %2529  ;;  %2680 = vxpose.xlu0.b32.cont [9/16] (narrow) %v2679_v62, 8  ;;  %v2525_v13 = vpop.permute.xlu0 %2524  ;;  %v375_v46 = vmul.f32 %v3925_v21, %v3788_v60  ;;  %v2718_v30 = vpack.i.bf16 %v2472_v3, %v357_v50 }
 0x11c   : > { %v2532_v16 = vunpack.i.h.bf16 %v2530_v36  ;;  %v2531_v9 = vunpack.i.l.bf16 %v2530_v36  ;;  %2314 = vmatpush3.bf16.msra.mxu0 %v2313_v52  ;;  %v2527_v18 = vunpack.i.h.bf16 %v2525_v13  ;;  %v2526_v6 = vunpack.i.l.bf16 %v2525_v13  ;;  %2234 = vmatpush3.bf16.msra.mxu1 %v2233_v47 }
 0x11d   : > { %v2685_v59 = vpack.i.bf16 %v2481_v31, %v375_v46 }
 0x11e   : > { %v2315_v11 = vpack.c.bf16 %v2532_v16, %v2531_v9  ;;  %2713 = vxpose.xlu1.b32.cont [7/16] (narrow) %v2712_v49, 8  ;;  %v2235_v12 = vpack.c.bf16 %v2527_v18, %v2526_v6  ;;  %v2486_v49 = vunpack.i.l.bf16 %v3857_v57  ;;  %v3937_v16 = vld [vmem:[%s3035_s26 + $0xe0] sm:$0xff]  ;;  %v358_v18 = vmul.f32 %v3942_v53, %v3788_v60 }
 0x11f   : > { %v2540_v24 = vpop.permute.xlu1 %2539  ;;  %2682 = vxpose.xlu0.b32.cont [10/16] (narrow) %v2681_v15, 8  ;;  %v2535_v17 = vpop.permute.xlu0 %2534  ;;  %v376_v9 = vmul.f32 %v3937_v16, %v3788_v60 }
 0x120   : > { %v2542_v54 = vunpack.i.h.bf16 %v2540_v24  ;;  %v2541_v1 = vunpack.i.l.bf16 %v2540_v24  ;;  %2316 = vmatprep.subr.bf16.mxu0 %v2315_v11  ;;  %v2537_v38 = vunpack.i.h.bf16 %v2535_v17  ;;  %v2536_v37 = vunpack.i.l.bf16 %v2535_v17  ;;  %2236 = vmatprep.subr.bf16.mxu1 %v2235_v12 }
 0x121   : > { %v2687_v17 = vpack.i.bf16 %v2486_v49, %v376_v9 }
 0x122   : > { %v2317_v27 = vpack.c.bf16 %v2542_v54, %v2541_v1  ;;  %2715 = vxpose.xlu1.b32.cont [8/16] (narrow) %v2714_v40, 8  ;;  %v2237_v2 = vpack.c.bf16 %v2537_v38, %v2536_v37  ;;  %v3949_v54 = vld [vmem:[%s3035_s26 + $0xe8] sm:$0xff]  ;;  %v3954_v37 = vld [vmem:[%s3035_s26 + $0x58] sm:$0xff] }
 0x123   : > { %v2550_v25 = vpop.permute.xlu1 %2549  ;;  %2684 = vxpose.xlu0.b32.cont [11/16] (narrow) %v2683_v51, 8  ;;  %v2545_v0 = vpop.permute.xlu0 %2544  ;;  %v377_v1 = vmul.f32 %v3949_v54, %v3788_v60  ;;  %v359_v20 = vmul.f32 %v3954_v37, %v3788_v60  ;;  %v2482_v51 = vunpack.i.h.bf16 %v3835_v4  ;;  %v3966_v4 = vld [vmem:[%s3035_s26 + $0x60] sm:$0xff] }
 0x124   : > { %v2552_v62 = vunpack.i.h.bf16 %v2550_v25  ;;  %v2551_v52 = vunpack.i.l.bf16 %v2550_v25  ;;  %2318 = vmatpush3.bf16.msra.mxu0 %v2317_v27  ;;  %v2547_v36 = vunpack.i.h.bf16 %v2545_v0  ;;  %v2546_v47 = vunpack.i.l.bf16 %v2545_v0  ;;  %2238 = vmatpush3.bf16.msra.mxu1 %v2237_v2  ;;  %v3961_v0 = vld [vmem:[%s3035_s26 + $0xf0] sm:$0xff] }
 0x125   : > { %v2720_v27 = vpack.i.bf16 %v2477_v10, %v358_v18  ;;  %v2487_v18 = vunpack.i.h.bf16 %v3857_v57 }
 0x126   : > { %v2319_v13 = vpack.c.bf16 %v2552_v62, %v2551_v52  ;;  %2717 = vxpose.xlu1.b32.cont [9/16] (narrow) %v2716_v42, 8  ;;  %v2239_v15 = vpack.c.bf16 %v2547_v36, %v2546_v47  ;;  %v2689_v62 = vpack.i.bf16 %v2491_v26, %v377_v1  ;;  %v2496_v52 = vunpack.i.l.bf16 %v3873_v33  ;;  %v3978_v1 = vld [vmem:[%s3035_s26 + $0x68] sm:$0xff] }
 0x127   : > { %v2560_v6 = vpop.permute.xlu1 %2559  ;;  %2686 = vxpose.xlu0.b32.cont [12/16] (narrow) %v2685_v59, 8  ;;  %v2555_v24 = vpop.permute.xlu0 %2554  ;;  %v378_v36 = vmul.f32 %v3961_v0, %v3788_v60  ;;  %v360_v59 = vmul.f32 %v3966_v4, %v3788_v60  ;;  %v361_v57 = vmul.f32 %v3978_v1, %v3788_v60 }
 0x128   : > { %v2562_v11 = vunpack.i.h.bf16 %v2560_v6  ;;  %v2561_v44 = vunpack.i.l.bf16 %v2560_v6  ;;  %2320 = vmatprep.subr.bf16.mxu0 %v2319_v13  ;;  %v2557_v12 = vunpack.i.h.bf16 %v2555_v24  ;;  %v2556_v40 = vunpack.i.l.bf16 %v2555_v24  ;;  %2240 = vmatprep.subr.bf16.mxu1 %v2239_v15  ;;  %v3973_v24 = vld [vmem:[%s3035_s26 + $0xf8] sm:$0xff] }
 0x129   : > { %v2722_v13 = vpack.i.bf16 %v2482_v51, %v359_v20  ;;  %v2492_v20 = vunpack.i.h.bf16 %v3850_v58 }
 0x12a   : > { %v2321_v38 = vpack.c.bf16 %v2562_v11, %v2561_v44  ;;  %2719 = vxpose.xlu1.b32.cont [10/16] (narrow) %v2718_v30, 8  ;;  %v2241_v46 = vpack.c.bf16 %v2557_v12, %v2556_v40  ;;  %v2501_v44 = vunpack.i.l.bf16 %v3865_v43  ;;  %v379_v12 = vmul.f32 %v3973_v24, %v3788_v60 }
 0x12b   : > { %v2570_v31 = vpop.permute.xlu1 %2569  ;;  %2688 = vxpose.xlu0.b32.cont [13/16] (narrow) %v2687_v17, 8  ;;  %v2565_v2 = vpop.permute.xlu0 %2564  ;;  %v2691_v40 = vpack.i.bf16 %v2496_v52, %v378_v36  ;;  %v2726_v36 = vpack.i.bf16 %v2492_v20, %v361_v57 }
 0x12c   : > { %v2572_v50 = vunpack.i.h.bf16 %v2570_v31  ;;  %v2571_v25 = vunpack.i.l.bf16 %v2570_v31  ;;  %2322 = vmatpush3.bf16.msra.mxu0 %v2321_v38  ;;  %v2567_v3 = vunpack.i.h.bf16 %v2565_v2  ;;  %v2566_v42 = vunpack.i.l.bf16 %v2565_v2  ;;  %2242 = vmatpush3.bf16.msra.mxu1 %v2241_v46 }
 0x12d   : > { %v2724_v31 = vpack.i.bf16 %v2487_v18, %v360_v59  ;;  %v2693_v2 = vpack.i.bf16 %v2501_v44, %v379_v12  ;;  %v2502_v44 = vunpack.i.h.bf16 %v3865_v43 }
 0x12e   : > { %v2323_v47 = vpack.c.bf16 %v2572_v50, %v2571_v25  ;;  %2721 = vxpose.xlu1.b32.cont [11/16] (narrow) %v2720_v27, 8  ;;  %v2243_v9 = vpack.c.bf16 %v2567_v3, %v2566_v42  ;;  %v3984_v42 = vld [vmem:[%s3035_s26 + $0x70] sm:$0xff] }
 0x12f   : > { %v2580_v49 = vpop.permute.xlu1 %2579  ;;  %2690 = vxpose.xlu0.b32.cont [14/16] (narrow) %v2689_v62, 8  ;;  %v2575_v30 = vpop.permute.xlu0 %2574  ;;  %v362_v62 = vmul.f32 %v3984_v42, %v3788_v60 }
 0x130   : > { %v2582_v6 = vunpack.i.h.bf16 %v2580_v49  ;;  %v2581_v15 = vunpack.i.l.bf16 %v2580_v49  ;;  %2324 = vmatprep.subr.bf16.mxu0 %v2323_v47  ;;  %v2577_v10 = vunpack.i.h.bf16 %v2575_v30  ;;  %v2576_v11 = vunpack.i.l.bf16 %v2575_v30  ;;  %2244 = vmatprep.subr.bf16.mxu1 %v2243_v9 }
 0x131   : > { %v2497_v47 = vunpack.i.h.bf16 %v3873_v33 }
 0x132   : > { %v2325_v26 = vpack.c.bf16 %v2582_v6, %v2581_v15  ;;  %2723 = vxpose.xlu1.b32.cont [12/16] (narrow) %v2722_v13, 8  ;;  %v2245_v38 = vpack.c.bf16 %v2577_v10, %v2576_v11  ;;  %v3990_v15 = vld [vmem:[%s3035_s26 + $0x78] sm:$0xff] }
 0x133   : > { %v2590_v17 = vpop.permute.xlu1 %2589  ;;  %2692 = vxpose.xlu0.b32.cont [15/16] (narrow) %v2691_v40, 8  ;;  %v2585_v27 = vpop.permute.xlu0 %2584  ;;  %v363_v30 = vmul.f32 %v3990_v15, %v3788_v60  ;;  %v2728_v33 = vpack.i.bf16 %v2497_v47, %v362_v62 }
 0x134   : > { %v2592_v46 = vunpack.i.h.bf16 %v2590_v17  ;;  %v2591_v51 = vunpack.i.l.bf16 %v2590_v17  ;;  %2326 = vmatpush3.bf16.msra.mxu0 %v2325_v26  ;;  %v2587_v50 = vunpack.i.h.bf16 %v2585_v27  ;;  %v2586_v25 = vunpack.i.l.bf16 %v2585_v27  ;;  %2246 = vmatpush3.bf16.msra.mxu1 %v2245_v38 }
 0x136   : > { %v2327_v3 = vpack.c.bf16 %v2592_v46, %v2591_v51  ;;  %2725 = vxpose.xlu1.b32.cont [13/16] (narrow) %v2724_v31, 8  ;;  %v2247_v58 = vpack.c.bf16 %v2587_v50, %v2586_v25  ;;  %v2730_v46 = vpack.i.bf16 %v2502_v44, %v363_v30 }
 0x137   : > { %v2600_v52 = vpop.permute.xlu1 %2599  ;;  %2694 = vxpose.xlu0.b32.end [16/16] (narrow) %v2693_v2, 8  ;;  %v2595_v9 = vpop.permute.xlu0 %2594 }
 0x138   : > { %v2602_v59 = vunpack.i.h.bf16 %v2600_v52  ;;  %v2601_v49 = vunpack.i.l.bf16 %v2600_v52  ;;  %2328 = vmatprep.subr.bf16.mxu0 %v2327_v3  ;;  %v2597_v13 = vunpack.i.h.bf16 %v2595_v9  ;;  %v2596_v18 = vunpack.i.l.bf16 %v2595_v9  ;;  %2248 = vmatprep.subr.bf16.mxu1 %v2247_v58 }
 0x13a   : > { %v2329_v6 = vpack.c.bf16 %v2602_v59, %v2601_v49  ;;  %2727 = vxpose.xlu1.b32.cont [14/16] (narrow) %v2726_v36, 8  ;;  %v2249_v11 = vpack.c.bf16 %v2597_v13, %v2596_v18 }
 0x13b   : > { %v2610_v10 = vpop.permute.xlu1 %2609  ;;  %v2605_v26 = vpop.permute.xlu0 %2604 }
 0x13c   : > { %v2612_v12 = vunpack.i.h.bf16 %v2610_v10  ;;  %v2611_v40 = vunpack.i.l.bf16 %v2610_v10  ;;  %2330 = vmatpush3.bf16.msra.mxu0 %v2329_v6  ;;  %v2607_v57 = vunpack.i.h.bf16 %v2605_v26  ;;  %v2606_v17 = vunpack.i.l.bf16 %v2605_v26  ;;  %2250 = vmatpush3.bf16.msra.mxu1 %v2249_v11 }
 0x13e   : > { %v2331_v38 = vpack.c.bf16 %v2612_v12, %v2611_v40  ;;  %2729 = vxpose.xlu1.b32.cont [15/16] (narrow) %v2728_v33, 8  ;;  %v2251_v31 = vpack.c.bf16 %v2607_v57, %v2606_v17 }
 0x13f   : > { %v2620_v20 = vpop.permute.xlu1 %2619  ;;  %v2615_v60 = vpop.permute.xlu0 %2614 }
 0x140   : > { %v2622_v51 = vunpack.i.h.bf16 %v2620_v20  ;;  %v2621_v27 = vunpack.i.l.bf16 %v2620_v20  ;;  %2332 = vmatprep.subr.bf16.mxu0 %v2331_v38  ;;  %v2617_v50 = vunpack.i.h.bf16 %v2615_v60  ;;  %v2616_v25 = vunpack.i.l.bf16 %v2615_v60  ;;  %2252 = vmatprep.subr.bf16.mxu1 %v2251_v31 }
 0x142   : > { %v2333_v43 = vpack.c.bf16 %v2622_v51, %v2621_v27  ;;  %2731 = vxpose.xlu1.b32.end [16/16] (narrow) %v2730_v46, 8  ;;  %v2253_v3 = vpack.c.bf16 %v2617_v50, %v2616_v25 }
 0x143   : > { %v2630_v2 = vpop.permute.xlu1 %2629  ;;  %v2625_v58 = vpop.permute.xlu0 %2624 }
 0x144   : > { %v2632_v62 = vunpack.i.h.bf16 %v2630_v2  ;;  %v2631_v52 = vunpack.i.l.bf16 %v2630_v2  ;;  %2334 = vmatpush3.bf16.msra.mxu0 %v2333_v43  ;;  %v2627_v36 = vunpack.i.h.bf16 %v2625_v58  ;;  %v2626_v47 = vunpack.i.l.bf16 %v2625_v58  ;;  %2254 = vmatpush3.bf16.msra.mxu1 %v2253_v3  ;;  %v2946_v2 = vld [vmem:[%s3035_s26 + $0x80] sm:$0xff] }
 0x145   : > { %v2742_v3 = vpack.i.bf16 %v3793_v55, %v2946_v2  ;;  %v2772_v55 = vpack.i.bf16 %v3853_v34, %v3838_v8  ;;  %v4028_v8 = vpack.i.bf16 %v3901_v63, %v3889_v48 }
 0x146   : > { %v2335_v59 = vpack.c.bf16 %v2632_v62, %v2631_v52  ;;  %v2255_v9 = vpack.c.bf16 %v2627_v36, %v2626_v47  ;;  %v2752_v62 = vpack.i.bf16 %v3821_v35, %v3809_v14  ;;  %v2762_v52 = vpack.i.bf16 %v3816_v29, %v3802_v41  ;;  %v1810_v36 = vld [vmem:[%s4170_s2] sm:$0xff] }
 0x147   : > { %v2640_v49 = vpop.permute.xlu1 %2639  ;;  %v2635_v6 = vpop.permute.xlu0 %2634  ;;  %v2782_v14 = vpack.i.bf16 %v3846_v28, %v3829_v23  ;;  %v2792_v41 = vpack.i.bf16 %v3882_v56, %v3869_v7  ;;  %v2802_v29 = vpack.i.bf16 %v3877_v5, %v3861_v45  ;;  %v2812_v35 = vpack.i.bf16 %v3906_v39, %v3894_v61 }
 0x148   : > { %v2642_v13 = vunpack.i.h.bf16 %v2640_v49  ;;  %v2641_v18 = vunpack.i.l.bf16 %v2640_v49  ;;  %2336 = vmatprep.subr.bf16.mxu0 %v2335_v59  ;;  %v2637_v30 = vunpack.i.h.bf16 %v2635_v6  ;;  %v2636_v10 = vunpack.i.l.bf16 %v2635_v6  ;;  %2256 = vmatprep.subr.bf16.mxu1 %v2255_v9 }
 0x14a   : > { %v2337_v11 = vpack.c.bf16 %v2642_v13, %v2641_v18  ;;  %v2257_v33 = vpack.c.bf16 %v2637_v30, %v2636_v10 }
 0x14b   : > { %v2650_v44 = vpop.permute.xlu1 %2649  ;;  %v2645_v26 = vpop.permute.xlu0 %2644 }
 0x14c   : > { %v2652_v12 = vunpack.i.h.bf16 %v2650_v44  ;;  %v2651_v40 = vunpack.i.l.bf16 %v2650_v44  ;;  %2338 = vmatpush3.bf16.msra.mxu0 %v2337_v11  ;;  %v2647_v57 = vunpack.i.h.bf16 %v2645_v26  ;;  %v2646_v17 = vunpack.i.l.bf16 %v2645_v26  ;;  %2258 = vmatpush3.bf16.msra.mxu1 %v2257_v33 }
 0x14e   : > { %v2339_v38 = vpack.c.bf16 %v2652_v12, %v2651_v40  ;;  %v2259_v31 = vpack.c.bf16 %v2647_v57, %v2646_v17 }
 0x14f   : > { %v2660_v20 = vpop.permute.xlu1 %2659  ;;  %v2655_v27 = vpop.permute.xlu0 %2654 }
 0x150   : > { %v2662_v46 = vunpack.i.h.bf16 %v2660_v20  ;;  %v2661_v51 = vunpack.i.l.bf16 %v2660_v20  ;;  %2340 = vmatprep.subr.bf16.mxu0 %v2339_v38  ;;  %v2657_v60 = vunpack.i.h.bf16 %v2655_v27  ;;  %v2656_v50 = vunpack.i.l.bf16 %v2655_v27  ;;  %2260 = vmatprep.subr.bf16.mxu1 %v2259_v31 }
 0x152   : > { %v2341_v25 = vpack.c.bf16 %v2662_v46, %v2661_v51  ;;  %v2261_v43 = vpack.c.bf16 %v2657_v60, %v2656_v50 }
 0x154   : > { %2342 = vmatpush3.bf16.msra.mxu0 %v2341_v25  ;;  %2262 = vmatpush3.bf16.msra.mxu1 %v2261_v43 }
 0x160   : > { %2743 = vrot.lane.b32.xlu1 %v2742_v3, %s2978_s30  ;;  %2738 = vrot.lane.b32.xlu0 %v2742_v3, %s2979_s5 }
 0x164   : > { %2753 = vrot.lane.b32.xlu1 %v2752_v62, %s2978_s30  ;;  %2748 = vrot.lane.b32.xlu0 %v2752_v62, %s2979_s5 }
 0x168   : > { %2763 = vrot.lane.b32.xlu1 %v2762_v52, %s2978_s30  ;;  %2758 = vrot.lane.b32.xlu0 %v2762_v52, %s2979_s5 }
 0x16c   : > { %2773 = vrot.lane.b32.xlu1 %v2772_v55, %s2978_s30  ;;  %2768 = vrot.lane.b32.xlu0 %v2772_v55, %s2979_s5 }
 0x170   : > { %2783 = vrot.lane.b32.xlu1 %v2782_v14, %s2978_s30  ;;  %2778 = vrot.lane.b32.xlu0 %v2782_v14, %s2979_s5 }
 0x174   : > { %2793 = vrot.lane.b32.xlu1 %v2792_v41, %s2978_s30  ;;  %2788 = vrot.lane.b32.xlu0 %v2792_v41, %s2979_s5 }
 0x178   : > { %2803 = vrot.lane.b32.xlu1 %v2802_v29, %s2978_s30  ;;  %2798 = vrot.lane.b32.xlu0 %v2802_v29, %s2979_s5 }
 0x17b   : > { %v2695_v23 = vpop.trf.xlu0 }
 0x17c   : > { %2813 = vrot.lane.b32.xlu1 %v2812_v35, %s2978_s30  ;;  %v2696_v28 = vunpack.i.l.bf16 %v2695_v23  ;;  %v2699_v34 = vunpack.i.h.bf16 %v2695_v23  ;;  %2808 = vrot.lane.b32.xlu0 %v2812_v35, %s2979_s5 }
 0x17e   : > { %740 = vmatprep.mubr.f32.mxu1 %v2696_v28  ;;  %1586 = vmatprep.mubr.f32.mxu0 %v2699_v34 }
 0x180   : > { %2823 = vrot.lane.b32.xlu1 %v4028_v8, %s2978_s30 }
 0x186   : > { %v2732_v45 = vpop.trf.xlu1 }
 0x187   : > { %v2733_v7 = vunpack.i.l.bf16 %v2732_v45  ;;  %v2736_v5 = vunpack.i.h.bf16 %v2732_v45 }
 0x189   : > { %741 = vmatmul.mubr.f32.vlgmr.msra.gmra.mrb[0].mxu1 %v2733_v7  ;;  %1587 = vmatmul.mubr.f32.vlgmr.msra.gmra.mrb[0].mxu0 %v2736_v5 }
 0x1d2   : > { %v2744_v56 = vpop.permute.xlu1 %2743  ;;  %v2739_v61 = vpop.permute.xlu0 %2738 }
 0x1d3   : > { %v2746_v39 = vunpack.i.h.bf16 %v2744_v56  ;;  %v2745_v58 = vunpack.i.l.bf16 %v2744_v56  ;;  %v2741_v48 = vunpack.i.h.bf16 %v2739_v61  ;;  %v2740_v63 = vunpack.i.l.bf16 %v2739_v61 }
 0x1d5   : > { %v2343_v47 = vpack.c.bf16 %v2746_v39, %v2745_v58  ;;  %v2263_v59 = vpack.c.bf16 %v2741_v48, %v2740_v63 }
 0x1d6   : > { %v2754_v49 = vpop.permute.xlu1 %2753  ;;  %v2749_v9 = vpop.permute.xlu0 %2748 }
 0x1d7   : > { %v2756_v13 = vunpack.i.h.bf16 %v2754_v49  ;;  %v2755_v18 = vunpack.i.l.bf16 %v2754_v49  ;;  %2345 = vmatprep.subr.msk.bf16.mxu0 %vm4035_vm4, %v2343_v47  ;;  %v2751_v6 = vunpack.i.h.bf16 %v2749_v9  ;;  %v2750_v30 = vunpack.i.l.bf16 %v2749_v9  ;;  %2265 = vmatprep.subr.msk.bf16.mxu1 %vm4035_vm4, %v2263_v59 }
 0x1d9   : > { %v2346_v10 = vpack.c.bf16 %v2756_v13, %v2755_v18  ;;  %v2266_v11 = vpack.c.bf16 %v2751_v6, %v2750_v30 }
 0x1da   : > { %v2764_v44 = vpop.permute.xlu1 %2763  ;;  %v2759_v33 = vpop.permute.xlu0 %2758 }
 0x1db   : > { %v2766_v12 = vunpack.i.h.bf16 %v2764_v44  ;;  %v2765_v40 = vunpack.i.l.bf16 %v2764_v44  ;;  %2348 = vmatpush3.bf16.xpose.msk.msra.mxu0 %vm4035_vm4, %v2346_v10  ;;  %v2761_v26 = vunpack.i.h.bf16 %v2759_v33  ;;  %v2760_v57 = vunpack.i.l.bf16 %v2759_v33  ;;  %2268 = vmatpush3.bf16.xpose.msk.msra.mxu1 %vm4035_vm4, %v2266_v11 }
 0x1dd   : > { %v2349_v17 = vpack.c.bf16 %v2766_v12, %v2765_v40  ;;  %v2269_v38 = vpack.c.bf16 %v2761_v26, %v2760_v57 }
 0x1de   : > { %v2774_v20 = vpop.permute.xlu1 %2773  ;;  %v2769_v31 = vpop.permute.xlu0 %2768 }
 0x1df   : > { %v2776_v46 = vunpack.i.h.bf16 %v2774_v20  ;;  %v2775_v51 = vunpack.i.l.bf16 %v2774_v20  ;;  %2351 = vmatprep.subr.msk.bf16.mxu0 %vm4035_vm4, %v2349_v17  ;;  %v2771_v27 = vunpack.i.h.bf16 %v2769_v31  ;;  %v2770_v60 = vunpack.i.l.bf16 %v2769_v31  ;;  %2271 = vmatprep.subr.msk.bf16.mxu1 %vm4035_vm4, %v2269_v38 }
 0x1e0   : > { %v1593_v20 = vstv %s2053_s6  ;;  %v747_v31 = vstv %s746_s7 }
 0x1e1   : > { %v2352_v50 = vpack.c.bf16 %v2776_v46, %v2775_v51  ;;  %v2272_v25 = vpack.c.bf16 %v2771_v27, %v2770_v60 }
 0x1e2   : > { %v2784_v43 = vpop.permute.xlu1 %2783  ;;  %v2779_v2 = vpop.permute.xlu0 %2778 }
 0x1e3   : > { %v2786_v3 = vunpack.i.h.bf16 %v2784_v43  ;;  %v2785_v62 = vunpack.i.l.bf16 %v2784_v43  ;;  %2354 = vmatpush3.bf16.xpose.msk.msra.mxu0 %vm4035_vm4, %v2352_v50  ;;  %v2781_v52 = vunpack.i.h.bf16 %v2779_v2  ;;  %v2780_v55 = vunpack.i.l.bf16 %v2779_v2  ;;  %2274 = vmatpush3.bf16.xpose.msk.msra.mxu1 %vm4035_vm4, %v2272_v25 }
 0x1e4   : > { %v2832_v43 = vpack.i.bf16 %v3930_v22, %v3918_v19  ;;  %v2842_v2 = vpack.i.bf16 %v3925_v21, %v3913_v32  ;;  %v2872_v32 = vpack.i.bf16 %v3978_v1, %v3966_v4  ;;  %v2882_v19 = vpack.i.bf16 %v3973_v24, %v3961_v0 }
 0x1e5   : > { %v2355_v14 = vpack.c.bf16 %v2786_v3, %v2785_v62  ;;  %v2275_v41 = vpack.c.bf16 %v2781_v52, %v2780_v55  ;;  %v2852_v3 = vpack.i.bf16 %v3954_v37, %v3942_v53  ;;  %v2862_v62 = vpack.i.bf16 %v3949_v54, %v3937_v16 }
 0x1e6   : > { %v2794_v29 = vpop.permute.xlu1 %2793  ;;  %v2789_v35 = vpop.permute.xlu0 %2788 }
 0x1e7   : > { %v2796_v23 = vunpack.i.h.bf16 %v2794_v29  ;;  %v2795_v28 = vunpack.i.l.bf16 %v2794_v29  ;;  %2357 = vmatprep.subr.msk.bf16.mxu0 %vm4035_vm4, %v2355_v14  ;;  %v2791_v34 = vunpack.i.h.bf16 %v2789_v35  ;;  %v2790_v45 = vunpack.i.l.bf16 %v2789_v35  ;;  %2277 = vmatprep.subr.msk.bf16.mxu1 %vm4035_vm4, %v2275_v41 }
 0x1e9   : > { %v2358_v7 = vpack.c.bf16 %v2796_v23, %v2795_v28  ;;  %v2278_v5 = vpack.c.bf16 %v2791_v34, %v2790_v45 }
 0x1ea   : > { %v2804_v56 = vpop.permute.xlu1 %2803  ;;  %v2799_v61 = vpop.permute.xlu0 %2798 }
 0x1eb   : > { %v2806_v39 = vunpack.i.h.bf16 %v2804_v56  ;;  %v2805_v58 = vunpack.i.l.bf16 %v2804_v56  ;;  %2360 = vmatpush3.bf16.xpose.msk.msra.mxu0 %vm4035_vm4, %v2358_v7  ;;  %v2801_v48 = vunpack.i.h.bf16 %v2799_v61  ;;  %v2800_v63 = vunpack.i.l.bf16 %v2799_v61  ;;  %2280 = vmatpush3.bf16.xpose.msk.msra.mxu1 %vm4035_vm4, %v2278_v5 }
 0x1ed   : > { %v2361_v47 = vpack.c.bf16 %v2806_v39, %v2805_v58  ;;  %v2281_v59 = vpack.c.bf16 %v2801_v48, %v2800_v63 }
 0x1ee   : > { %v2814_v49 = vpop.permute.xlu1 %2813  ;;  %v2809_v9 = vpop.permute.xlu0 %2808 }
 0x1ef   : > { %v2816_v13 = vunpack.i.h.bf16 %v2814_v49  ;;  %v2815_v18 = vunpack.i.l.bf16 %v2814_v49  ;;  %2363 = vmatprep.subr.msk.bf16.mxu0 %vm4035_vm4, %v2361_v47  ;;  %v2811_v6 = vunpack.i.h.bf16 %v2809_v9  ;;  %v2810_v30 = vunpack.i.l.bf16 %v2809_v9  ;;  %2283 = vmatprep.subr.msk.bf16.mxu1 %vm4035_vm4, %v2281_v59 }
 0x1f1   : > { %v2364_v10 = vpack.c.bf16 %v2816_v13, %v2815_v18  ;;  %v2284_v11 = vpack.c.bf16 %v2811_v6, %v2810_v30 }
 0x1f2   : > { %v2824_v44 = vpop.permute.xlu1 %2823 }
 0x1f3   : > { %v2826_v33 = vunpack.i.h.bf16 %v2824_v44  ;;  %v2825_v12 = vunpack.i.l.bf16 %v2824_v44  ;;  %2366 = vmatpush3.bf16.xpose.msk.msra.mxu0 %vm4035_vm4, %v2364_v10  ;;  %2286 = vmatpush3.bf16.xpose.msk.msra.mxu1 %vm4035_vm4, %v2284_v11 }
 0x1f5   : > { %v2367_v40 = vpack.c.bf16 %v2826_v33, %v2825_v12 }
 0x1f7   : > { %2369 = vmatprep.subr.msk.bf16.mxu0 %vm4035_vm4, %v2367_v40 }
 0x25c   : > { %v2125_v26 = vpop.f32.mrb[0].mxu1  ;;  %v2194_v57 = vpop.f32.mrb[0].mxu0 }
 0x25d   : > { %v2126_v17 = vpop.f32.mrb[1].mxu1  ;;  %v2195_v38 = vpop.f32.mrb[1].mxu0 }
 0x25e   : > { %v2127_v46 = vadd.f32 %v2126_v17, %v2125_v26  ;;  %v2196_v51 = vadd.f32 %v2195_v38, %v2194_v57 }
 0x260   : > { %v1594_v27 = vmul.f32 %v2196_v51, %v1593_v20  ;;  %v748_v60 = vmul.f32 %v2127_v46, %v747_v31 }
 0x262   : > { %v1595_v50 = vsel %vm276_vm1, %v1594_v27, -inf  ;;  %v749_v25 = vsel %vm276_vm1, %v748_v60, -inf }
 0x263   : > { %1596 = vmax.xlane.f32.xlu1 %v1595_v50  ;;  %750 = vmax.xlane.f32.xlu0 %v749_v25 }
 0x274   : > { %2833 = vrot.lane.b32.xlu1 %v2832_v43, %s2978_s30 }
 0x278   : > { %2843 = vrot.lane.b32.xlu1 %v2842_v2, %s2978_s30 }
 0x279   : > { %2818 = vrot.lane.b32.xlu0 %v4028_v8, %s2979_s5 }
 0x27c   : > { %2853 = vrot.lane.b32.xlu1 %v2852_v3, %s2978_s30 }
 0x27d   : > { %2828 = vrot.lane.b32.xlu0 %v2832_v43, %s2979_s5 }
 0x280   : > { %2863 = vrot.lane.b32.xlu1 %v2862_v62, %s2978_s30 }
 0x281   : > { %2838 = vrot.lane.b32.xlu0 %v2842_v2, %s2979_s5 }
 0x284   : > { %2873 = vrot.lane.b32.xlu1 %v2872_v32, %s2978_s30 }
 0x285   : > { %2848 = vrot.lane.b32.xlu0 %v2852_v3, %s2979_s5 }
 0x288   : > { %2883 = vrot.lane.b32.xlu1 %v2882_v19, %s2978_s30 }
 0x289   : > { %2858 = vrot.lane.b32.xlu0 %v2862_v62, %s2979_s5 }
 0x28d   : > { %2868 = vrot.lane.b32.xlu0 %v2872_v32, %s2979_s5 }
 0x291   : > { %2878 = vrot.lane.b32.xlu0 %v2882_v19, %s2979_s5 }
 0x2f0   : > { %v1597_v21 = vpop.xlane.xlu1 %1596  ;;  %v751_v22 = vpop.xlane.xlu0 %750 }
 0x2f1   : > { %v1598_v16 = vsub.f32 %v1594_v27, %v1597_v21  ;;  %v752_v53 = vsub.f32 %v748_v60, %v751_v22  ;;  %v2892_v21 = vpack.i.bf16 %v3990_v15, %v3984_v42  ;;  %v1809_v42 = vld [vmem:[%s4169_s1 + $0x8] sm:$0xff] }
 0x2f3   : > { %v1599_v54 = vmul.f32 1.442695, %v1598_v16  ;;  %v753_v37 = vmul.f32 1.442695, %v752_v53  ;;  %v1808_v16 = vld [vmem:[%s4169_s1] sm:$0xff] }
 0x2f4   : > { %v2834_v4 = vpop.permute.xlu1 %2833  ;;  %v2819_v1 = vpop.permute.xlu0 %2818 }
 0x2f5   : > { %2907 = vpow2.f32 %v1599_v54  ;;  %v2836_v0 = vunpack.i.h.bf16 %v2834_v4  ;;  %v2835_v24 = vunpack.i.l.bf16 %v2834_v4  ;;  %v2821_v8 = vunpack.i.h.bf16 %v2819_v1 }
 0x2f6   : > { %2909 = vpow2.f32 %v753_v37  ;;  %v2820_v52 = vunpack.i.l.bf16 %v2819_v1 }
 0x2f7   : > { %v2370_v55 = vpack.c.bf16 %v2836_v0, %v2835_v24 }
 0x2f8   : > { %v2287_v14 = vpack.c.bf16 %v2821_v8, %v2820_v52  ;;  %v2844_v41 = vpop.permute.xlu1 %2843  ;;  %v2829_v29 = vpop.permute.xlu0 %2828 }
 0x2f9   : > { %v2846_v35 = vunpack.i.h.bf16 %v2844_v41  ;;  %v2845_v23 = vunpack.i.l.bf16 %v2844_v41  ;;  %2372 = vmatpush3.bf16.xpose.msk.msra.mxu0 %vm4035_vm4, %v2370_v55  ;;  %v2831_v28 = vunpack.i.h.bf16 %v2829_v29  ;;  %v2830_v34 = vunpack.i.l.bf16 %v2829_v29 }
 0x2fa   : > { %2289 = vmatprep.subr.msk.bf16.mxu1 %vm4035_vm4, %v2287_v14 }
 0x2fb   : > { %v2373_v45 = vpack.c.bf16 %v2846_v35, %v2845_v23  ;;  %v2290_v7 = vpack.c.bf16 %v2831_v28, %v2830_v34  ;;  %v2980_v35 = vmov 0.0   ;;  %v2981_v23 = vmov 0   ;;  %v1811_v28 = vld [vmem:[%s4170_s2 + $0x8] sm:$0xff] }
 0x2fc   : > { %v2854_v5 = vpop.permute.xlu1 %2853  ;;  %v2839_v56 = vpop.permute.xlu0 %2838  ;;  %2897 = vset.pattern.permute.xlu1 %v2981_v23 }
 0x2fd   : > { %v2856_v61 = vunpack.i.h.bf16 %v2854_v5  ;;  %v2855_v39 = vunpack.i.l.bf16 %v2854_v5  ;;  %2375 = vmatprep.subr.msk.bf16.mxu0 %vm4035_vm4, %v2373_v45  ;;  %v2841_v58 = vunpack.i.h.bf16 %v2839_v56  ;;  %v2840_v48 = vunpack.i.l.bf16 %v2839_v56  ;;  %2292 = vmatpush3.bf16.xpose.msk.msra.mxu1 %vm4035_vm4, %v2290_v7 }
 0x2ff   : > { %v4109_v63 = vpop.eup %2907  ;;  %v2376_v47 = vpack.c.bf16 %v2856_v61, %v2855_v39  ;;  %v2293_v59 = vpack.c.bf16 %v2841_v58, %v2840_v48 }
 0x300   : > { %v4111_v49 = vpop.eup %2909  ;;  %v1601_v9 = vsel %vm276_vm1, %v4109_v63, 0.0  ;;  %v2864_v13 = vpop.permute.xlu1 %2863 }
 0x301   : > { %v2849_v18 = vpop.permute.xlu0 %2848  ;;  %1602 = vadd.xlane.f32.xlu1 %v1601_v9  ;;  %v755_v6 = vsel %vm276_vm1, %v4111_v49, 0.0  ;;  %v2866_v30 = vunpack.i.h.bf16 %v2864_v13  ;;  %v2865_v10 = vunpack.i.l.bf16 %v2864_v13  ;;  %2378 = vmatpush3.bf16.xpose.msk.msra.mxu0 %vm4035_vm4, %v2376_v47 }
 0x302   : > { %v2851_v11 = vunpack.i.h.bf16 %v2849_v18  ;;  %756 = vadd.xlane.f32.xlu0 %v755_v6  ;;  %v2850_v44 = vunpack.i.l.bf16 %v2849_v18  ;;  %2295 = vmatprep.subr.msk.bf16.mxu1 %vm4035_vm4, %v2293_v59 }
 0x303   : > { %v2379_v33 = vpack.c.bf16 %v2866_v30, %v2865_v10 }
 0x304   : > { %v2296_v12 = vpack.c.bf16 %v2851_v11, %v2850_v44  ;;  %v2874_v40 = vpop.permute.xlu1 %2873 }
 0x305   : > { %v2859_v26 = vpop.permute.xlu0 %2858  ;;  %v2876_v57 = vunpack.i.h.bf16 %v2874_v40  ;;  %v2875_v17 = vunpack.i.l.bf16 %v2874_v40  ;;  %2381 = vmatprep.subr.msk.bf16.mxu0 %vm4035_vm4, %v2379_v33 }
 0x306   : > { %v2861_v38 = vunpack.i.h.bf16 %v2859_v26  ;;  %v2860_v20 = vunpack.i.l.bf16 %v2859_v26  ;;  %2298 = vmatpush3.bf16.xpose.msk.msra.mxu1 %vm4035_vm4, %v2296_v12 }
 0x307   : > { %v2382_v31 = vpack.c.bf16 %v2876_v57, %v2875_v17 }
 0x308   : > { %v2299_v46 = vpack.c.bf16 %v2861_v38, %v2860_v20  ;;  %v2884_v51 = vpop.permute.xlu1 %2883 }
 0x309   : > { %v2869_v27 = vpop.permute.xlu0 %2868  ;;  %v2886_v60 = vunpack.i.h.bf16 %v2884_v51  ;;  %v2885_v50 = vunpack.i.l.bf16 %v2884_v51  ;;  %2384 = vmatpush3.bf16.xpose.msk.msra.mxu0 %vm4035_vm4, %v2382_v31 }
 0x30a   : > { %v2871_v25 = vunpack.i.h.bf16 %v2869_v27  ;;  %v2870_v43 = vunpack.i.l.bf16 %v2869_v27  ;;  %2301 = vmatprep.subr.msk.bf16.mxu1 %vm4035_vm4, %v2299_v46 }
 0x30b   : > { %v2385_v2 = vpack.c.bf16 %v2886_v60, %v2885_v50 }
 0x30c   : > { %v2302_v3 = vpack.c.bf16 %v2871_v25, %v2870_v43 }
 0x30d   : > { %v2879_v62 = vpop.permute.xlu0 %2878  ;;  %2387 = vmatprep.subr.msk.bf16.mxu0 %vm4035_vm4, %v2385_v2 }
 0x30e   : > { %v2881_v32 = vunpack.i.h.bf16 %v2879_v62  ;;  %v2880_v19 = vunpack.i.l.bf16 %v2879_v62  ;;  %2304 = vmatpush3.bf16.xpose.msk.msra.mxu1 %vm4035_vm4, %v2302_v3 }
 0x310   : > { %v2305_v22 = vpack.c.bf16 %v2881_v32, %v2880_v19 }
 0x312   : > { %2307 = vmatprep.subr.msk.bf16.mxu1 %vm4035_vm4, %v2305_v22  ;;  %2893 = vrot.lane.b32.xlu1 %v2892_v21, %s2978_s30 }
 0x316   : > { %1814 = vperm.xlu1 %2897, %v1810_v36  }
 0x318   : > { %2888 = vrot.lane.b32.xlu0 %v2892_v21, %s2979_s5 }
 0x31a   : > { %1819 = vperm.xlu1 %2897, %v1811_v28  }
 0x336   : > { %1822 = vxpose.xlu0.b32.start [1/2] (short) (narrow) %v1808_v16, 16 }
 0x33a   : > { %1823 = vxpose.xlu0.b32.end [2/2] (short) (narrow) %v1809_v42, 16 }
 0x363   : > { %2898 = vset.pattern.permute.xlu0 %v2981_v23 }
 0x38e   : > { %v1603_v15 = vpop.xlane.xlu1 %1602 }
 0x38f   : > { %2911 = vrcp.f32 %v1603_v15  ;;  %v757_v53 = vpop.xlane.xlu0 %756 }
 0x390   : > { %2913 = vrcp.f32 %v757_v53 }
 0x392   : > { %v2894_v54 = vpop.permute.xlu1 %2893 }
 0x393   : > { %v2896_v37 = vunpack.i.h.bf16 %v2894_v54  ;;  %v2895_v4 = vunpack.i.l.bf16 %v2894_v54  ;;  %v2889_v1 = vpop.permute.xlu0 %2888 }
 0x394   : > { %v2891_v0 = vunpack.i.h.bf16 %v2889_v1  ;;  %v2890_v24 = vunpack.i.l.bf16 %v2889_v1 }
 0x395   : > { %v2388_v8 = vpack.c.bf16 %v2896_v37, %v2895_v4 }
 0x396   : > { %v2308_v52 = vpack.c.bf16 %v2891_v0, %v2890_v24  ;;  %v1815_v48 = vpop.permute.xlu1 %1814 }
 0x397   : > { %2390 = vmatpush3.bf16.xpose.msk.msra.mxu0 %vm4035_vm4, %v2388_v8 }
 0x398   : > { %2310 = vmatpush3.bf16.xpose.msk.msra.mxu1 %vm4035_vm4, %v2308_v52 }
 0x399   : > { %v2912_v55 = vpop.eup %2911 }
 0x39a   : > { %v2914_v14 = vpop.eup %2913  ;;  %v1605_v41 = vmul.f32 %v2912_v55, %v4109_v63  ;;  %v1820_v63 = vpop.permute.xlu1 %1819 }
 0x39b   : > { %v759_v29 = vmul.f32 %v2914_v14, %v4111_v49 }
 0x39c   : > { %2229 = vmatprep.mubr.msk.f32.mxu0 %vm276_vm1, %v1605_v41 }
 0x39d   : > { %2160 = vmatprep.mubr.msk.f32.mxu1 %vm276_vm1, %v759_v29 }
 0x39e   : > { %2230 = vmatmul.mubr.msk.f32.vlgmr.msra.gmra.mrb[2].mxu0 %vm276_vm1, %v1605_v41 }
 0x39f   : > { %2161 = vmatmul.mubr.msk.f32.vlgmr.msra.gmra.mrb[2].mxu1 %vm276_vm1, %v759_v29  ;;  %1925 = vmatprep.mubr.f32.mxu0 %v2980_v35 }
 0x3a0   : > { %1931 = vmatprep.mubr.f32.mxu1 %v2980_v35 }
 0x3b6   : > { %v1838_v45 = vpop.trf.xlu0 }
 0x3ba   : > { %v1839_v58 = vpop.trf.xlu0 }
 0x471   : > { %v1803_v34 = vpop.f32.mrb[2].mxu0 }
 0x472   : > { %v989_v7 = vpop.f32.mrb[2].mxu1  ;;  %v1805_v5 = vpop.f32.mrb[3].mxu0 }
 0x473   : > { %v2393_v56 = vpack.c.bf16 %v1803_v34, %v989_v7  ;;  %v991_v61 = vpop.f32.mrb[3].mxu1 }
 0x474   : > { %v2391_v39 = vpack.c.bf16 %v1805_v5, %v991_v61 }
 0x476   : > { %2392 = vmatprep.subr.bf16.mxu0 %v2391_v39  ;;  %2395 = vmatprep.subr.bf16.mxu1 %v2391_v39 }
 0x477   : > { %2394 = vmatpush1.bf16.msra.mxu0 %v2393_v56  ;;  %2396 = vmatpush1.bf16.msra.mxu1 %v2393_v56 }
 0x47a   : > { %2087 = vmatmul.mubr.msk.f32.vlgmr.msra.gmra.mrb[4].mxu0 %vm1854_vm5, %v1838_v45  ;;  %2088 = vmatmul.mubr.msk.f32.vlgmr.msra.gmra.mrb[4].mxu1 %vm1854_vm5, %v1839_v58 }
 0x54d   : > { %v1927_v47 = vpop.f32.mrb[4].mxu0  ;;  %v1933_v59 = vpop.f32.mrb[4].mxu1 }
 0x54e   : > { %v1928_v49 = vadd.f32 %v1927_v47, %v1815_v48  ;;  %v1934_v9 = vadd.f32 %v1933_v59, %v1820_v63  ;;  %v1929_v13 = vpop.f32.mrb[5].mxu0  ;;  %v1935_v18 = vpop.f32.mrb[5].mxu1 }
 0x54f   : > { %v1930_v6 = vadd.f32 %v1929_v13, %v1815_v48  ;;  %v1936_v30 = vadd.f32 %v1935_v18, %v1820_v63 }
 0x550   : > { %1938 = vst [vmem:[%s211_s21] sm:$0xff] %v1928_v49  ;;  %1940 = vst [vmem:[%s211_s21 + $0x10] sm:$0xff] %v1934_v9 }
 0x551   : > { %1939 = vst [vmem:[%s211_s21 + $0x8] sm:$0xff] %v1930_v6  ;;  %1941 = vst [vmem:[%s211_s21 + $0x18] sm:$0xff] %v1936_v30 }
 0x552 PF: > { %s15_s15 = sadd.s32 1, %s2972_s15  }
 0x553   : > { %p12_p1 = scmp.ge.s32.totalorder %s15_s15, 4  }
 0x555   :  { %14 = sbr.rel (!%p12_p1) target bundleno = 1 (0x1), region = 71 }
 0x55c   :  { %1963 = vsyncpa [#allocation3], 1 }
 0x55d   :  { %1965 = vsyncpa [#allocation3 + $0x1], 1 }

// kernel: dilated_mdta_forward.2
= control target key start
LH: loop header
LB: loop body
LE: loop exit
PB: predicated region body
PF: predicated region fallthrough
CT: control target
= control target key end

     0   :  { %s2198_s21 = smov 0   ;;  %s2200_s22 = smov 0   ;;  %s3402_s0 = inlined_call_operand.vmem [shape: f32[2,20,24,16], index: 0, kind: input, shape index: {}]   ;;  %s3403_s1 = inlined_call_operand.vmem [shape: f32[20,24,1], index: 1, kind: input, shape index: {}]   ;;  %s3404_s2 = inlined_call_operand.vmem [shape: f32[16,128], index: 2, kind: input, shape index: {}]   ;;  %s3405_s3 = inlined_call_operand.vmem [shape: f32[1,128], index: 3, kind: input, shape index: {}]   ;;  %s3406_s4 = inlined_call_operand.vmem [shape: f32[9,128], index: 4, kind: input, shape index: {}]   ;;  %s3407_s5 = inlined_call_operand.vmem [shape: f32[1,128], index: 5, kind: input, shape index: {}]   ;;  %s3408_s6 = inlined_call_operand.vmem [shape: f32[2,16,16,128], index: 6, kind: output, shape index: {}]  }
   0x1   :  { %s2202_s23 = smov 0   ;;  %s2204_s24 = smov 0  }
   0x2   :  { %s2206_s25 = smov 0  }
   0x3 LB: > { %s25_s26 = sadd.s32 1, %s2152_s23  ;;  %s28_s27 = sadd.s32 1, %s2156_s24  ;;  %s2160_s25 = sphi %s2206_s25, %s16_s25   ;;  %s2156_s24 = sphi %s2204_s24, %s3591_s24   ;;  %s2152_s23 = sphi %s2202_s23, %s3590_s23   ;;  %s2148_s22 = sphi %s2200_s22, %s3589_s22   ;;  %s2144_s21 = sphi %s2198_s21, %s3588_s21  }
   0x4   : > { %p26_p0 = scmp.ge.s32.totalorder %s25_s26, 2  ;;  %p1925_p1 = scmp.ge.s32.totalorder %s2160_s25, 1 }
   0x5   : > { %p226_p2 = scmp.lt.s32.totalorder %s2160_s25, 5 }
   0x6   : > { %s3593_s26 = smov (%p26_p0, %s25_s26), 0  ;;  %s3595_s27 = smov (!%p26_p0, %s28_s27), %s2156_s24 }
   0x7   : > { %p227_p3 = pnand %p1925_p1, %p226_p2  ;;  %p30_p4 = scmp.ge.s32.totalorder %s3595_s27, 2 }
   0x9   : > { %s3597_s27 = smov (%p30_p4, %s3595_s27), 0  ;;  %230 = sbr.rel (%p227_p3) target bundleno = 412 (0x19c), region = 44 }
  0x10   : > { %s1932_s28 = smul.u32 192, %s2144_s21  ;;  %v316_v0 = vld [vmem:[%s3404_s2] sm:$0xff]  ;;  %v317_v1 = vld [vmem:[%s3404_s2 + $0x8] sm:$0xff]  ;;  %p261_p5 = scmp.lt.s32.totalorder %s2148_s22, 1  ;;  %v2162_v2 = vmov 0   ;;  %vm325_vm0 = vcmask 130048  }
  0x11   : > { %2119 = vset.pattern.permute.xlu1 %v2162_v2  ;;  %2118 = vset.pattern.permute.xlu0 %v2162_v2  ;;  %v2070_v3 = vpack.c.bf16 %v317_v1, %v316_v0  ;;  %vm1022_vm1 = vcmask 1045504   ;;  %vm1147_vm2 = vcmask 1043456   ;;  %s1927_s30 = sshll.u32 %s2144_s21, 3 }
  0x12   : > { %s2240_s11 = scalar_lea.vmem %s3403_s1, %s1932_s28  ;;  %s3599_s22 = smov (!%p261_p5, %s2148_s22), 1 }
  0x13   : > { %v682_v4 = vld [vmem:[%s2240_s11 + $0x10] sm:$0xff]  ;;  %v680_v5 = vld [vmem:[%s2240_s11] sm:$0xff]  ;;  %2071 = vmatprep.subr.bf16.mxu0 %v2070_v3  ;;  %2074 = vmatprep.subr.bf16.mxu1 %v2070_v3  ;;  %v683_v6 = vld [vmem:[%s2240_s11 + $0x18] sm:$0xff]  ;;  %s2076_s12 = smul.u32 480, %s3599_s22  ;;  %p2987_p6 = scmp.lt.s32.totalorder %s1927_s30, 15 }
  0x14   : > { %728 = vperm.xlu1 %2119, %v682_v4   ;;  %718 = vperm.xlu0 %2118, %v680_v5   ;;  %v681_v7 = vld [vmem:[%s2240_s11 + $0x8] sm:$0xff]  ;;  %v684_v9 = vld [vmem:[%s2240_s11 + $0x20] sm:$0xff]  ;;  %v687_v18 = vld [vmem:[%s2240_s11 + $0x38] sm:$0xff]  ;;  %s1929_s8 = sshll.u32 %s3599_s22, 5 }
  0x15   : > { %2073 = vmatpush3.bf16.msra.mxu0 %v2070_v3  ;;  %2075 = vmatpush3.bf16.msra.mxu1 %v2070_v3  ;;  %s265_s15 = scalar_lea.vmem %s3402_s0, %s2076_s12  ;;  %v685_v8 = vld [vmem:[%s2240_s11 + $0x28] sm:$0xff]  ;;  %v686_v19 = vld [vmem:[%s2240_s11 + $0x30] sm:$0xff]  ;;  %v688_v25 = vld [vmem:[%s2240_s11 + $0x40] sm:$0xff]  ;;  %s3601_s30 = smov (!%p2987_p6, %s1927_s30), 15 }
  0x16   : > { %s2252_s16 = scalar_lea.vmem %s265_s15, %s1932_s28  ;;  %v689_v24 = vld [vmem:[%s2240_s11 + $0x48] sm:$0xff]  ;;  %v691_v30 = vld [vmem:[%s2240_s11 + $0x58] sm:$0xff]  ;;  %v690_v31 = vld [vmem:[%s2240_s11 + $0x50] sm:$0xff]  ;;  %s1928_s21 = sshll.u32 %s3601_s30, 1 }
  0x17   : > { %v280_v10 = vld [vmem:[%s2252_s16] sm:$0xff]  ;;  %v298_v11 = vld [vmem:[%s2252_s16 + $0x90] sm:$0xff]  ;;  %v281_v12 = vld [vmem:[%s2252_s16 + $0x8] sm:$0xff]  ;;  %s273_s22 = sadd.s32 %s1929_s8, %s1928_s21 }
  0x18   : > { %733 = vperm.xlu1 %2119, %v683_v6   ;;  %723 = vperm.xlu0 %2118, %v681_v7   ;;  %v299_v13 = vld [vmem:[%s2252_s16 + $0x98] sm:$0xff]  ;;  %v282_v14 = vld [vmem:[%s2252_s16 + $0x10] sm:$0xff]  ;;  %v300_v15 = vld [vmem:[%s2252_s16 + $0xa0] sm:$0xff]  ;;  %s1930_s9 = sshll.u32 %s273_s22, 3 }
  0x19   : > { %2016 = vmatprep.mubr.msk.f32.mxu0 %vm325_vm0, %v280_v10  ;;  %2043 = vmatprep.mubr.msk.f32.mxu1 %vm325_vm0, %v298_v11  ;;  %v283_v16 = vld [vmem:[%s2252_s16 + $0x18] sm:$0xff]  ;;  %v301_v17 = vld [vmem:[%s2252_s16 + $0xa8] sm:$0xff]  ;;  %v284_v20 = vld [vmem:[%s2252_s16 + $0x20] sm:$0xff]  ;;  %s3106_s14 = scalar_lea.vmem %s3408_s6, %s1930_s9 }
  0x1a   : > { %2017 = vmatmul.mubr.msk.f32.vlgmr.msra.gmra.mrb[0].mxu0 %vm325_vm0, %v281_v12  ;;  %2044 = vmatmul.mubr.msk.f32.vlgmr.msra.gmra.mrb[0].mxu1 %vm325_vm0, %v299_v13  ;;  %v302_v21 = vld [vmem:[%s2252_s16 + $0xb0] sm:$0xff]  ;;  %v285_v22 = vld [vmem:[%s2252_s16 + $0x28] sm:$0xff]  ;;  %v303_v23 = vld [vmem:[%s2252_s16 + $0xb8] sm:$0xff] }
  0x1b   : > { %2019 = vmatprep.mubr.msk.f32.mxu0 %vm325_vm0, %v282_v14  ;;  %2046 = vmatprep.mubr.msk.f32.mxu1 %vm325_vm0, %v300_v15  ;;  %v286_v26 = vld [vmem:[%s2252_s16 + $0x30] sm:$0xff]  ;;  %v304_v27 = vld [vmem:[%s2252_s16 + $0xc0] sm:$0xff]  ;;  %v287_v28 = vld [vmem:[%s2252_s16 + $0x38] sm:$0xff] }
  0x1c   : > { %743 = vperm.xlu1 %2119, %v685_v8   ;;  %738 = vperm.xlu0 %2118, %v684_v9   ;;  %v305_v29 = vld [vmem:[%s2252_s16 + $0xc8] sm:$0xff]  ;;  %v288_v32 = vld [vmem:[%s2252_s16 + $0x40] sm:$0xff]  ;;  %v306_v33 = vld [vmem:[%s2252_s16 + $0xd0] sm:$0xff] }
  0x1d   : > { %v289_v34 = vld [vmem:[%s2252_s16 + $0x48] sm:$0xff]  ;;  %v307_v35 = vld [vmem:[%s2252_s16 + $0xd8] sm:$0xff]  ;;  %v692_v37 = vld [vmem:[%s2240_s11 + $0x60] sm:$0xff] }
  0x1e   : > { %2020 = vmatmul.mubr.msk.f32.gmra.mrb[2].mxu0 %vm325_vm0, %v283_v16  ;;  %2047 = vmatmul.mubr.msk.f32.gmra.mrb[2].mxu1 %vm325_vm0, %v301_v17  ;;  %v693_v36 = vld [vmem:[%s2240_s11 + $0x68] sm:$0xff]  ;;  %v290_v38 = vld [vmem:[%s2252_s16 + $0x50] sm:$0xff]  ;;  %v308_v39 = vld [vmem:[%s2252_s16 + $0xe0] sm:$0xff] }
  0x1f   : > { %2022 = vmatprep.mubr.msk.f32.mxu0 %vm325_vm0, %v284_v20  ;;  %2049 = vmatprep.mubr.msk.f32.mxu1 %vm325_vm0, %v302_v21  ;;  %v291_v40 = vld [vmem:[%s2252_s16 + $0x58] sm:$0xff]  ;;  %v309_v41 = vld [vmem:[%s2252_s16 + $0xe8] sm:$0xff]  ;;  %v694_v43 = vld [vmem:[%s2240_s11 + $0x70] sm:$0xff] }
  0x20   : > { %753 = vperm.xlu1 %2119, %v687_v18   ;;  %748 = vperm.xlu0 %2118, %v686_v19   ;;  %v695_v42 = vld [vmem:[%s2240_s11 + $0x78] sm:$0xff]  ;;  %v292_v44 = vld [vmem:[%s2252_s16 + $0x60] sm:$0xff]  ;;  %v310_v45 = vld [vmem:[%s2252_s16 + $0xf0] sm:$0xff] }
  0x21   : > { %v293_v46 = vld [vmem:[%s2252_s16 + $0x68] sm:$0xff]  ;;  %v311_v47 = vld [vmem:[%s2252_s16 + $0xf8] sm:$0xff]  ;;  %v696_v49 = vld [vmem:[%s2240_s11 + $0x80] sm:$0xff] }
  0x22   : > { %2023 = vmatmul.mubr.msk.f32.gmra.mrb[4].mxu0 %vm325_vm0, %v285_v22  ;;  %2050 = vmatmul.mubr.msk.f32.gmra.mrb[4].mxu1 %vm325_vm0, %v303_v23  ;;  %v697_v48 = vld [vmem:[%s2240_s11 + $0x88] sm:$0xff]  ;;  %v294_v50 = vld [vmem:[%s2252_s16 + $0x70] sm:$0xff]  ;;  %v312_v51 = vld [vmem:[%s2252_s16 + $0x100] sm:$0xff] }
  0x23   : > { %2025 = vmatprep.mubr.msk.f32.mxu0 %vm325_vm0, %v286_v26  ;;  %2052 = vmatprep.mubr.msk.f32.mxu1 %vm325_vm0, %v304_v27  ;;  %v295_v52 = vld [vmem:[%s2252_s16 + $0x78] sm:$0xff]  ;;  %v313_v53 = vld [vmem:[%s2252_s16 + $0x108] sm:$0xff]  ;;  %v698_v55 = vld [vmem:[%s2240_s11 + $0x90] sm:$0xff]  ;;  %v934_v27 = vlaneseq }
  0x24   : > { %763 = vperm.xlu1 %2119, %v689_v24   ;;  %758 = vperm.xlu0 %2118, %v688_v25   ;;  %v699_v54 = vld [vmem:[%s2240_s11 + $0x98] sm:$0xff]  ;;  %v296_v56 = vld [vmem:[%s2252_s16 + $0x80] sm:$0xff]  ;;  %v314_v57 = vld [vmem:[%s2252_s16 + $0x110] sm:$0xff] }
  0x25   : > { %v297_v58 = vld [vmem:[%s2252_s16 + $0x88] sm:$0xff]  ;;  %v315_v59 = vld [vmem:[%s2252_s16 + $0x118] sm:$0xff]  ;;  %v700_v61 = vld [vmem:[%s2240_s11 + $0xa0] sm:$0xff] }
  0x26   : > { %2026 = vmatmul.mubr.msk.f32.gmra.mrb[6].mxu0 %vm325_vm0, %v287_v28  ;;  %2053 = vmatmul.mubr.msk.f32.gmra.mrb[6].mxu1 %vm325_vm0, %v305_v29  ;;  %v701_v60 = vld [vmem:[%s2240_s11 + $0xa8] sm:$0xff]  ;;  %v703_v62 = vld [vmem:[%s2240_s11 + $0xb8] sm:$0xff]  ;;  %v702_v63 = vld [vmem:[%s2240_s11 + $0xb0] sm:$0xff] }
  0x27   : > { %2028 = vmatprep.mubr.msk.f32.mxu0 %vm325_vm0, %v288_v32  ;;  %2055 = vmatprep.mubr.msk.f32.mxu1 %vm325_vm0, %v306_v33  ;;  %v705_v0 = vld [vmem:[%s2240_s11 + $0xc8] sm:$0xff]  ;;  %v704_v1 = vld [vmem:[%s2240_s11 + $0xc0] sm:$0xff]  ;;  %v707_v2 = vld [vmem:[%s2240_s11 + $0xd8] sm:$0xff] }
  0x28   : > { %773 = vperm.xlu1 %2119, %v691_v30   ;;  %768 = vperm.xlu0 %2118, %v690_v31   ;;  %v706_v3 = vld [vmem:[%s2240_s11 + $0xd0] sm:$0xff]  ;;  %v709_v4 = vld [vmem:[%s2240_s11 + $0xe8] sm:$0xff]  ;;  %v708_v5 = vld [vmem:[%s2240_s11 + $0xe0] sm:$0xff]  ;;  %v935_v30 = vshrl.u32 %v934_v27, 7 }
  0x29   : > { %v711_v6 = vld [vmem:[%s2240_s11 + $0xf8] sm:$0xff]  ;;  %v710_v7 = vld [vmem:[%s2240_s11 + $0xf0] sm:$0xff]  ;;  %v713_v8 = vld [vmem:[%s2240_s11 + $0x108] sm:$0xff] }
  0x2a   : > { %2029 = vmatmul.mubr.msk.f32.gmra.mrb[8].mxu0 %vm325_vm0, %v289_v34  ;;  %2056 = vmatmul.mubr.msk.f32.gmra.mrb[8].mxu1 %vm325_vm0, %v307_v35  ;;  %v712_v9 = vld [vmem:[%s2240_s11 + $0x100] sm:$0xff]  ;;  %v715_v10 = vld [vmem:[%s2240_s11 + $0x118] sm:$0xff]  ;;  %v714_v11 = vld [vmem:[%s2240_s11 + $0x110] sm:$0xff]  ;;  %v972_v32 = vsub.s32 1, %v935_v30  ;;  %v1097_v33 = vsub.s32 2, %v935_v30 }
  0x2b   : > { %2031 = vmatprep.mubr.msk.f32.mxu0 %vm325_vm0, %v290_v38  ;;  %2058 = vmatprep.mubr.msk.f32.mxu1 %vm325_vm0, %v308_v39  ;;  %v2393_v34 = vld [vmem:[%s3405_s3] ss:$0 sm:$0xff]  ;;  %v1258_v39 = vsub.s32 4, %v935_v30 }
  0x2c   : > { %783 = vperm.xlu1 %2119, %v693_v36   ;;  %778 = vperm.xlu0 %2118, %v692_v37   ;;  %v932_v35 = vld [vmem:[%s3406_s4] sm:$0xff]  ;;  %v936_v36 = vsub.s32 0, %v935_v30  ;;  %v1222_v37 = vsub.s32 3, %v935_v30 }
  0x2e   : > { %2032 = vmatmul.mubr.msk.f32.gmra.mrb[10].mxu0 %vm325_vm0, %v291_v40  ;;  %2059 = vmatmul.mubr.msk.f32.gmra.mrb[10].mxu1 %vm325_vm0, %v309_v41  ;;  %v1382_v40 = vsub.s32 5, %v935_v30  ;;  %v1506_v41 = vsub.s32 6, %v935_v30 }
  0x2f   : > { %2034 = vmatprep.mubr.msk.f32.mxu0 %vm325_vm0, %v292_v44  ;;  %2061 = vmatprep.mubr.msk.f32.mxu1 %vm325_vm0, %v310_v45  ;;  %v1542_v44 = vsub.s32 7, %v935_v30 }
  0x30   : > { %793 = vperm.xlu1 %2119, %v695_v42   ;;  %788 = vperm.xlu0 %2118, %v694_v43  }
  0x32   : > { %2035 = vmatmul.mubr.msk.f32.gmra.mrb[12].mxu0 %vm325_vm0, %v293_v46  ;;  %2062 = vmatmul.mubr.msk.f32.gmra.mrb[12].mxu1 %vm325_vm0, %v311_v47  ;;  %v2399_v46 = vrot.slane %v932_v35, %v972_v32  ;;  %v2401_v47 = vrot.slane %v932_v35, %v1097_v33 }
  0x33   : > { %2037 = vmatprep.mubr.msk.f32.mxu0 %vm325_vm0, %v294_v50  ;;  %2064 = vmatprep.mubr.msk.f32.mxu1 %vm325_vm0, %v312_v51  ;;  %v2404_v51 = vrot.slane %v932_v35, %v936_v36 }
  0x34   : > { %803 = vperm.xlu1 %2119, %v697_v48   ;;  %798 = vperm.xlu0 %2118, %v696_v49  }
  0x36   : > { %2038 = vmatmul.mubr.msk.f32.gmra.mrb[14].mxu0 %vm325_vm0, %v295_v52  ;;  %2065 = vmatmul.mubr.msk.f32.gmra.mrb[14].mxu1 %vm325_vm0, %v313_v53 }
  0x37   : > { %2040 = vmatprep.mubr.msk.f32.mxu0 %vm325_vm0, %v296_v56  ;;  %2067 = vmatprep.mubr.msk.f32.mxu1 %vm325_vm0, %v314_v57  ;;  %v2410_v57 = vrot.slane %v932_v35, %v1258_v39 }
  0x38   : > { %813 = vperm.xlu1 %2119, %v699_v54   ;;  %808 = vperm.xlu0 %2118, %v698_v55   ;;  %v2408_v54 = vrot.slane %v932_v35, %v1222_v37 }
  0x3a   : > { %2041 = vmatmul.mubr.msk.f32.gmra.mrb[16].mxu0 %vm325_vm0, %v297_v58  ;;  %2068 = vmatmul.mubr.msk.f32.gmra.mrb[16].mxu1 %vm325_vm0, %v315_v59  ;;  %v2412_v58 = vrot.slane %v932_v35, %v1382_v40  ;;  %v2414_v59 = vrot.slane %v932_v35, %v1506_v41 }
  0x3c   : > { %823 = vperm.xlu1 %2119, %v701_v60   ;;  %818 = vperm.xlu0 %2118, %v700_v61  }
  0x40   : > { %833 = vperm.xlu1 %2119, %v703_v62   ;;  %828 = vperm.xlu0 %2118, %v702_v63   ;;  %v2416_v63 = vrot.slane %v932_v35, %v1542_v44 }
  0x44   : > { %843 = vperm.xlu1 %2119, %v705_v0   ;;  %838 = vperm.xlu0 %2118, %v704_v1  }
  0x48   : > { %853 = vperm.xlu1 %2119, %v707_v2   ;;  %848 = vperm.xlu0 %2118, %v706_v3  }
  0x4c   : > { %863 = vperm.xlu1 %2119, %v709_v4   ;;  %858 = vperm.xlu0 %2118, %v708_v5  }
  0x50   : > { %873 = vperm.xlu1 %2119, %v711_v6   ;;  %868 = vperm.xlu0 %2118, %v710_v7  }
  0x54   : > { %883 = vperm.xlu1 %2119, %v713_v8   ;;  %878 = vperm.xlu0 %2118, %v712_v9  }
  0x58   : > { %893 = vperm.xlu1 %2119, %v715_v10   ;;  %888 = vperm.xlu0 %2118, %v714_v11  }
  0x93   : > { %v2358_v12 = vpop.permute.xlu1 %728  ;;  %v719_v13 = vpop.permute.xlu0 %718 }
  0x97   : > { %v2360_v14 = vpop.permute.xlu1 %733  ;;  %v724_v15 = vpop.permute.xlu0 %723 }
  0x9b   : > { %v2362_v16 = vpop.permute.xlu1 %743  ;;  %v2364_v17 = vpop.permute.xlu0 %738 }
  0x9f   : > { %v2366_v18 = vpop.permute.xlu1 %753  ;;  %v2368_v19 = vpop.permute.xlu0 %748 }
  0xa3   : > { %v2370_v20 = vpop.permute.xlu1 %763  ;;  %v2372_v21 = vpop.permute.xlu0 %758 }
  0xa7   : > { %v2374_v22 = vpop.permute.xlu1 %773  ;;  %v2376_v23 = vpop.permute.xlu0 %768 }
  0xab   : > { %v2378_v24 = vpop.permute.xlu1 %783  ;;  %v2380_v25 = vpop.permute.xlu0 %778 }
  0xac   : > { %3429 = vst [vmem:[#allocation2_spill] sm:$0xff] %v2378_v24  ;;  %3430 = vst [vmem:[#allocation3_spill] sm:$0xff] %v2380_v25 }
  0xaf   : > { %v2382_v26 = vpop.permute.xlu1 %793  ;;  %v2384_v28 = vpop.permute.xlu0 %788 }
  0xb0   : > { %3431 = vst [vmem:[#allocation4_spill] sm:$0xff] %v2382_v26  ;;  %3432 = vst [vmem:[#allocation5_spill] sm:$0xff] %v2384_v28 }
  0xb3   : > { %v2386_v29 = vpop.permute.xlu1 %803  ;;  %v2388_v31 = vpop.permute.xlu0 %798 }
  0xb4   : > { %3433 = vst [vmem:[#allocation6_spill] sm:$0xff] %v2386_v29  ;;  %3434 = vst [vmem:[#allocation7_spill] sm:$0xff] %v2388_v31 }
  0xb7   : > { %v814_v38 = vpop.permute.xlu1 %813  ;;  %v809_v55 = vpop.permute.xlu0 %808 }
  0xbb   : > { %v824_v10 = vpop.permute.xlu1 %823 }
  0xbf   : > { %v834_v26 = vpop.permute.xlu1 %833 }
  0xed   : > { %v2018_v42 = vpop.f32.mrb[0].mxu0  ;;  %v2045_v43 = vpop.f32.mrb[0].mxu1 }
  0xee   : > { %v506_v45 = vadd.f32 %v2018_v42, %v2393_v34  ;;  %v596_v48 = vadd.f32 %v2045_v43, %v2393_v34  ;;  %v500_v49 = vpop.f32.mrb[1].mxu0  ;;  %v590_v50 = vpop.f32.mrb[1].mxu1 }
  0xef   : > { %v501_v52 = vadd.f32 %v2393_v34, %v500_v49  ;;  %v591_v53 = vadd.f32 %v2393_v34, %v590_v50  ;;  %v819_v49 = vpop.permute.xlu0 %818 }
  0xf0   : > { %v897_v56 = vmul.f32 %v724_v15, %v506_v45  ;;  %v2424_v2 = vmul.f32 %v814_v38, %v596_v48 }
  0xf1   : > { %v896_v60 = vmul.f32 %v719_v13, %v501_v52  ;;  %v2021_v61 = vpop.f32.mrb[2].mxu0  ;;  %v2048_v62 = vpop.f32.mrb[2].mxu1  ;;  %v2429_v8 = vmul.f32 %v809_v55, %v591_v53 }
  0xf2   : > { %v2419_v0 = vmul.f32 %v2399_v46, %v897_v56  ;;  %v2422_v1 = vmul.f32 %v2401_v47, %v897_v56  ;;  %3435 = vst [vmem:[#allocation8_spill] sm:$0xff] %v2424_v2  ;;  %v516_v3 = vadd.f32 %v2021_v61, %v2393_v34  ;;  %v510_v4 = vpop.f32.mrb[3].mxu0  ;;  %v600_v5 = vpop.f32.mrb[3].mxu1  ;;  %v606_v9 = vadd.f32 %v2048_v62, %v2393_v34 }
  0xf3   : > { %v974_v6 = vmul.f32 %v2399_v46, %v896_v60  ;;  %v1099_v7 = vmul.f32 %v2401_v47, %v896_v60  ;;  %3436 = vst [vmem:[#allocation9_spill] sm:$0xff] %v2429_v8  ;;  %v511_v27 = vadd.f32 %v2393_v34, %v510_v4  ;;  %v939_v30 = vmul.f32 %v2404_v51, %v897_v56 }
  0xf4   : > { %v1024_v11 = vrot.slane %v2419_v0, 2  ;;  %v1149_v13 = vrot.slane %v2422_v1, 4  ;;  %v899_v15 = vmul.f32 %v2360_v14, %v516_v3  ;;  %v2437_v35 = vmul.f32 %v824_v10, %v606_v9 }
  0xf5   : > { %v1023_v32 = vrot.slane %v974_v6, 2  ;;  %v1148_v33 = vrot.slane %v1099_v7, 4  ;;  %v2439_v36 = vpop.f32.mrb[4].mxu0  ;;  %v2441_v37 = vpop.f32.mrb[4].mxu1  ;;  %v938_v38 = vmul.f32 %v2404_v51, %v896_v60  ;;  %v898_v14 = vmul.f32 %v2358_v12, %v511_v27  ;;  %v2468_v12 = vld [vmem:[%s3406_s4 + $0x8] ss:$0 sm:$0xff] }
  0xf6   : > { %3437 = vst [vmem:[#allocation10_spill] sm:$0xff] %v2437_v35  ;;  %v2445_v39 = vmul.f32 %v2399_v46, %v899_v15  ;;  %v2448_v40 = vmul.f32 %v2401_v47, %v899_v15  ;;  %v2451_v41 = vpop.f32.mrb[5].mxu0  ;;  %v2453_v42 = vpop.f32.mrb[5].mxu1  ;;  %v2459_v45 = vmul.f32 %v2410_v57, %v2437_v35  ;;  %v601_v48 = vadd.f32 %v2393_v34, %v600_v5 }
  0xf7   : > { %v1025_v43 = vsel %vm1022_vm1, %v1023_v32, %v1024_v11  ;;  %v1150_v44 = vsel %vm1147_vm2, %v1148_v33, %v1149_v13  ;;  %v2463_v52 = vmul.f32 %v2404_v51, %v899_v15  ;;  %v2472_v53 = vmul.f32 %v2408_v54, %v2437_v35 }
  0xf8   : > { %v1079_v50 = vadd.f32 %v1025_v43, %v938_v38  ;;  %v2476_v55 = vmul.f32 %v2412_v58, %v2437_v35  ;;  %v2482_v61 = vmul.f32 %v2416_v63, %v2437_v35  ;;  %v2486_v62 = vmul.f32 %v2468_v12, %v2437_v35 }
  0xf9   : > { %3438 = vst [vmem:[#allocation11_spill] sm:$0xff] %v2472_v53  ;;  %v2488_v0 = vpop.f32.mrb[6].mxu0  ;;  %v2490_v1 = vpop.f32.mrb[6].mxu1  ;;  %v976_v5 = vmul.f32 %v2399_v46, %v898_v14  ;;  %v1101_v6 = vmul.f32 %v2401_v47, %v898_v14  ;;  %v2504_v15 = vmul.f32 %v2414_v59, %v2437_v35  ;;  %v916_v27 = vmul.f32 %v819_v49, %v601_v48 }
  0xfa   : > { %v2492_v3 = vadd.f32 %v1150_v44, %v1079_v50  ;;  %v2497_v7 = vpop.f32.mrb[7].mxu0  ;;  %v2499_v9 = vpop.f32.mrb[7].mxu1  ;;  %v1272_v32 = vmul.f32 %v2410_v57, %v2429_v8  ;;  %v1273_v43 = vmul.f32 %v2410_v57, %v2424_v2  ;;  %v1396_v14 = vmul.f32 %v2412_v58, %v2429_v8 }
  0xfb   : > { %3439 = vst [vmem:[#allocation12_spill] sm:$0xff] %v2504_v15  ;;  %v1026_v33 = vrot.slane %v976_v5, 2  ;;  %v1151_v38 = vrot.slane %v1101_v6, 4  ;;  %v1274_v10 = vmul.f32 %v2410_v57, %v916_v27  ;;  %v1397_v56 = vmul.f32 %v2412_v58, %v2424_v2 }
  0xfc   : > { %v1328_v4 = vrot.slane %v1272_v32, 2  ;;  %v1329_v6 = vrot.slane %v1273_v43, 2  ;;  %v2528_v53 = vmul.f32 %v2399_v46, %v916_v27  ;;  %v2531_v32 = vmul.f32 %v2401_v47, %v916_v27 }
  0xfd   : > { %v2515_v60 = vpop.f32.mrb[8].mxu0  ;;  %v2517_v48 = vpop.f32.mrb[8].mxu1  ;;  %v1027_v49 = vsel %vm1022_vm1, %v1024_v11, %v1026_v33  ;;  %v1152_v5 = vsel %vm1147_vm2, %v1149_v13, %v1151_v38  ;;  %v1331_v31 = vrot.slane %v1274_v10, 2  ;;  %v1398_v13 = vmul.f32 %v2412_v58, %v916_v27 }
  0xfe   : > { %v2523_v15 = vpop.f32.mrb[9].mxu0  ;;  %v2525_v44 = vpop.f32.mrb[9].mxu1  ;;  %v1080_v50 = vadd.f32 %v1027_v49, %v939_v30  ;;  %3440 = vst [vmem:[#allocation13_spill] sm:$0xff] %v2528_v53  ;;  %3441 = vst [vmem:[#allocation14_spill] sm:$0xff] %v2531_v32  ;;  %v2534_v11 = vsel %vm1022_vm1, %v1328_v4, %v1329_v6  ;;  %v1452_v33 = vrot.slane %v1396_v14, 4  ;;  %v1453_v38 = vrot.slane %v1397_v56, 4 }
  0xff   : > { %3442 = vst [vmem:[#allocation15_spill] sm:$0xff] %v2534_v11  ;;  %v2540_v29 = vsel %vm1022_vm1, %v1329_v6, %v1331_v31  ;;  %v1550_v30 = vmul.f32 %v2416_v63, %v2429_v8  ;;  %v1551_v49 = vmul.f32 %v2416_v63, %v2424_v2  ;;  %v1455_v14 = vrot.slane %v1398_v13, 4 }
 0x100   : > { %v2537_v43 = vadd.f32 %v1152_v5, %v1080_v50  ;;  %3443 = vst [vmem:[#allocation16_spill] sm:$0xff] %v2540_v29  ;;  %v2551_v4 = vsel %vm1147_vm2, %v1452_v33, %v1453_v38  ;;  %v1552_v56 = vmul.f32 %v2416_v63, %v916_v27  ;;  %v1674_v31 = vmul.f32 %v2468_v12, %v2429_v8 }
 0x101   : > { %v2546_v28 = vpop.f32.mrb[10].mxu0  ;;  %v2548_v10 = vpop.f32.mrb[10].mxu1  ;;  %3444 = vst [vmem:[#allocation17_spill] sm:$0xff] %v2551_v4  ;;  %v1602_v6 = vrot.slane %v1550_v30, 2  ;;  %v1603_v29 = vrot.slane %v1551_v49, 2  ;;  %v1675_v11 = vmul.f32 %v2468_v12, %v2424_v2  ;;  %v1676_v35 = vmul.f32 %v2468_v12, %v916_v27 }
 0x102   : > { %v2556_v50 = vpop.f32.mrb[11].mxu0  ;;  %v2558_v5 = vpop.f32.mrb[11].mxu1  ;;  %v2564_v33 = vsel %vm1147_vm2, %v1453_v38, %v1455_v14  ;;  %v1605_v13 = vrot.slane %v1552_v56, 2  ;;  %v1726_v4 = vrot.slane %v1674_v31, 4  ;;  %v526_v25 = vadd.f32 %v2439_v36, %v2393_v34 }
 0x103   : > { %3445 = vst [vmem:[#allocation18_spill] sm:$0xff] %v2564_v33  ;;  %v2569_v8 = vsel %vm1022_vm1, %v1602_v6, %v1603_v29  ;;  %v1727_v24 = vrot.slane %v1675_v11, 4  ;;  %v1729_v30 = vrot.slane %v1676_v35, 4  ;;  %v616_v49 = vadd.f32 %v2441_v37, %v2393_v34  ;;  %v829_v37 = vpop.permute.xlu0 %828 }
 0x104   : > { %3446 = vst [vmem:[#allocation19_spill] sm:$0xff] %v2569_v8  ;;  %v2578_v38 = vsel %vm1022_vm1, %v1603_v29, %v1605_v13  ;;  %v901_v14 = vmul.f32 %v2362_v16, %v526_v25  ;;  %v521_v36 = vadd.f32 %v2393_v34, %v2451_v41  ;;  %v611_v56 = vadd.f32 %v2393_v34, %v2453_v42 }
 0x105   : > { %v2573_v2 = vpop.f32.mrb[12].mxu0  ;;  %v2575_v27 = vpop.f32.mrb[12].mxu1  ;;  %3449 = vst [vmem:[#allocation22_spill] sm:$0xff] %v2578_v38  ;;  %v2591_v6 = vsel %vm1147_vm2, %v1726_v4, %v1727_v24  ;;  %v2594_v29 = vsel %vm1147_vm2, %v1727_v24, %v1729_v30  ;;  %v919_v16 = vmul.f32 %v834_v26, %v616_v49 }
 0x106   : > { %3447 = vst [vmem:[#allocation20_spill] sm:$0xff] %v2573_v2  ;;  %3448 = vst [vmem:[#allocation21_spill] sm:$0xff] %v2575_v27  ;;  %v2585_v11 = vpop.f32.mrb[13].mxu0  ;;  %v2587_v35 = vpop.f32.mrb[13].mxu1  ;;  %v979_v25 = vmul.f32 %v2399_v46, %v901_v14  ;;  %v1104_v41 = vmul.f32 %v2401_v47, %v901_v14  ;;  %v900_v42 = vmul.f32 %v2364_v17, %v521_v36 }
 0x107   : > { %3450 = vst [vmem:[#allocation23_spill] sm:$0xff] %v2585_v11  ;;  %3451 = vst [vmem:[#allocation24_spill] sm:$0xff] %v2587_v35  ;;  %v2599_v13 = vmul.f32 %v829_v37, %v611_v56  ;;  %v2602_v38 = vmul.f32 %v2399_v46, %v919_v16  ;;  %v2605_v31 = vmul.f32 %v2401_v47, %v919_v16  ;;  %v844_v27 = vpop.permute.xlu1 %843 }
 0x108   : > { %3452 = vst [vmem:[#allocation25_spill] sm:$0xff] %v2591_v6  ;;  %3453 = vst [vmem:[#allocation26_spill] sm:$0xff] %v2594_v29  ;;  %v1277_v4 = vmul.f32 %v2410_v57, %v919_v16  ;;  %v1401_v24 = vmul.f32 %v2412_v58, %v919_v16  ;;  %v1555_v17 = vmul.f32 %v2416_v63, %v919_v16  ;;  %v1031_v29 = vrot.slane %v979_v25, 2 }
 0x109   : > { %3454 = vst [vmem:[#allocation27_spill] sm:$0xff] %v2602_v38  ;;  %3455 = vst [vmem:[#allocation28_spill] sm:$0xff] %v2605_v31  ;;  %v2609_v30 = vpop.f32.mrb[14].mxu0  ;;  %v2611_v26 = vpop.f32.mrb[14].mxu1  ;;  %v1679_v14 = vmul.f32 %v2468_v12, %v919_v16  ;;  %v536_v36 = vadd.f32 %v2488_v0, %v2393_v34  ;;  %v1156_v6 = vrot.slane %v1104_v41, 4  ;;  %v978_v11 = vmul.f32 %v2399_v46, %v900_v42 }
 0x10a   : > { %3456 = vst [vmem:[#allocation29_spill] sm:$0xff] %v2609_v30  ;;  %3457 = vst [vmem:[#allocation30_spill] sm:$0xff] %v2611_v26  ;;  %v2618_v56 = vpop.f32.mrb[15].mxu0  ;;  %v2620_v37 = vpop.f32.mrb[15].mxu1  ;;  %v1336_v26 = vrot.slane %v1277_v4, 2  ;;  %v1460_v30 = vrot.slane %v1401_v24, 4  ;;  %v1103_v16 = vmul.f32 %v2401_v47, %v900_v42  ;;  %v1276_v0 = vmul.f32 %v2410_v57, %v2599_v13 }
 0x10b   : > { %3458 = vst [vmem:[#allocation31_spill] sm:$0xff] %v2618_v56  ;;  %3459 = vst [vmem:[#allocation32_spill] sm:$0xff] %v2620_v37  ;;  %v1610_v49 = vrot.slane %v1555_v17, 2  ;;  %v1734_v35 = vrot.slane %v1679_v14, 4  ;;  %v1400_v37 = vmul.f32 %v2412_v58, %v2599_v13  ;;  %v941_v33 = vmul.f32 %v2404_v51, %v900_v42 }
 0x10c   : > { %v1029_v4 = vrot.slane %v978_v11, 2  ;;  %v1554_v24 = vmul.f32 %v2416_v63, %v2599_v13  ;;  %v1678_v17 = vmul.f32 %v2468_v12, %v2599_v13  ;;  %v1154_v31 = vrot.slane %v1103_v16, 4 }
 0x10d   : > { %v2630_v25 = vpop.f32.mrb[16].mxu0  ;;  %v2632_v41 = vpop.f32.mrb[16].mxu1  ;;  %v1334_v38 = vrot.slane %v1276_v0, 2  ;;  %v1458_v56 = vrot.slane %v1400_v37, 4 }
 0x10e   : > { %3460 = vst [vmem:[#allocation33_spill] sm:$0xff] %v2630_v25  ;;  %3461 = vst [vmem:[#allocation34_spill] sm:$0xff] %v2632_v41  ;;  %v2639_v14 = vpop.f32.mrb[17].mxu0  ;;  %v2641_v8 = vpop.f32.mrb[17].mxu1  ;;  %v2644_v25 = vmul.f32 %v2366_v18, %v536_v36  ;;  %v3464_v41 = vrot.slane %v2445_v39, 2  ;;  %v1032_v42 = vsel %vm1022_vm1, %v1029_v4, %v1031_v29  ;;  %v1608_v32 = vrot.slane %v1554_v24, 2 }
 0x10f   : > { %3462 = vst [vmem:[#allocation35_spill] sm:$0xff] %v2639_v14  ;;  %3463 = vst [vmem:[#allocation36_spill] sm:$0xff] %v2641_v8  ;;  %v1732_v53 = vrot.slane %v1678_v17, 4  ;;  %v1082_v14 = vadd.f32 %v1032_v42, %v941_v33  ;;  %v3465_v8 = vrot.slane %v2448_v40, 4  ;;  %v1157_v37 = vsel %vm1147_vm2, %v1154_v31, %v1156_v6 }
 0x110   : > { %v1030_v11 = vsel %vm1022_vm1, %v3464_v41, %v1029_v4  ;;  %v3466_v18 = vrot.slane %v2459_v45, 2  ;;  %v2661_v36 = vsel %vm1022_vm1, %v1334_v38, %v1336_v26  ;;  %v3469_v29 = vrot.slane %v2476_v55, 4 }
 0x111   : > { %v1081_v2 = vadd.f32 %v1030_v11, %v2463_v52  ;;  %v1155_v16 = vsel %vm1147_vm2, %v3465_v8, %v1154_v31  ;;  %3468 = vst [vmem:[#allocation38_spill] sm:$0xff] %v2661_v36  ;;  %v2669_v52 = vsel %vm1147_vm2, %v1458_v56, %v1460_v30  ;;  %v2671_v8 = vadd.f32 %v1157_v37, %v1082_v14 }
 0x112   : > { %v2658_v39 = vsel %vm1022_vm1, %v3466_v18, %v1334_v38  ;;  %v2666_v0 = vsel %vm1147_vm2, %v3469_v29, %v1458_v56  ;;  %3471 = vst [vmem:[#allocation40_spill] sm:$0xff] %v2669_v52  ;;  %v3472_v33 = vrot.slane %v2482_v61, 2  ;;  %v2679_v31 = vsel %vm1022_vm1, %v1608_v32, %v1610_v49 }
 0x113   : > { %3467 = vst [vmem:[#allocation37_spill] sm:$0xff] %v2658_v39  ;;  %3470 = vst [vmem:[#allocation39_spill] sm:$0xff] %v2666_v0  ;;  %v1206_v40 = vadd.f32 %v1155_v16, %v1081_v2  ;;  %v3475_v38 = vrot.slane %v2486_v62, 4  ;;  %v2687_v6 = vsel %vm1147_vm2, %v1732_v53, %v1734_v35  ;;  %v626_v2 = vadd.f32 %v2490_v1, %v2393_v34 }
 0x114   : > { %v2676_v45 = vsel %vm1022_vm1, %v3472_v33, %v1608_v32  ;;  %3474 = vst [vmem:[#allocation42_spill] sm:$0xff] %v2679_v31  ;;  %3477 = vst [vmem:[#allocation44_spill] sm:$0xff] %v2687_v6  ;;  %v531_v61 = vadd.f32 %v2393_v34, %v2497_v7  ;;  %v621_v30 = vadd.f32 %v2393_v34, %v2499_v9 }
 0x115   : > { %3473 = vst [vmem:[#allocation41_spill] sm:$0xff] %v2676_v45  ;;  %v2684_v55 = vsel %vm1147_vm2, %v3475_v38, %v1732_v53  ;;  %v546_v32 = vadd.f32 %v2515_v60, %v2393_v34  ;;  %v636_v62 = vadd.f32 %v2517_v48, %v2393_v34  ;;  %v541_v26 = vadd.f32 %v2393_v34, %v2523_v15  ;;  %v839_v53 = vpop.permute.xlu0 %838  ;;  %v854_v60 = vpop.permute.xlu1 %853 }
 0x116   : > { %3476 = vst [vmem:[#allocation43_spill] sm:$0xff] %v2684_v55  ;;  %v2703_v35 = vmul.f32 %v2408_v54, %v2599_v13  ;;  %v2707_v1 = vmul.f32 %v2414_v59, %v2599_v13  ;;  %v2709_v7 = vmul.f32 %v844_v27, %v626_v2  ;;  %v902_v9 = vmul.f32 %v2368_v19, %v531_v61 }
 0x117   : > { %v2712_v49 = vmul.f32 %v839_v53, %v621_v30  ;;  %v905_v48 = vmul.f32 %v2370_v20, %v546_v32  ;;  %v943_v15 = vmul.f32 %v2404_v51, %v2644_v25  ;;  %v981_v56 = vmul.f32 %v2399_v46, %v2644_v25 }
 0x118   : > { %3478 = vst [vmem:[#allocation45_spill] sm:$0xff] %v2703_v35  ;;  %3479 = vst [vmem:[#allocation46_spill] sm:$0xff] %v2707_v1  ;;  %v980_v41 = vmul.f32 %v2399_v46, %v902_v9  ;;  %v1105_v4 = vmul.f32 %v2401_v47, %v902_v9  ;;  %v2721_v24 = vmul.f32 %v854_v60, %v636_v62 }
 0x119   : > { %v904_v27 = vmul.f32 %v2372_v21, %v541_v26  ;;  %v2726_v19 = vmul.f32 %v2414_v59, %v2709_v7  ;;  %v1224_v20 = vmul.f32 %v2408_v54, %v902_v9  ;;  %v1260_v17 = vmul.f32 %v2410_v57, %v902_v9 }
 0x11a   : > { %v1384_v14 = vmul.f32 %v2412_v58, %v902_v9  ;;  %v942_v11 = vmul.f32 %v2404_v51, %v902_v9  ;;  %v2734_v42 = vmul.f32 %v2414_v59, %v2712_v49  ;;  %v2738_v16 = vmul.f32 %v2416_v63, %v2712_v49 }
 0x11b   : > { %3480 = vst [vmem:[#allocation47_spill] sm:$0xff] %v2726_v19  ;;  %v2742_v21 = vmul.f32 %v2468_v12, %v2712_v49  ;;  %v1033_v37 = vrot.slane %v980_v41, 2  ;;  %v1158_v18 = vrot.slane %v1105_v4, 4  ;;  %v1240_v29 = vadd.f32 %v1224_v20, %v2492_v3 }
 0x11c   : > { %v1308_v33 = vrot.slane %v1260_v17, 2  ;;  %v1432_v38 = vrot.slane %v1384_v14, 4  ;;  %v2746_v2 = vmul.f32 %v2404_v51, %v905_v48  ;;  %v2749_v61 = vmul.f32 %v2399_v46, %v905_v48 }
 0x11d   : > { %v2752_v30 = vmul.f32 %v2401_v47, %v905_v48  ;;  %v1226_v62 = vmul.f32 %v2408_v54, %v905_v48  ;;  %v2757_v26 = vmul.f32 %v2410_v57, %v905_v48  ;;  %v2760_v3 = vmul.f32 %v2412_v58, %v905_v48 }
 0x11e   : > { %v2767_v41 = vmul.f32 %v2414_v59, %v2721_v24  ;;  %v2773_v20 = vmul.f32 %v2416_v63, %v2721_v24  ;;  %v2777_v48 = vmul.f32 %v2468_v12, %v2721_v24  ;;  %v982_v17 = vmul.f32 %v2399_v46, %v904_v27 }
 0x11f   : > { %v2769_v4 = vadd.f32 %v1226_v62, %v1206_v40  ;;  %v1034_v9 = vrot.slane %v981_v56, 2  ;;  %v1106_v53 = vmul.f32 %v2401_v47, %v2644_v25  ;;  %v1107_v62 = vmul.f32 %v2401_v47, %v904_v27 }
 0x120   : > { %3481 = vst [vmem:[#allocation48_spill] sm:$0xff] %v2767_v41  ;;  %v1036_v40 = vrot.slane %v982_v17, 2  ;;  %v1225_v32 = vmul.f32 %v2408_v54, %v2644_v25  ;;  %v1261_v6 = vmul.f32 %v2410_v57, %v2644_v25  ;;  %v1262_v14 = vmul.f32 %v2410_v57, %v904_v27 }
 0x121   : > { %v1035_v55 = vsel %vm1022_vm1, %v1033_v37, %v1034_v9  ;;  %v1159_v41 = vrot.slane %v1106_v53, 4  ;;  %v1385_v56 = vmul.f32 %v2412_v58, %v2644_v25  ;;  %v1161_v17 = vrot.slane %v1107_v62, 4 }
 0x122   : > { %v1037_v60 = vsel %vm1022_vm1, %v1034_v9, %v1036_v40  ;;  %v1083_v31 = vadd.f32 %v1035_v55, %v942_v11  ;;  %v1241_v45 = vadd.f32 %v1225_v32, %v2537_v43  ;;  %v1309_v1 = vrot.slane %v1261_v6, 2  ;;  %v864_v9 = vpop.permute.xlu1 %863 }
 0x123   : > { %v1084_v52 = vadd.f32 %v1037_v60, %v943_v15  ;;  %v1160_v0 = vsel %vm1147_vm2, %v1158_v18, %v1159_v41  ;;  %v1311_v36 = vrot.slane %v1262_v14, 2  ;;  %v1162_v39 = vsel %vm1147_vm2, %v1159_v41, %v1161_v17  ;;  %v849_v15 = vpop.permute.xlu0 %848 }
 0x124   : > { %v2797_v37 = vadd.f32 %v1160_v0, %v1083_v31  ;;  %v1386_v53 = vmul.f32 %v2412_v58, %v904_v27  ;;  %v1433_v35 = vrot.slane %v1385_v56, 4  ;;  %v1310_v25 = vsel %vm1022_vm1, %v1308_v33, %v1309_v1 }
 0x125   : > { %v2800_v19 = vadd.f32 %v1162_v39, %v1084_v52  ;;  %v1312_v55 = vsel %vm1022_vm1, %v1309_v1, %v1311_v36  ;;  %v631_v43 = vadd.f32 %v2393_v34, %v2525_v44  ;;  %v1364_v11 = vadd.f32 %v1310_v25, %v1240_v29 }
 0x126   : > { %v1365_v6 = vadd.f32 %v1312_v55, %v1241_v45  ;;  %v1434_v18 = vsel %vm1147_vm2, %v1432_v38, %v1433_v35  ;;  %v1435_v32 = vrot.slane %v1386_v53, 4  ;;  %v1557_v31 = vmul.f32 %v2416_v63, %v2709_v7 }
 0x127   : > { %v922_v0 = vmul.f32 %v849_v15, %v631_v43  ;;  %v1681_v39 = vmul.f32 %v2468_v12, %v2709_v7  ;;  %v556_v52 = vadd.f32 %v2546_v28, %v2393_v34  ;;  %v2815_v1 = vadd.f32 %v1434_v18, %v1364_v11  ;;  %v3488_v11 = vld [vmem:[#allocation2_spill] sm:$0xff] }
 0x128   : > { %v1436_v44 = vsel %vm1147_vm2, %v1433_v35, %v1435_v32  ;;  %v646_v45 = vadd.f32 %v2548_v10, %v2393_v34  ;;  %v1613_v28 = vrot.slane %v1557_v31, 2  ;;  %v551_v62 = vadd.f32 %v2393_v34, %v2556_v50 }
 0x129   : > { %v2820_v29 = vadd.f32 %v1436_v44, %v1365_v6  ;;  %v2823_v33 = vmul.f32 %v2410_v57, %v922_v0  ;;  %v1558_v38 = vmul.f32 %v2416_v63, %v922_v0  ;;  %v1682_v60 = vmul.f32 %v2468_v12, %v922_v0 }
 0x12a   : > { %v1737_v41 = vrot.slane %v1681_v39, 4  ;;  %v907_v35 = vmul.f32 %v2374_v22, %v556_v52  ;;  %v2829_v14 = vmul.f32 %v2412_v58, %v922_v0  ;;  %v925_v40 = vmul.f32 %v864_v9, %v646_v45 }
 0x12b   : > { %v1615_v10 = vrot.slane %v1558_v38, 2  ;;  %v3482_v56 = vrot.slane %v2738_v16, 2  ;;  %v3483_v53 = vrot.slane %v2742_v21, 4  ;;  %v1739_v55 = vrot.slane %v1682_v60, 4 }
 0x12c   : > { %v985_v22 = vmul.f32 %v2399_v46, %v907_v35  ;;  %v1110_v15 = vmul.f32 %v2401_v47, %v907_v35  ;;  %v1265_v50 = vmul.f32 %v2410_v57, %v907_v35  ;;  %v1389_v16 = vmul.f32 %v2412_v58, %v907_v35 }
 0x12d   : > { %v2836_v17 = vsel %vm1022_vm1, %v3482_v56, %v1613_v28  ;;  %v2841_v25 = vsel %vm1147_vm2, %v3483_v53, %v1737_v41  ;;  %v2845_v43 = vsel %vm1022_vm1, %v1613_v28, %v1615_v10  ;;  %v2852_v6 = vsel %vm1147_vm2, %v1737_v41, %v1739_v55  ;;  %v3486_v41 = vld [vmem:[#allocation20_spill] sm:$0xff]  ;;  %v3487_v55 = vld [vmem:[#allocation21_spill] sm:$0xff] }
 0x12e   : > { %v2855_v21 = vmul.f32 %v2410_v57, %v925_v40  ;;  %v2858_v18 = vmul.f32 %v2412_v58, %v925_v40  ;;  %v1041_v0 = vrot.slane %v985_v22, 2  ;;  %v1166_v31 = vrot.slane %v1110_v15, 4  ;;  %v859_v22 = vpop.permute.xlu0 %858 }
 0x12f   : > { %v1561_v39 = vmul.f32 %v2416_v63, %v925_v40  ;;  %v1316_v52 = vrot.slane %v1265_v50, 2  ;;  %v1440_v44 = vrot.slane %v1389_v16, 4  ;;  %v1685_v45 = vmul.f32 %v2468_v12, %v925_v40 }
 0x130   : > { %3484 = vst [vmem:[#allocation49_spill] sm:$0xff] %v2855_v21  ;;  %3485 = vst [vmem:[#allocation50_spill] sm:$0xff] %v2858_v18  ;;  %v906_v38 = vmul.f32 %v2376_v23, %v551_v62  ;;  %v641_v60 = vadd.f32 %v2393_v34, %v2558_v5  ;;  %v566_v35 = vadd.f32 %v3486_v41, %v2393_v34  ;;  %v3490_v18 = vrot.slane %v2752_v30, 4  ;;  %v3526_v21 = vld [vmem:[#allocation5_spill] sm:$0xff] }
 0x131   : > { %v1620_v10 = vrot.slane %v1561_v39, 2  ;;  %v656_v40 = vadd.f32 %v3487_v55, %v2393_v34  ;;  %v1744_v23 = vrot.slane %v1685_v45, 4  ;;  %v3489_v45 = vrot.slane %v2749_v61, 2 }
 0x132   : > { %v984_v56 = vmul.f32 %v2399_v46, %v906_v38  ;;  %v1109_v53 = vmul.f32 %v2401_v47, %v906_v38  ;;  %v1227_v62 = vmul.f32 %v2408_v54, %v906_v38  ;;  %v1264_v15 = vmul.f32 %v2410_v57, %v906_v38 }
 0x133   : > { %v1388_v50 = vmul.f32 %v2412_v58, %v906_v38  ;;  %v945_v5 = vmul.f32 %v2404_v51, %v906_v38  ;;  %v2878_v39 = vmul.f32 %v859_v22, %v641_v60  ;;  %v2882_v55 = vmul.f32 %v3488_v11, %v566_v35 }
 0x134   : > { %v1039_v16 = vrot.slane %v984_v56, 2  ;;  %v1164_v41 = vrot.slane %v1109_v53, 4  ;;  %v1243_v28 = vadd.f32 %v1227_v62, %v2671_v8  ;;  %v1314_v9 = vrot.slane %v1264_v15, 2  ;;  %v874_v62 = vpop.permute.xlu1 %873 }
 0x135   : > { %v1438_v32 = vrot.slane %v1388_v50, 4  ;;  %v3491_v53 = vrot.slane %v2757_v26, 2  ;;  %v1560_v26 = vmul.f32 %v2416_v63, %v2878_v39 }
 0x136   : > { %v1040_v27 = vsel %vm1022_vm1, %v3489_v45, %v1039_v16  ;;  %v1042_v36 = vsel %vm1022_vm1, %v1039_v16, %v1041_v0  ;;  %v1165_v38 = vsel %vm1147_vm2, %v3490_v18, %v1164_v41  ;;  %v1167_v60 = vsel %vm1147_vm2, %v1164_v41, %v1166_v31 }
 0x137   : > { %v1085_v56 = vadd.f32 %v1040_v27, %v2746_v2  ;;  %v1086_v8 = vadd.f32 %v1042_v36, %v945_v5  ;;  %v1315_v11 = vsel %vm1022_vm1, %v3491_v53, %v1314_v9  ;;  %v1317_v35 = vsel %vm1022_vm1, %v1314_v9, %v1316_v52  ;;  %v3493_v52 = vld [vmem:[#allocation8_spill] sm:$0xff]  ;;  %v3501_v53 = vld [vmem:[#allocation13_spill] sm:$0xff] }
 0x138   : > { %v1366_v61 = vadd.f32 %v1315_v11, %v2769_v4  ;;  %v1367_v22 = vadd.f32 %v1317_v35, %v1243_v28  ;;  %v3492_v0 = vrot.slane %v2760_v3, 4  ;;  %v1441_v18 = vsel %vm1147_vm2, %v1438_v32, %v1440_v44 }
 0x139   : > { %v2902_v31 = vadd.f32 %v1165_v38, %v1085_v56  ;;  %v2904_v2 = vadd.f32 %v1167_v60, %v1086_v8  ;;  %v1684_v36 = vmul.f32 %v2468_v12, %v2878_v39  ;;  %v927_v3 = vmul.f32 %v874_v62, %v656_v40 }
 0x13a   : > { %v1439_v30 = vsel %vm1147_vm2, %v3492_v0, %v1438_v32  ;;  %v2912_v4 = vadd.f32 %v1441_v18, %v1367_v22  ;;  %v993_v9 = vmul.f32 %v2399_v46, %v3493_v52  ;;  %v2918_v32 = vmul.f32 %v2414_v59, %v2878_v39 }
 0x13b   : > { %v2910_v27 = vadd.f32 %v1439_v30, %v1366_v61  ;;  %v1618_v44 = vrot.slane %v1560_v26, 2  ;;  %v1742_v28 = vrot.slane %v1684_v36, 4  ;;  %v1118_v15 = vmul.f32 %v2401_v47, %v3493_v52 }
 0x13c   : > { %3494 = vst [vmem:[#allocation20_spill] sm:$0xff] %v2918_v32  ;;  %v951_v50 = vmul.f32 %v2404_v51, %v3493_v52  ;;  %v1054_v5 = vrot.slane %v993_v9, 2  ;;  %v1279_v16 = vmul.f32 %v2410_v57, %v2709_v7  ;;  %v1403_v40 = vmul.f32 %v2412_v58, %v2709_v7 }
 0x13d   : > { %v3495_v41 = vrot.slane %v2773_v20, 2  ;;  %v2934_v38 = vsel %vm1022_vm1, %v1618_v44, %v1620_v10  ;;  %v3498_v60 = vrot.slane %v2777_v48, 4  ;;  %v2942_v8 = vsel %vm1147_vm2, %v1742_v28, %v1744_v23  ;;  %v3503_v23 = vld [vmem:[#allocation14_spill] sm:$0xff] }
 0x13e   : > { %3497 = vst [vmem:[#allocation2_spill] sm:$0xff] %v2934_v38  ;;  %3500 = vst [vmem:[#allocation51_spill] sm:$0xff] %v2942_v8  ;;  %v3502_v11 = vrot.slane %v3501_v53, 2  ;;  %v1179_v61 = vrot.slane %v1118_v15, 4  ;;  %v1339_v20 = vrot.slane %v1279_v16, 2  ;;  %v1463_v22 = vrot.slane %v1403_v40, 4  ;;  %v869_v15 = vpop.permute.xlu0 %868 }
 0x13f   : > { %v2931_v45 = vsel %vm1022_vm1, %v3495_v41, %v1618_v44  ;;  %v2939_v56 = vsel %vm1147_vm2, %v3498_v60, %v1742_v28  ;;  %v1237_v10 = vmul.f32 %v2408_v54, %v2709_v7  ;;  %v2950_v48 = vmul.f32 %v2416_v63, %v927_v3  ;;  %v3507_v28 = vld [vmem:[#allocation24_spill] sm:$0xff]  ;;  %v3508_v41 = vld [vmem:[#allocation23_spill] sm:$0xff] }
 0x140   : > { %3496 = vst [vmem:[#allocation21_spill] sm:$0xff] %v2931_v45  ;;  %3499 = vst [vmem:[#allocation8_spill] sm:$0xff] %v2939_v56  ;;  %v1057_v35 = vsel %vm1022_vm1, %v1054_v5, %v3502_v11  ;;  %v2953_v30 = vmul.f32 %v2468_v12, %v927_v3  ;;  %v3504_v18 = vrot.slane %v3503_v23, 4  ;;  %v3505_v26 = vrot.slane %v2823_v33, 2 }
 0x141   : > { %v1092_v0 = vadd.f32 %v1057_v35, %v951_v50  ;;  %v3506_v9 = vrot.slane %v2829_v14, 4  ;;  %v651_v7 = vadd.f32 %v2393_v34, %v3507_v28  ;;  %v1521_v16 = vmul.f32 %v2414_v59, %v927_v3  ;;  %v3509_v14 = vld [vmem:[#allocation9_spill] sm:$0xff] }
 0x142   : > { %v1182_v62 = vsel %vm1147_vm2, %v1179_v61, %v3504_v18  ;;  %v1342_v36 = vsel %vm1022_vm1, %v1339_v20, %v3505_v26  ;;  %v561_v60 = vadd.f32 %v2393_v34, %v3508_v41  ;;  %v992_v11 = vmul.f32 %v2399_v46, %v3509_v14 }
 0x143   : > { %v1466_v44 = vsel %vm1147_vm2, %v1463_v22, %v3506_v9  ;;  %v1217_v50 = vadd.f32 %v1182_v62, %v1092_v0  ;;  %v926_v53 = vmul.f32 %v869_v15, %v651_v7  ;;  %v1117_v35 = vmul.f32 %v2401_v47, %v3509_v14 }
 0x144   : > { %v950_v3 = vmul.f32 %v2404_v51, %v3509_v14  ;;  %v1278_v0 = vmul.f32 %v2410_v57, %v2712_v49  ;;  %v1402_v18 = vmul.f32 %v2412_v58, %v2712_v49  ;;  %v1053_v62 = vrot.slane %v992_v11, 2 }
 0x145   : > { %v1253_v23 = vadd.f32 %v1237_v10, %v1217_v50  ;;  %v1178_v26 = vrot.slane %v1117_v35, 4  ;;  %v1236_v9 = vmul.f32 %v2408_v54, %v2712_v49  ;;  %v1562_v28 = vmul.f32 %v2416_v63, %v926_v53  ;;  %v3511_v49 = vld [vmem:[#allocation29_spill] sm:$0xff] }
 0x146   : > { %v1338_v10 = vrot.slane %v1278_v0, 2  ;;  %v1462_v15 = vrot.slane %v1402_v18, 4  ;;  %v1686_v50 = vmul.f32 %v2468_v12, %v926_v53  ;;  %v1055_v41 = vsel %vm1022_vm1, %v1053_v62, %v1054_v5  ;;  %v3512_v0 = vld [vmem:[#allocation3_spill] sm:$0xff]  ;;  %v3514_v62 = vld [vmem:[#allocation4_spill] sm:$0xff] }
 0x147   : > { %v1377_v7 = vadd.f32 %v1342_v36, %v1253_v23  ;;  %v1180_v11 = vsel %vm1147_vm2, %v1178_v26, %v1179_v61  ;;  %v1622_v35 = vrot.slane %v1562_v28, 2  ;;  %v576_v33 = vadd.f32 %v3511_v49, %v2393_v34 }
 0x148   : > { %v1091_v23 = vadd.f32 %v1055_v41, %v950_v3  ;;  %v1340_v40 = vsel %vm1022_vm1, %v1338_v10, %v1339_v20  ;;  %v1464_v8 = vsel %vm1147_vm2, %v1462_v15, %v1463_v22  ;;  %v2999_v56 = vmul.f32 %v3512_v0, %v561_v60 }
 0x149   : > { %v1501_v36 = vadd.f32 %v1466_v44, %v1377_v7  ;;  %v3513_v18 = vrot.slane %v2950_v48, 2  ;;  %v1746_v5 = vrot.slane %v1686_v50, 4  ;;  %v911_v61 = vmul.f32 %v3514_v62, %v576_v33  ;;  %v3515_v44 = vld [vmem:[#allocation30_spill] sm:$0xff] }
 0x14a   : > { %v1216_v20 = vadd.f32 %v1180_v11, %v1091_v23  ;;  %v1520_v22 = vmul.f32 %v2414_v59, %v926_v53  ;;  %v666_v60 = vadd.f32 %v3515_v44, %v2393_v34  ;;  %v3516_v3 = vrot.slane %v2953_v30, 4  ;;  %v3517_v7 = vld [vmem:[#allocation10_spill] sm:$0xff] }
 0x14b   : > { %v1624_v38 = vsel %vm1022_vm1, %v1622_v35, %v3513_v18  ;;  %v3005_v26 = vadd.f32 %v1521_v16, %v1501_v36  ;;  %v3020_v33 = vmul.f32 %v2399_v46, %v911_v61  ;;  %v3023_v16 = vmul.f32 %v2401_v47, %v911_v61 }
 0x14c   : > { %v1748_v28 = vsel %vm1147_vm2, %v1746_v5, %v3516_v3  ;;  %v952_v10 = vmul.f32 %v2404_v51, %v3517_v7  ;;  %v1252_v15 = vadd.f32 %v1236_v9, %v1216_v20  ;;  %v1230_v50 = vmul.f32 %v2408_v54, %v911_v61  ;;  %v884_v3 = vpop.permute.xlu1 %883 }
 0x14d   : > { %v3029_v53 = vmul.f32 %v2410_v57, %v911_v61  ;;  %v3032_v41 = vmul.f32 %v2412_v58, %v911_v61  ;;  %v3035_v11 = vmul.f32 %v2404_v51, %v911_v61  ;;  %v1510_v35 = vmul.f32 %v2414_v59, %v911_v61 }
 0x14e   : > { %v3039_v49 = vmul.f32 %v2416_v63, %v911_v61  ;;  %v995_v36 = vmul.f32 %v2399_v46, %v3517_v7  ;;  %v1376_v9 = vadd.f32 %v1340_v40, %v1252_v15  ;;  %v3048_v18 = vadd.f32 %v1230_v50, %v2902_v31 }
 0x14f   : > { %v3053_v20 = vadd.f32 %v1510_v35, %v2910_v27  ;;  %v3057_v40 = vmul.f32 %v2468_v12, %v911_v61  ;;  %v3061_v15 = vmul.f32 %v2399_v46, %v2599_v13  ;;  %v1120_v31 = vmul.f32 %v2401_v47, %v3517_v7 }
 0x150   : > { %3518 = vst [vmem:[#allocation13_spill] sm:$0xff] %v3039_v49  ;;  %v1500_v45 = vadd.f32 %v1464_v8, %v1376_v9  ;;  %v929_v50 = vmul.f32 %v884_v3, %v666_v60  ;;  %v1058_v62 = vrot.slane %v995_v36, 2  ;;  %v3067_v27 = vmul.f32 %v2401_v47, %v2599_v13 }
 0x151   : > { %3519 = vst [vmem:[#allocation14_spill] sm:$0xff] %v3053_v20  ;;  %3520 = vst [vmem:[#allocation24_spill] sm:$0xff] %v3057_v40  ;;  %v1281_v8 = vmul.f32 %v2410_v57, %v2721_v24  ;;  %v3424_v61 = vrot.slane %v3061_v15, 2  ;;  %v1238_v9 = vmul.f32 %v2408_v54, %v2721_v24  ;;  %v3076_v44 = vmul.f32 %v2410_v57, %v2878_v39 }
 0x152   : > { %v1536_v35 = vadd.f32 %v1520_v22, %v1500_v45  ;;  %v1183_v7 = vrot.slane %v1120_v31, 4  ;;  %v3423_v60 = vrot.slane %v3067_v27, 4  ;;  %v1405_v36 = vmul.f32 %v2412_v58, %v2721_v24  ;;  %v3092_v31 = vld [vmem:[%s3407_s5] ss:$0 sm:$0xff] }
 0x153   : > { %3521 = vst [vmem:[#allocation23_spill] sm:$0xff] %v3076_v44  ;;  %v3083_v3 = vmul.f32 %v2412_v58, %v2878_v39  ;;  %v1060_v22 = vsel %vm1022_vm1, %v1058_v62, %v3424_v61  ;;  %v1343_v5 = vrot.slane %v1281_v8, 2  ;;  %v3421_v0 = vrot.slane %v3076_v44, 2 }
 0x154   : > { %v1660_v45 = vadd.f32 %v1624_v38, %v1536_v35  ;;  %v1093_v23 = vadd.f32 %v1060_v22, %v952_v10  ;;  %v1185_v24 = vsel %vm1147_vm2, %v1183_v7, %v3423_v60  ;;  %v1467_v32 = vrot.slane %v1405_v36, 4  ;;  %v3524_v36 = vld [vmem:[#allocation31_spill] sm:$0xff] }
 0x155   : > { %3522 = vst [vmem:[#allocation9_spill] sm:$0xff] %v3083_v3  ;;  %v3422_v38 = vrot.slane %v3083_v3, 4  ;;  %v1345_v62 = vsel %vm1022_vm1, %v1343_v5, %v3421_v0  ;;  %v1522_v8 = vmul.f32 %v2414_v59, %v929_v50  ;;  %v3118_v22 = vmul.f32 %v2468_v12, %v929_v50 }
 0x156   : > { %v1784_v35 = vadd.f32 %v1748_v28, %v1660_v45  ;;  %v1218_v10 = vadd.f32 %v1185_v24, %v1093_v23  ;;  %v3112_v28 = vmul.f32 %v2416_v63, %v929_v50  ;;  %v571_v45 = vadd.f32 %v2393_v34, %v3524_v36 }
 0x157   : > { %v1469_v7 = vsel %vm1147_vm2, %v1467_v32, %v3422_v38  ;;  %3525 = vst [vmem:[#allocation3_spill] sm:$0xff] %v3118_v22  ;;  %v946_v0 = vmul.f32 %v2404_v51, %v2999_v56  ;;  %v947_v23 = vmul.f32 %v2404_v51, %v2882_v55  ;;  %v986_v38 = vmul.f32 %v2399_v46, %v2999_v56 }
 0x158   : > { %3523 = vst [vmem:[#allocation29_spill] sm:$0xff] %v3112_v28  ;;  %v1807_v5 = vadd.f32 %v3092_v31, %v1784_v35  ;;  %v1254_v24 = vadd.f32 %v1238_v9, %v1218_v10  ;;  %v3125_v32 = vmul.f32 %v3526_v21, %v571_v45  ;;  %v987_v34 = vmul.f32 %v2399_v46, %v2882_v55 }
 0x159   : > { %v1111_v50 = vmul.f32 %v2401_v47, %v2999_v56  ;;  %v1112_v35 = vmul.f32 %v2401_v47, %v2882_v55  ;;  %v1228_v36 = vmul.f32 %v2408_v54, %v2999_v56  ;;  %v1229_v21 = vmul.f32 %v2408_v54, %v2882_v55 }
 0x15a   : > { %1823 = vst [vmem:[%s3106_s14 + $0x60] sm:$0xff] %v1807_v5  ;;  %v1378_v9 = vadd.f32 %v1345_v62, %v1254_v24  ;;  %v988_v10 = vmul.f32 %v2399_v46, %v3125_v32  ;;  %v1043_v45 = vrot.slane %v986_v38, 2  ;;  %v1044_v60 = vrot.slane %v987_v34, 2 }
 0x15b   : > { %v1113_v5 = vmul.f32 %v2401_v47, %v3125_v32  ;;  %v1168_v61 = vrot.slane %v1111_v50, 4  ;;  %v1169_v22 = vrot.slane %v1112_v35, 4  ;;  %v1232_v28 = vmul.f32 %v2408_v54, %v3509_v14 }
 0x15c   : > { %v1502_v3 = vadd.f32 %v1469_v7, %v1378_v9  ;;  %v1045_v44 = vsel %vm1022_vm1, %v1043_v45, %v1044_v60  ;;  %v1046_v20 = vrot.slane %v988_v10, 2  ;;  %v1233_v62 = vmul.f32 %v2408_v54, %v3493_v52 }
 0x15d   : > { %v1087_v24 = vadd.f32 %v1045_v44, %v946_v0  ;;  %v1170_v40 = vsel %vm1147_vm2, %v1168_v61, %v1169_v22  ;;  %v1171_v38 = vrot.slane %v1113_v5, 4  ;;  %v1244_v34 = vadd.f32 %v1228_v36, %v2797_v37 }
 0x15e   : > { %v3151_v49 = vadd.f32 %v1522_v8, %v1502_v3  ;;  %v1047_v50 = vsel %vm1022_vm1, %v1044_v60, %v1046_v20  ;;  %v1245_v35 = vadd.f32 %v1229_v21, %v2800_v19  ;;  %v1266_v7 = vmul.f32 %v2410_v57, %v2999_v56 }
 0x15f   : > { %v1088_v9 = vadd.f32 %v1047_v50, %v947_v23  ;;  %v1172_v10 = vsel %vm1147_vm2, %v1169_v22, %v1171_v38  ;;  %v1212_v45 = vadd.f32 %v1170_v40, %v1087_v24  ;;  %v1267_v0 = vmul.f32 %v2410_v57, %v2882_v55  ;;  %v3527_v24 = vld [vmem:[#allocation15_spill] sm:$0xff] }
 0x160   : > { %v1268_v44 = vmul.f32 %v2410_v57, %v3125_v32  ;;  %v1318_v37 = vrot.slane %v1266_v7, 2  ;;  %v1390_v61 = vmul.f32 %v2412_v58, %v2999_v56  ;;  %v1391_v19 = vmul.f32 %v2412_v58, %v2882_v55 }
 0x161   : > { %v1213_v20 = vadd.f32 %v1172_v10, %v1088_v9  ;;  %v1248_v60 = vadd.f32 %v1232_v28, %v1212_v45  ;;  %v1319_v3 = vrot.slane %v1267_v0, 2  ;;  %v1392_v8 = vmul.f32 %v2412_v58, %v3125_v32  ;;  %v3528_v0 = vld [vmem:[#allocation16_spill] sm:$0xff] }
 0x162   : > { %v1321_v40 = vrot.slane %v1268_v44, 2  ;;  %v1442_v22 = vrot.slane %v1390_v61, 4  ;;  %v1443_v23 = vrot.slane %v1391_v19, 4  ;;  %v1508_v36 = vmul.f32 %v2414_v59, %v2999_v56  ;;  %v3529_v19 = vld [vmem:[#allocation17_spill] sm:$0xff] }
 0x163   : > { %v1249_v21 = vadd.f32 %v1233_v62, %v1213_v20  ;;  %v1320_v5 = vsel %vm1022_vm1, %v1318_v37, %v1319_v3  ;;  %v1372_v38 = vadd.f32 %v3527_v24, %v1248_v60  ;;  %v1445_v50 = vrot.slane %v1392_v8, 4  ;;  %v3530_v8 = vld [vmem:[#allocation18_spill] sm:$0xff]  ;;  %v3531_v24 = vld [vmem:[#allocation47_spill] sm:$0xff] }
 0x164   : > { %v1322_v7 = vsel %vm1022_vm1, %v1319_v3, %v1321_v40  ;;  %v1368_v9 = vadd.f32 %v1320_v5, %v1244_v34  ;;  %v1444_v28 = vsel %vm1147_vm2, %v1442_v22, %v1443_v23  ;;  %v1509_v10 = vmul.f32 %v2414_v59, %v2882_v55 }
 0x165   : > { %v1369_v45 = vadd.f32 %v1322_v7, %v1245_v35  ;;  %v1373_v44 = vadd.f32 %v3528_v0, %v1249_v21  ;;  %v1446_v61 = vsel %vm1147_vm2, %v1443_v23, %v1445_v50  ;;  %v1496_v62 = vadd.f32 %v3529_v19, %v1372_v38  ;;  %v3532_v7 = vld [vmem:[#allocation19_spill] sm:$0xff]  ;;  %v3534_v19 = vld [vmem:[#allocation25_spill] sm:$0xff] }
 0x166   : > { %v1492_v20 = vadd.f32 %v1444_v28, %v1368_v9  ;;  %v1512_v37 = vmul.f32 %v2414_v59, %v3509_v14  ;;  %v1513_v60 = vmul.f32 %v2414_v59, %v3493_v52  ;;  %v1524_v34 = vadd.f32 %v1508_v36, %v2815_v1  ;;  %v3533_v28 = vld [vmem:[#allocation22_spill] sm:$0xff] }
 0x167   : > { %v1493_v3 = vadd.f32 %v1446_v61, %v1369_v45  ;;  %v1497_v40 = vadd.f32 %v3530_v8, %v1373_v44  ;;  %v1525_v35 = vadd.f32 %v1509_v10, %v2820_v29  ;;  %v1532_v22 = vadd.f32 %v2734_v42, %v1496_v62  ;;  %v3535_v8 = vld [vmem:[#allocation26_spill] sm:$0xff] }
 0x168   : > { %v1528_v21 = vadd.f32 %v1512_v37, %v1492_v20  ;;  %v1544_v23 = vmul.f32 %v2416_v63, %v2999_v56  ;;  %v1545_v5 = vmul.f32 %v2416_v63, %v2882_v55  ;;  %v1546_v14 = vmul.f32 %v2416_v63, %v3125_v32 }
 0x169   : > { %v1529_v52 = vadd.f32 %v1513_v60, %v1493_v3  ;;  %v1533_v1 = vadd.f32 %v3531_v24, %v1497_v40  ;;  %v1656_v36 = vadd.f32 %v2836_v17, %v1532_v22  ;;  %v1668_v29 = vmul.f32 %v2468_v12, %v2999_v56 }
 0x16a   : > { %v1592_v38 = vrot.slane %v1544_v23, 2  ;;  %v1593_v42 = vrot.slane %v1545_v5, 2  ;;  %v1595_v50 = vrot.slane %v1546_v14, 2  ;;  %v1652_v9 = vadd.f32 %v3532_v7, %v1528_v21  ;;  %v3537_v23 = vld [vmem:[#allocation33_spill] sm:$0xff]  ;;  %v879_v14 = vpop.permute.xlu0 %878 }
 0x16b   : > { %v1653_v10 = vadd.f32 %v3533_v28, %v1529_v52  ;;  %v1657_v45 = vadd.f32 %v2845_v43, %v1533_v1  ;;  %v1669_v0 = vmul.f32 %v2468_v12, %v2882_v55  ;;  %v1670_v44 = vmul.f32 %v2468_v12, %v3125_v32  ;;  %v3540_v28 = vld [vmem:[#allocation35_spill] sm:$0xff] }
 0x16c   : > { %v1594_v17 = vsel %vm1022_vm1, %v1592_v38, %v1593_v42  ;;  %v1596_v61 = vsel %vm1022_vm1, %v1593_v42, %v1595_v50  ;;  %v1716_v56 = vrot.slane %v1668_v29, 4  ;;  %v1776_v62 = vadd.f32 %v3534_v19, %v1652_v9  ;;  %v3538_v29 = vld [vmem:[#allocation6_spill] sm:$0xff] }
 0x16d   : > { %v1648_v20 = vadd.f32 %v1594_v17, %v1524_v34  ;;  %v1649_v37 = vadd.f32 %v1596_v61, %v1525_v35  ;;  %v1717_v60 = vrot.slane %v1669_v0, 4  ;;  %v1719_v3 = vrot.slane %v1670_v44, 4  ;;  %v2120_v34 = vld [vmem:[%s3405_s3] ss:$0 sm:$0xff]  ;;  %v3536_v35 = vld [vmem:[#allocation32_spill] sm:$0xff] }
 0x16e   : > { %v1777_v43 = vadd.f32 %v3535_v8, %v1653_v10  ;;  %v1780_v40 = vadd.f32 %v2841_v25, %v1656_v36  ;;  %v1781_v55 = vadd.f32 %v2852_v6, %v1657_v45  ;;  %v1799_v12 = vadd.f32 %v3092_v31, %v1776_v62  ;;  %v3539_v42 = vld [vmem:[#allocation34_spill] sm:$0xff]  ;;  %v3541_v45 = vld [vmem:[#allocation36_spill] sm:$0xff]  ;;  %v3235_v17 = vld [vmem:[%s3406_s4 + $0x8] ss:$0 sm:$0xff] }
 0x16f   : > { %v1718_v32 = vsel %vm1147_vm2, %v1716_v56, %v1717_v60  ;;  %v1720_v22 = vsel %vm1147_vm2, %v1717_v60, %v1719_v3  ;;  %v661_v21 = vadd.f32 %v2120_v34, %v3536_v35  ;;  %v586_v5 = vadd.f32 %v2120_v34, %v3537_v23  ;;  %v889_v35 = vpop.permute.xlu0 %888 }
 0x170   : > { %v1772_v25 = vadd.f32 %v1718_v32, %v1648_v20  ;;  %v1773_v6 = vadd.f32 %v1720_v22, %v1649_v37  ;;  %v1800_v52 = vadd.f32 %v3092_v31, %v1777_v43  ;;  %v1803_v24 = vadd.f32 %v3092_v31, %v1780_v40  ;;  %1815 = vst [vmem:[%s3106_s14 + $0x20] sm:$0xff] %v1799_v12 }
 0x171   : > { %v1804_v1 = vadd.f32 %v3092_v31, %v1781_v55  ;;  %v928_v36 = vmul.f32 %v879_v14, %v661_v21  ;;  %v913_v38 = vmul.f32 %v3538_v29, %v586_v5  ;;  %v676_v50 = vadd.f32 %v2120_v34, %v3539_v42  ;;  %v894_v55 = vpop.permute.xlu1 %893  ;;  %v3545_v29 = vld [vmem:[#allocation27_spill] sm:$0xff] }
 0x172   : > { %v1795_v7 = vadd.f32 %v3092_v31, %v1772_v25  ;;  %v1796_v9 = vadd.f32 %v3092_v31, %v1773_v6  ;;  %1816 = vst [vmem:[%s3106_s14 + $0x28] sm:$0xff] %v1800_v52  ;;  %1819 = vst [vmem:[%s3106_s14 + $0x40] sm:$0xff] %v1803_v24  ;;  %v581_v10 = vadd.f32 %v2120_v34, %v3540_v28  ;;  %v3542_v21 = vrot.slane %v2950_v48, 2  ;;  %v3544_v6 = vld [vmem:[#allocation7_spill] sm:$0xff] }
 0x173   : > { %v671_v0 = vadd.f32 %v2120_v34, %v3541_v45  ;;  %1820 = vst [vmem:[%s3106_s14 + $0x48] sm:$0xff] %v1804_v1  ;;  %v1564_v44 = vmul.f32 %v2416_v63, %v928_v36  ;;  %v1688_v61 = vmul.f32 %v3235_v17, %v928_v36  ;;  %v991_v56 = vmul.f32 %v2399_v46, %v913_v38 }
 0x174   : > { %v1116_v19 = vmul.f32 %v2401_v47, %v913_v38  ;;  %1811 = vst [vmem:[%s3106_s14] sm:$0xff] %v1795_v7  ;;  %1812 = vst [vmem:[%s3106_s14 + $0x8] sm:$0xff] %v1796_v9  ;;  %v1271_v62 = vmul.f32 %v2410_v57, %v913_v38  ;;  %v1395_v20 = vmul.f32 %v2412_v58, %v913_v38  ;;  %v3543_v5 = vrot.slane %v2953_v30, 4 }
 0x175   : > { %v3245_v37 = vmul.f32 %v2416_v63, %v913_v38  ;;  %v3248_v60 = vmul.f32 %v3235_v17, %v913_v38  ;;  %v1625_v3 = vrot.slane %v1564_v44, 2  ;;  %v1749_v8 = vrot.slane %v1688_v61, 4 }
 0x176   : > { %v1051_v43 = vrot.slane %v991_v56, 2  ;;  %v1176_v40 = vrot.slane %v1116_v19, 4  ;;  %v1326_v12 = vrot.slane %v1271_v62, 2  ;;  %v1450_v32 = vrot.slane %v1395_v20, 4 }
 0x177   : > { %v1600_v22 = vrot.slane %v3245_v37, 2  ;;  %v1724_v34 = vrot.slane %v3248_v60, 4  ;;  %v1626_v23 = vsel %vm1022_vm1, %v3542_v21, %v1625_v3  ;;  %v1750_v14 = vsel %vm1147_vm2, %v3543_v5, %v1749_v8 }
 0x178   : > { %v931_v25 = vmul.f32 %v894_v55, %v676_v50  ;;  %v912_v52 = vmul.f32 %v3544_v6, %v581_v10  ;;  %v1661_v24 = vadd.f32 %v1626_v23, %v3005_v26  ;;  %v3260_v1 = vmul.f32 %v889_v35, %v671_v0 }
 0x179   : > { %v953_v36 = vmul.f32 %v2404_v51, %v2599_v13  ;;  %v3546_v38 = vrot.slane %v3545_v29, 2  ;;  %v3547_v48 = vrot.slane %v3061_v15, 2  ;;  %v3548_v19 = vrot.slane %v3020_v33, 2  ;;  %v3553_v29 = vld [vmem:[#allocation45_spill] sm:$0xff] }
 0x17a   : > { %v3270_v30 = vmul.f32 %v2416_v63, %v931_v25  ;;  %v3273_v50 = vmul.f32 %v3235_v17, %v931_v25  ;;  %v949_v7 = vmul.f32 %v2404_v51, %v912_v52  ;;  %v990_v26 = vmul.f32 %v2399_v46, %v912_v52 }
 0x17b   : > { %v1062_v42 = vsel %vm1022_vm1, %v3547_v48, %v3546_v38  ;;  %v1785_v9 = vadd.f32 %v1750_v14, %v1661_v24  ;;  %v1115_v13 = vmul.f32 %v2401_v47, %v912_v52  ;;  %v1231_v28 = vmul.f32 %v2408_v54, %v912_v52  ;;  %v3552_v24 = vld [vmem:[#allocation11_spill] sm:$0xff] }
 0x17c   : > { %v1270_v15 = vmul.f32 %v2410_v57, %v912_v52  ;;  %v1630_v10 = vrot.slane %v3270_v30, 2  ;;  %v1754_v45 = vrot.slane %v3273_v50, 4  ;;  %v1049_v0 = vrot.slane %v990_v26, 2  ;;  %v3554_v26 = vld [vmem:[#allocation28_spill] sm:$0xff] }
 0x17d   : > { %v1394_v44 = vmul.f32 %v2412_v58, %v912_v52  ;;  %v1808_v61 = vadd.f32 %v3092_v31, %v1785_v9  ;;  %v1174_v51 = vrot.slane %v1115_v13, 4  ;;  %v1247_v46 = vadd.f32 %v1231_v28, %v2904_v2  ;;  %v3557_v28 = vld [vmem:[#allocation37_spill] sm:$0xff] }
 0x17e   : > { %v1324_v56 = vrot.slane %v1270_v15, 2  ;;  %v1050_v47 = vsel %vm1022_vm1, %v3548_v19, %v1049_v0  ;;  %v1052_v62 = vsel %vm1022_vm1, %v1049_v0, %v1051_v43  ;;  %v1511_v20 = vmul.f32 %v2414_v59, %v912_v52  ;;  %v3559_v15 = vld [vmem:[#allocation12_spill] sm:$0xff] }
 0x17f   : > { %v1448_v57 = vrot.slane %v1394_v44, 4  ;;  %1824 = vst [vmem:[%s3106_s14 + $0x68] sm:$0xff] %v1808_v61  ;;  %v1089_v37 = vadd.f32 %v1050_v47, %v3035_v11  ;;  %v1090_v3 = vadd.f32 %v1052_v62, %v949_v7  ;;  %v3549_v58 = vrot.slane %v3023_v16, 4  ;;  %v3560_v44 = vld [vmem:[#allocation46_spill] sm:$0xff] }
 0x180   : > { %v1177_v2 = vsel %vm1147_vm2, %v1174_v51, %v1176_v40  ;;  %v3550_v55 = vrot.slane %v3029_v53, 2  ;;  %v1327_v35 = vsel %vm1022_vm1, %v1324_v56, %v1326_v12  ;;  %v3551_v43 = vrot.slane %v3032_v41, 4 }
 0x181   : > { %v1175_v8 = vsel %vm1147_vm2, %v3549_v58, %v1174_v51  ;;  %v1451_v23 = vsel %vm1147_vm2, %v1448_v57, %v1450_v32  ;;  %v1215_v5 = vadd.f32 %v1177_v2, %v1090_v3  ;;  %v1371_v14 = vadd.f32 %v1327_v35, %v1247_v46  ;;  %v3561_v51 = vld [vmem:[#allocation13_spill] sm:$0xff]  ;;  %v3567_v3 = vld [vmem:[#allocation14_spill] sm:$0xff] }
 0x182   : > { %v1325_v33 = vsel %vm1022_vm1, %v3550_v55, %v1324_v56  ;;  %v1449_v21 = vsel %vm1147_vm2, %v3551_v43, %v1448_v57  ;;  %v1214_v11 = vadd.f32 %v1175_v8, %v1089_v37  ;;  %v1527_v25 = vadd.f32 %v1511_v20, %v2912_v4  ;;  %v3566_v20 = vld [vmem:[#allocation40_spill] sm:$0xff]  ;;  %v3568_v2 = vld [vmem:[#allocation41_spill] sm:$0xff] }
 0x183   : > { %v1370_v16 = vadd.f32 %v1325_v33, %v3048_v18  ;;  %v1548_v40 = vmul.f32 %v2416_v63, %v912_v52  ;;  %v1672_v53 = vmul.f32 %v3235_v17, %v912_v52  ;;  %v1094_v6 = vadd.f32 %v1062_v42, %v953_v36  ;;  %v3558_v36 = vld [vmem:[#allocation38_spill] sm:$0xff]  ;;  %v3570_v43 = vld [vmem:[#allocation49_spill] sm:$0xff] }
 0x184   : > { %v1250_v12 = vadd.f32 %v3552_v24, %v1214_v11  ;;  %v1251_v41 = vadd.f32 %v3553_v29, %v1215_v5  ;;  %v1495_v48 = vadd.f32 %v1451_v23, %v1371_v14  ;;  %v3555_v9 = vrot.slane %v3554_v26, 4  ;;  %v3569_v33 = vld [vmem:[#allocation42_spill] sm:$0xff]  ;;  %v3572_v23 = vld [vmem:[#allocation23_spill] sm:$0xff]  ;;  %v3574_v5 = vld [vmem:[#allocation48_spill] sm:$0xff] }
 0x185   : > { %v1494_v38 = vadd.f32 %v1449_v21, %v1370_v16  ;;  %v1598_v7 = vrot.slane %v1548_v40, 2  ;;  %v1722_v32 = vrot.slane %v1672_v53, 4  ;;  %v3556_v18 = vrot.slane %v3067_v27, 4  ;;  %v3563_v27 = vld [vmem:[#allocation24_spill] sm:$0xff]  ;;  %v3576_v24 = vld [vmem:[#allocation43_spill] sm:$0xff]  ;;  %v3582_v26 = vld [vmem:[#allocation21_spill] sm:$0xff] }
 0x186   : > { %v1239_v4 = vmul.f32 %v2408_v54, %v2878_v39  ;;  %v1374_v52 = vadd.f32 %v3557_v28, %v1250_v12  ;;  %v1375_v42 = vadd.f32 %v3558_v36, %v1251_v41  ;;  %v1531_v61 = vadd.f32 %v3560_v44, %v1495_v48  ;;  %v3565_v39 = vld [vmem:[#allocation39_spill] sm:$0xff]  ;;  %v3575_v16 = vld [vmem:[#allocation20_spill] sm:$0xff]  ;;  %v3580_v48 = vld [vmem:[#allocation9_spill] sm:$0xff] }
 0x187   : > { %v1187_v13 = vsel %vm1147_vm2, %v3556_v18, %v3555_v9  ;;  %v1530_v0 = vadd.f32 %v3559_v15, %v1494_v38  ;;  %v3562_v46 = vrot.slane %v3561_v51, 2  ;;  %v1601_v19 = vsel %vm1022_vm1, %v1598_v7, %v1600_v22  ;;  %v3577_v12 = vld [vmem:[#allocation44_spill] sm:$0xff]  ;;  %v3583_v18 = vld [vmem:[#allocation2_spill] sm:$0xff] }
 0x188   : > { %v3564_v47 = vrot.slane %v3563_v27, 4  ;;  %v1725_v54 = vsel %vm1147_vm2, %v1722_v32, %v1724_v34  ;;  %v1498_v57 = vadd.f32 %v3565_v39, %v1374_v52  ;;  %v1499_v37 = vadd.f32 %v3566_v20, %v1375_v42 }
 0x189   : > { %v1599_v56 = vsel %vm1022_vm1, %v3562_v46, %v1598_v7  ;;  %v1651_v8 = vadd.f32 %v1601_v19, %v1527_v25  ;;  %v1654_v55 = vadd.f32 %v3568_v2, %v1530_v0  ;;  %v1655_v35 = vadd.f32 %v3569_v33, %v1531_v61  ;;  %v3584_v0 = vld [vmem:[#allocation8_spill] sm:$0xff]  ;;  %v3585_v61 = vld [vmem:[#allocation51_spill] sm:$0xff]  ;;  %v3586_v19 = vld [vmem:[#allocation29_spill] sm:$0xff] }
 0x18a   : > { %v1723_v62 = vsel %vm1147_vm2, %v3564_v47, %v1722_v32  ;;  %v1650_v58 = vadd.f32 %v1599_v56, %v3567_v3  ;;  %v1219_v22 = vadd.f32 %v1187_v13, %v1094_v6  ;;  %v3571_v21 = vrot.slane %v3570_v43, 2  ;;  %v3578_v6 = vld [vmem:[#allocation50_spill] sm:$0xff]  ;;  %v3587_v47 = vld [vmem:[#allocation3_spill] sm:$0xff] }
 0x18b   : > { %v3573_v11 = vrot.slane %v3572_v23, 2  ;;  %v1534_v34 = vadd.f32 %v3574_v5, %v1498_v57  ;;  %v1535_v14 = vadd.f32 %v3575_v16, %v1499_v37  ;;  %v1775_v53 = vadd.f32 %v1725_v54, %v1651_v8 }
 0x18c   : > { %v1774_v40 = vadd.f32 %v1723_v62, %v1650_v58  ;;  %v1778_v25 = vadd.f32 %v3576_v24, %v1654_v55  ;;  %v1779_v29 = vadd.f32 %v3577_v12, %v1655_v35  ;;  %v1255_v41 = vadd.f32 %v1239_v4, %v1219_v22 }
 0x18d   : > { %v1347_v60 = vsel %vm1022_vm1, %v3573_v11, %v3571_v21  ;;  %v3579_v38 = vrot.slane %v3578_v6, 4  ;;  %v3581_v7 = vrot.slane %v3580_v48, 4  ;;  %v1658_v9 = vadd.f32 %v3582_v26, %v1534_v34 }
 0x18e   : > { %v1659_v13 = vadd.f32 %v3583_v18, %v1535_v14  ;;  %v1797_v28 = vadd.f32 %v3092_v31, %v1774_v40  ;;  %v1798_v52 = vadd.f32 %v3092_v31, %v1775_v53  ;;  %v1801_v36 = vadd.f32 %v3092_v31, %v1778_v25 }
 0x18f   : > { %v1471_v32 = vsel %vm1147_vm2, %v3581_v7, %v3579_v38  ;;  %v1802_v4 = vadd.f32 %v3092_v31, %v1779_v29  ;;  %v1379_v42 = vadd.f32 %v1347_v60, %v1255_v41  ;;  %v1523_v15 = vmul.f32 %v2414_v59, %v3260_v1 }
 0x190   : > { %v1782_v44 = vadd.f32 %v3584_v0, %v1658_v9  ;;  %v1783_v51 = vadd.f32 %v3585_v61, %v1659_v13  ;;  %1813 = vst [vmem:[%s3106_s14 + $0x10] sm:$0xff] %v1797_v28  ;;  %1814 = vst [vmem:[%s3106_s14 + $0x18] sm:$0xff] %v1798_v52  ;;  %v1566_v46 = vmul.f32 %v2416_v63, %v3260_v1  ;;  %v1627_v27 = vrot.slane %v3586_v19, 2 }
 0x191   : > { %v1690_v56 = vmul.f32 %v3235_v17, %v3260_v1  ;;  %v1751_v62 = vrot.slane %v3587_v47, 4  ;;  %1817 = vst [vmem:[%s3106_s14 + $0x30] sm:$0xff] %v1801_v36  ;;  %1818 = vst [vmem:[%s3106_s14 + $0x38] sm:$0xff] %v1802_v4  ;;  %v1503_v59 = vadd.f32 %v1471_v32, %v1379_v42 }
 0x192   : > { %v1805_v54 = vadd.f32 %v3092_v31, %v1782_v44  ;;  %v1806_v39 = vadd.f32 %v3092_v31, %v1783_v51  ;;  %v1628_v57 = vrot.slane %v1566_v46, 2 }
 0x193   : > { %v1752_v20 = vrot.slane %v1690_v56, 4  ;;  %v1539_v37 = vadd.f32 %v1523_v15, %v1503_v59 }
 0x194   : > { %1821 = vst [vmem:[%s3106_s14 + $0x50] sm:$0xff] %v1805_v54  ;;  %1822 = vst [vmem:[%s3106_s14 + $0x58] sm:$0xff] %v1806_v39  ;;  %v1629_v63 = vsel %vm1022_vm1, %v1627_v27, %v1628_v57  ;;  %v1631_v17 = vsel %vm1022_vm1, %v1628_v57, %v1630_v10 }
 0x195   : > { %v1753_v1 = vsel %vm1147_vm2, %v1751_v62, %v1752_v20  ;;  %v1755_v3 = vsel %vm1147_vm2, %v1752_v20, %v1754_v45  ;;  %v1662_v58 = vadd.f32 %v1629_v63, %v3151_v49  ;;  %v1663_v8 = vadd.f32 %v1631_v17, %v1539_v37 }
 0x197   : > { %v1786_v2 = vadd.f32 %v1753_v1, %v1662_v58  ;;  %v1787_v55 = vadd.f32 %v1755_v3, %v1663_v8 }
 0x199   : > { %v1809_v33 = vadd.f32 %v3092_v31, %v1786_v2  ;;  %v1810_v35 = vadd.f32 %v3092_v31, %v1787_v55 }
 0x19b   : > { %1825 = vst [vmem:[%s3106_s14 + $0x70] sm:$0xff] %v1809_v33  ;;  %1826 = vst [vmem:[%s3106_s14 + $0x78] sm:$0xff] %v1810_v35 }
 0x19c PF: > { %s16_s25 = sadd.s32 1, %s2160_s25   ;;  %s3588_s21 = smov %s2152_s23 }
 0x19d   : > { %p13_p7 = scmp.ge.s32.totalorder %s16_s25, 6   ;;  %s3589_s22 = smov %s2156_s24 }
 0x19e   : > { %s3590_s23 = smov %s3593_s26  ;;  %s3591_s24 = smov %s3597_s27 }
 0x19f   :  { %15 = sbr.rel (!%p13_p7) target bundleno = 3 (0x3), region = 76 }

</bundles_post_ra>
